<compile_context>
chip_gen: v7x
topology: tpu7x:2x2x1
jax: 0.10.0
libtpu: 0.0.40
codegen_flags: <defaults>
</compile_context>

<pallas_src>
import functools

import jax
import jax.numpy as jnp
from jax.experimental import pallas as pl
from jax.experimental.pallas import tpu as pltpu

_INV_SQRT2 = 0.7071067811865476


def _gelu_exact(x):
    # Matches torch.nn.functional.gelu (default, erf-based).
    return 0.5 * x * (1.0 + jax.lax.erf(x * _INV_SQRT2))


# --------------------------------------------------------------------------
# Per-generation VMEM budget
# --------------------------------------------------------------------------
def _detect_vmem_bytes():
    """Physical VMEM per TensorCore (128 MiB v5e/v6e, 64 MiB v7x)."""
    try:
        info = pltpu.get_tpu_info()
        for attr in ("vmem_capacity_bytes", "vmem_size_bytes", "vmem_bytes"):
            v = getattr(info, attr, None)
            if v:
                return int(v)
    except Exception:
        pass
    return 64 * 1024 * 1024  # conservative fallback (v7x-sized)


_PHYS_VMEM = _detect_vmem_bytes()
# Scoped limit: 3/4 of physical (96 MiB on v5e/v6e, 48 MiB on v7x / fallback).
_VMEM_LIMIT = int(min((_PHYS_VMEM * 3) // 4, 96 * 1024 * 1024))
# Byte budget for live pipelined blocks + in-kernel intermediates.
_TILE_BUDGET = (_VMEM_LIMIT * 3) // 5


# --------------------------------------------------------------------------
# Pallas kernels
# --------------------------------------------------------------------------
def _mlp2_kernel(x_ref, w1_ref, b1_ref, w2_ref, b2_ref, o_ref):
    # y = gelu(x @ W1 + b1) @ W2 + b2 — fused 2-layer pointwise MLP.
    # Matmuls in bf16 (MXU), accumulate f32; bias/gelu in f32 (v5e-safe).
    x = x_ref[...].astype(jnp.bfloat16)
    h = jnp.dot(x, w1_ref[...], preferred_element_type=jnp.float32)
    h = _gelu_exact(h + b1_ref[...])
    y = jnp.dot(h.astype(jnp.bfloat16), w2_ref[...],
                preferred_element_type=jnp.float32)
    o_ref[...] = (y + b2_ref[...]).astype(o_ref.dtype)


def _fno_fuse_kernel(spec_ref, x_ref, w_ref, b_ref, o_ref):
    # out = gelu(spectral(x) + x @ W_skip + b_skip) — fused skip + add + gelu.
    y = jnp.dot(x_ref[...].astype(jnp.bfloat16), w_ref[...],
                preferred_element_type=jnp.float32)
    y = y + b_ref[...] + spec_ref[...].astype(jnp.float32)
    o_ref[...] = _gelu_exact(y).astype(o_ref.dtype)


def _spectral_mul_kernel(xr_ref, xi_ref, wr_ref, wi_ref, or_ref, oi_ref):
    # Per-mode complex channel mixing as 4 real batched MXU matmuls
    # (same FLOPs as the packed form, half the weight bytes):
    #   yr = xr@wr - xi@wi ,  yi = xr@wi + xi@wr
    xr = xr_ref[...].astype(jnp.bfloat16)
    xi = xi_ref[...].astype(jnp.bfloat16)
    wr = wr_ref[...]
    wi = wi_ref[...]
    dn = (((2,), (1,)), ((0,), (0,)))
    rr = jax.lax.dot_general(xr, wr, dn, preferred_element_type=jnp.float32)
    ii = jax.lax.dot_general(xi, wi, dn, preferred_element_type=jnp.float32)
    ri = jax.lax.dot_general(xr, wi, dn, preferred_element_type=jnp.float32)
    ir = jax.lax.dot_general(xi, wr, dn, preferred_element_type=jnp.float32)
    or_ref[...] = (rr - ii).astype(or_ref.dtype)
    oi_ref[...] = (ri + ir).astype(oi_ref.dtype)


# --------------------------------------------------------------------------
# Budget-driven tiling helpers
# --------------------------------------------------------------------------
def _ceil_to(v, m):
    return ((v + m - 1) // m) * m


def _row_tile(M, per_row_bytes, fixed_bytes):
    """Largest row tile (multiple of 8) fitting the VMEM budget; keeps >=2
    grid steps whenever M allows (v7x dual-TC floor, cheap on v5e/v6e)."""
    avail = max(_TILE_BUDGET - fixed_bytes, per_row_bytes * 64)
    tm = min(int(avail // per_row_bytes), 8192)
    tm = max(8, (tm // 8) * 8)
    if M > 8:
        tm = min(tm, max(8, _ceil_to((M + 1) // 2, 8)))  # >= 2 grid steps
    tm = min(tm, _ceil_to(M, 8))
    Mp = _ceil_to(M, tm)
    return tm, Mp


def _mode_tile(Mm, B, C):
    """Mode-axis tile from a byte budget (wr/wi bf16 + xr/xi/yr/yi f32,
    double-buffered); >=2 grid steps for v7x megacore; exact divisor of Mm."""
    per_mode = 2 * (2 * C * C * 2 + 4 * B * C * 4)
    cap = max(1, int(_TILE_BUDGET // per_mode))
    if Mm > 1:
        cap = min(cap, Mm // 2)
    cap = min(cap, Mm)
    for t in range(cap, 0, -1):
        if Mm % t == 0:
            return t
    return 1


def _pad_rows(a, Mp):
    M = a.shape[0]
    if Mp == M:
        return a
    return jnp.pad(a, ((0, Mp - M), (0, 0)))


# --------------------------------------------------------------------------
# Pallas wrappers
# --------------------------------------------------------------------------
def mlp2(x2d, w1, b1, w2, b2, out_dtype=jnp.bfloat16):
    """Fused two-layer pointwise MLP on (M, C) rows."""
    M, K1 = x2d.shape
    Km = w1.shape[1]
    N = w2.shape[1]
    dx = jnp.dtype(x2d.dtype).itemsize
    do = jnp.dtype(out_dtype).itemsize
    dw = jnp.dtype(w1.dtype).itemsize
    per_row = 2 * (K1 * dx + N * do) + (Km + N) * 4        # blocks + f32 intermediates
    fixed = 2 * ((K1 * Km + Km * N) * dw + (Km + N) * 4)   # weights + biases (2 bufs)
    tm, Mp = _row_tile(M, per_row, fixed)
    out = pl.pallas_call(
        _mlp2_kernel,
        out_shape=jax.ShapeDtypeStruct((Mp, N), out_dtype),
        grid_spec=pltpu.PrefetchScalarGridSpec(
            num_scalar_prefetch=0,
            grid=(Mp // tm,),
            in_specs=[pl.BlockSpec((tm, K1), lambda i: (i, 0)),
                      pl.BlockSpec((K1, Km), lambda i: (0, 0)),
                      pl.BlockSpec((1, Km), lambda i: (0, 0)),
                      pl.BlockSpec((Km, N), lambda i: (0, 0)),
                      pl.BlockSpec((1, N), lambda i: (0, 0))],
            out_specs=pl.BlockSpec((tm, N), lambda i: (i, 0))),
        compiler_params=pltpu.CompilerParams(
            dimension_semantics=("parallel",),
            vmem_limit_bytes=_VMEM_LIMIT),
    )(_pad_rows(x2d, Mp), w1, b1, w2, b2)
    return out if Mp == M else out[:M]


def fno_block_fuse(spec2d, x2d, w, b):
    """gelu(spec + x @ W_skip + b_skip) on (M, C) rows -> bf16 activations."""
    M, K = x2d.shape
    N = w.shape[1]
    ds = jnp.dtype(spec2d.dtype).itemsize
    dx = jnp.dtype(x2d.dtype).itemsize
    dw = jnp.dtype(w.dtype).itemsize
    per_row = 2 * (N * ds + K * dx + N * 2) + N * 4
    fixed = 2 * (K * N * dw + N * 4)
    tm, Mp = _row_tile(M, per_row, fixed)
    out = pl.pallas_call(
        _fno_fuse_kernel,
        out_shape=jax.ShapeDtypeStruct((Mp, N), jnp.bfloat16),
        grid_spec=pltpu.PrefetchScalarGridSpec(
            num_scalar_prefetch=0,
            grid=(Mp // tm,),
            in_specs=[pl.BlockSpec((tm, N), lambda i: (i, 0)),
                      pl.BlockSpec((tm, K), lambda i: (i, 0)),
                      pl.BlockSpec((K, N), lambda i: (0, 0)),
                      pl.BlockSpec((1, N), lambda i: (0, 0))],
            out_specs=pl.BlockSpec((tm, N), lambda i: (i, 0))),
        compiler_params=pltpu.CompilerParams(
            dimension_semantics=("parallel",),
            vmem_limit_bytes=_VMEM_LIMIT),
    )(_pad_rows(spec2d, Mp), _pad_rows(x2d, Mp), w, b)
    return out if Mp == M else out[:M]


def spectral_mul(xr, xi, wr, wi):
    """Batched per-mode complex mixing via 4 real MXU matmuls, tiled over modes."""
    Mm, B, C = xr.shape
    tmm = _mode_tile(Mm, B, C)
    # NOTE: if weight DMA remains exposed, pipeline_mode=pl.Buffered(3) on the
    # wr/wi specs can hide it further (watch the v7x VMEM budget).
    return pl.pallas_call(
        _spectral_mul_kernel,
        out_shape=(jax.ShapeDtypeStruct((Mm, B, C), jnp.float32),
                   jax.ShapeDtypeStruct((Mm, B, C), jnp.float32)),
        grid_spec=pltpu.PrefetchScalarGridSpec(
            num_scalar_prefetch=0,
            grid=(Mm // tmm,),
            in_specs=[pl.BlockSpec((tmm, B, C), lambda i: (i, 0, 0)),
                      pl.BlockSpec((tmm, B, C), lambda i: (i, 0, 0)),
                      pl.BlockSpec((tmm, C, C), lambda i: (i, 0, 0)),
                      pl.BlockSpec((tmm, C, C), lambda i: (i, 0, 0))],
            out_specs=[pl.BlockSpec((tmm, B, C), lambda i: (i, 0, 0)),
                       pl.BlockSpec((tmm, B, C), lambda i: (i, 0, 0))]),
        compiler_params=pltpu.CompilerParams(
            dimension_semantics=("parallel",),
            vmem_limit_bytes=_VMEM_LIMIT),
    )(xr, xi, wr, wi)


# --------------------------------------------------------------------------
# Model pieces (FFT / layout glue in plain JAX, hot paths in Pallas)
# --------------------------------------------------------------------------
def spectral_conv(h_l, B, H, W, C, m1, m2, wr, wi):
    """SpectralConv2d on channels-last flattened input (B*H*W, C) -> (B*H*W, C)."""
    x = h_l.reshape(B, H, W, C).astype(jnp.float32)               # channels-last
    # TODO(synk): rfft2/irfft2 have no Pallas/Mosaic primitive; they stay in XLA.
    x_ft = jnp.fft.rfft2(x, axes=(1, 2))                          # (B, H, Wf, C)
    Wf = W // 2 + 1

    def to_modes_first(c):                                        # (B,m1,m2,C)->(m1*m2,B,C)
        return jnp.transpose(c, (1, 2, 0, 3)).reshape(m1 * m2, B, C)

    xm = jnp.concatenate(
        [to_modes_first(x_ft[:, :m1, :m2, :]),
         to_modes_first(x_ft[:, H - m1:, :m2, :])], axis=0)       # (2*m1*m2, B, C)

    yr, yi = spectral_mul(jnp.real(xm), jnp.imag(xm), wr, wi)     # (2*m1*m2, B, C) x2
    out_c = jax.lax.complex(yr, yi)

    def from_modes_first(o):                                      # (m1*m2,B,C)->(B,m1,m2,C)
        return jnp.transpose(o.reshape(m1, m2, B, C), (2, 0, 1, 3))

    o1 = from_modes_first(out_c[: m1 * m2])
    o2 = from_modes_first(out_c[m1 * m2:])

    if H >= 2 * m1:
        mid = jnp.zeros((B, H - 2 * m1, m2, C), jnp.complex64)
        left = jnp.concatenate([o1, mid, o2], axis=1)             # (B, H, m2, C)
        right = jnp.zeros((B, H, Wf - m2, C), jnp.complex64)
        out_ft = jnp.concatenate([left, right], axis=2)           # (B, H, Wf, C)
    else:
        out_ft = jnp.zeros((B, H, Wf, C), jnp.complex64)
        out_ft = out_ft.at[:, :m1, :m2, :].set(o1)
        out_ft = out_ft.at[:, H - m1:, :m2, :].set(o2)

    y = jnp.fft.irfft2(out_ft, s=(H, W), axes=(1, 2))             # (B, H, W, C) f32
    return y.reshape(B * H * W, C)


def fno2d_forward(x, params, n_modes, hidden, out_ch):
    """x: (B, in_ch, H, W) NCHW, returns (B, out_ch, H, W). Use prepare_params() first."""
    B, Cin, H, W = x.shape
    m1, m2 = n_modes
    xl = jnp.transpose(x, (0, 2, 3, 1)).reshape(B * H * W, Cin)

    # p: uplift MLP (Conv1x1 -> gelu -> Conv1x1), fused; bf16 activations out.
    h = mlp2(xl, params['p1_w'], params['p1_b'], params['p2_w'], params['p2_b'],
             out_dtype=jnp.bfloat16)

    # FNO blocks
    for blk in params['blocks']:
        spec = spectral_conv(h, B, H, W, hidden, m1, m2, blk['wr'], blk['wi'])
        h = fno_block_fuse(spec, h, blk['sw'], blk['sb'])

    # q: projection MLP, output channels lane-padded at prep time; f32 out.
    y = mlp2(h, params['q1_w'], params['q1_b'], params['q2_w'], params['q2_b'],
             out_dtype=jnp.float32)
    y = y[:, :out_ch]
    return jnp.transpose(y.reshape(B, H, W, out_ch), (0, 3, 1, 2))


# --------------------------------------------------------------------------
# Parameter init (synthetic, f32 master copy) + one-time prep for the kernels
# --------------------------------------------------------------------------
def init_params(key, in_ch, out_ch, hidden, uplift, proj, n_layers, m1, m2):
    keys = jax.random.split(key, 4 + n_layers)

    def dense(k, cin, cout):
        kw, kb = jax.random.split(k)
        bound = 1.0 / (cin ** 0.5)
        w = jax.random.uniform(kw, (cin, cout), jnp.float32, -bound, bound)
        b = jax.random.uniform(kb, (1, cout), jnp.float32, -bound, bound)
        return w, b

    p = {}
    p['p1_w'], p['p1_b'] = dense(keys[0], in_ch, uplift)
    p['p2_w'], p['p2_b'] = dense(keys[1], uplift, hidden)
    p['q1_w'], p['q1_b'] = dense(keys[2], hidden, proj)
    p['q2_w'], p['q2_b'] = dense(keys[3], proj, out_ch)
    p['blocks'] = []
    scale = 1.0 / (hidden * hidden)
    for l in range(n_layers):
        k1, k2, k3 = jax.random.split(keys[4 + l], 3)
        wr = scale * jax.random.uniform(k1, (2 * m1 * m2, hidden, hidden), jnp.float32)
        wi = scale * jax.random.uniform(k2, (2 * m1 * m2, hidden, hidden), jnp.float32)
        sw, sb = dense(k3, hidden, hidden)
        p['blocks'].append({'wr': wr, 'wi': wi, 'sw': sw, 'sb': sb})
    return p


def prepare_params(params):
    """One-time prep (done OUTSIDE the per-step forward): cast matmul weights
    to bf16, keep biases f32, and pad the lane-sparse q output channels to a
    multiple of 8 so the final store is not a (tm, 1) masked vst."""
    bf = jnp.bfloat16
    q2_w, q2_b = params['q2_w'], params['q2_b']
    n = q2_w.shape[1]
    n_pad = max(8, _ceil_to(n, 8))
    if n_pad != n:
        q2_w = jnp.pad(q2_w, ((0, 0), (0, n_pad - n)))
        q2_b = jnp.pad(q2_b, ((0, 0), (0, n_pad - n)))
    return {
        'p1_w': params['p1_w'].astype(bf), 'p1_b': params['p1_b'],
        'p2_w': params['p2_w'].astype(bf), 'p2_b': params['p2_b'],
        'q1_w': params['q1_w'].astype(bf), 'q1_b': params['q1_b'],
        'q2_w': q2_w.astype(bf), 'q2_b': q2_b,
        'blocks': [{'wr': b['wr'].astype(bf), 'wi': b['wi'].astype(bf),
                    'sw': b['sw'].astype(bf), 'sb': b['sb']}
                   for b in params['blocks']],
    }


# --------------------------------------------------------------------------
# Pure-JAX f32 reference (for numerical verification only)
# --------------------------------------------------------------------------
def fno2d_reference(x, params, n_modes, hidden):
    B, Cin, H, W = x.shape
    m1, m2 = n_modes
    xl = jnp.transpose(x, (0, 2, 3, 1)).reshape(B * H * W, Cin)

    def pw(h, w, b, act):
        y = h @ w + b
        return _gelu_exact(y) if act else y

    h = pw(xl, params['p1_w'], params['p1_b'], True)
    h = pw(h, params['p2_w'], params['p2_b'], False)
    for blk in params['blocks']:
        xc = jnp.transpose(h.reshape(B, H, W, hidden), (0, 3, 1, 2))
        x_ft = jnp.fft.rfft2(xc, axes=(-2, -1))
        wm = jax.lax.complex(blk['wr'], blk['wi']).reshape(2, m1, m2, hidden, hidden)
        out_ft = jnp.zeros((B, hidden, H, W // 2 + 1), jnp.complex64)
        out_ft = out_ft.at[:, :, :m1, :m2].set(
            jnp.einsum('bixy,xyio->boxy', x_ft[:, :, :m1, :m2], wm[0]))
        out_ft = out_ft.at[:, :, H - m1:, :m2].set(
            jnp.einsum('bixy,xyio->boxy', x_ft[:, :, H - m1:, :m2], wm[1]))
        spec = jnp.fft.irfft2(out_ft, s=(H, W), axes=(-2, -1))
        spec_l = jnp.transpose(spec, (0, 2, 3, 1)).reshape(B * H * W, hidden)
        h = _gelu_exact(spec_l + h @ blk['sw'] + blk['sb'])
    y = pw(h, params['q1_w'], params['q1_b'], True)
    y = pw(y, params['q2_w'], params['q2_b'], False)
    out_ch = params['q2_w'].shape[1]
    return jnp.transpose(y.reshape(B, H, W, out_ch), (0, 3, 1, 2))


# --------------------------------------------------------------------------
if __name__ == "__main__":
    key = jax.random.PRNGKey(0)
    B, in_ch, H, W = 2, 3, 16, 16
    hidden, uplift, proj, out_ch = 16, 32, 32, 1
    n_modes = (4, 4)
    n_layers = 2

    kx, kp = jax.random.split(key)
    x = jax.random.normal(kx, (B, in_ch, H, W), jnp.float32)
    params = init_params(kp, in_ch, out_ch, hidden, uplift, proj, n_layers, *n_modes)
    prep = prepare_params(params)   # one-time bf16 cast + lane padding (outside jit)

    fwd = jax.jit(functools.partial(fno2d_forward, n_modes=n_modes, hidden=hidden,
                                    out_ch=out_ch))
    out = jax.block_until_ready(fwd(x, prep))

    ref = fno2d_reference(x, params, n_modes, hidden)
    assert out.shape == (B, out_ch, H, W)
    err = float(jnp.max(jnp.abs(out - ref)))
    # bf16 matmul operands (f32 accumulation) vs f32 reference: loosened tolerance.
    assert jnp.allclose(out, ref, atol=3e-2, rtol=3e-2), err
    print("KERNEL_OK")
</pallas_src>

<mosaic_0001>
module attributes {stable_mosaic.version = 11 : i64} {
  func.func @_mlp2_kernel(%arg0: i32, %arg1: memref<256x3xf32, #tpu.memory_space<vmem>>, %arg2: memref<3x32xbf16, #tpu.memory_space<vmem>>, %arg3: memref<1x32xf32, #tpu.memory_space<vmem>>, %arg4: memref<32x16xbf16, #tpu.memory_space<vmem>>, %arg5: memref<1x16xf32, #tpu.memory_space<vmem>>, %arg6: memref<256x16xbf16, #tpu.memory_space<vmem>>) attributes {dimension_semantics = [#tpu.dimension_semantics<parallel>], iteration_bounds = array<i64: 2>, scalar_prefetch = 0 : i64, scratch_operands = 0 : i64, tpu.core_type = #tpu.core_type<tc>, window_params = [{transform_indices = @transform_0, window_bounds = array<i64: 256, 3>}, {pipeline_mode = #tpu.pipeline_mode<synchronous>, transform_indices = @transform_1, window_bounds = array<i64: 3, 32>}, {pipeline_mode = #tpu.pipeline_mode<synchronous>, transform_indices = @transform_2, window_bounds = array<i64: 1, 32>}, {pipeline_mode = #tpu.pipeline_mode<synchronous>, transform_indices = @transform_3, window_bounds = array<i64: 32, 16>}, {pipeline_mode = #tpu.pipeline_mode<synchronous>, transform_indices = @transform_4, window_bounds = array<i64: 1, 16>}, {transform_indices = @transform_5, window_bounds = array<i64: 256, 16>}]} {
    %c0 = arith.constant 0 : index
    %c0_0 = arith.constant 0 : index
    %0 = vector.load %arg1[%c0, %c0_0] : memref<256x3xf32, #tpu.memory_space<vmem>>, vector<256x3xf32>
    %1 = arith.truncf %0 : vector<256x3xf32> to vector<256x3xbf16>
    %c0_1 = arith.constant 0 : index
    %c0_2 = arith.constant 0 : index
    %2 = vector.load %arg2[%c0_1, %c0_2] : memref<3x32xbf16, #tpu.memory_space<vmem>>, vector<3x32xbf16>
    %cst = arith.constant dense<0.000000e+00> : vector<256x32xf32>
    %3 = tpu.matmul %1, %2, %cst {dimension_numbers = #tpu.dot_dimension_numbers<[1], [0], [0], [1], [0, 0, 1, 1], [], []>} : vector<256x3xbf16>, vector<3x32xbf16>, vector<256x32xf32> -> vector<256x32xf32>
    %c0_3 = arith.constant 0 : index
    %c0_4 = arith.constant 0 : index
    %4 = vector.load %arg3[%c0_3, %c0_4] : memref<1x32xf32, #tpu.memory_space<vmem>>, vector<1x32xf32>
    %5 = vector.broadcast %4 : vector<1x32xf32> to vector<256x32xf32>
    %6 = arith.addf %3, %5 : vector<256x32xf32>
    %cst_5 = arith.constant 5.000000e-01 : f32
    %7 = vector.broadcast %cst_5 : f32 to vector<256x32xf32>
    %8 = arith.mulf %7, %6 : vector<256x32xf32>
    %cst_6 = arith.constant 0.707106769 : f32
    %9 = vector.broadcast %cst_6 : f32 to vector<256x32xf32>
    %10 = arith.mulf %6, %9 : vector<256x32xf32>
    %11 = math.erf %10 : vector<256x32xf32>
    %cst_7 = arith.constant 1.000000e+00 : f32
    %12 = vector.broadcast %cst_7 : f32 to vector<256x32xf32>
    %13 = arith.addf %12, %11 : vector<256x32xf32>
    %14 = arith.mulf %8, %13 : vector<256x32xf32>
    %15 = arith.truncf %14 : vector<256x32xf32> to vector<256x32xbf16>
    %c0_8 = arith.constant 0 : index
    %c0_9 = arith.constant 0 : index
    %16 = vector.load %arg4[%c0_8, %c0_9] : memref<32x16xbf16, #tpu.memory_space<vmem>>, vector<32x16xbf16>
    %cst_10 = arith.constant dense<0.000000e+00> : vector<256x16xf32>
    %17 = tpu.matmul %15, %16, %cst_10 {dimension_numbers = #tpu.dot_dimension_numbers<[1], [0], [0], [1], [0, 0, 1, 1], [], []>} : vector<256x32xbf16>, vector<32x16xbf16>, vector<256x16xf32> -> vector<256x16xf32>
    %c0_11 = arith.constant 0 : index
    %c0_12 = arith.constant 0 : index
    %18 = vector.load %arg5[%c0_11, %c0_12] : memref<1x16xf32, #tpu.memory_space<vmem>>, vector<1x16xf32>
    %19 = vector.broadcast %18 : vector<1x16xf32> to vector<256x16xf32>
    %20 = arith.addf %17, %19 : vector<256x16xf32>
    %21 = arith.truncf %20 : vector<256x16xf32> to vector<256x16xbf16>
    %c0_13 = arith.constant 0 : index
    %c0_14 = arith.constant 0 : index
    %22 = vector.load %arg6[%c0_13, %c0_14] : memref<256x16xbf16, #tpu.memory_space<vmem>>, vector<256x16xbf16>
    tpu.vector_store %arg6[%c0_13, %c0_14], %21 {strides = array<i32>} : memref<256x16xbf16, #tpu.memory_space<vmem>>, vector<256x16xbf16>,
    return
  }
  func.func @transform_0(%arg0: i32) -> (i32, i32) {
    %c0_i32 = arith.constant 0 : i32
    %c0_i32_0 = arith.constant 0 : i32
    return %arg0, %c0_i32 : i32, i32
  }
  func.func @transform_1(%arg0: i32) -> (i32, i32) {
    %c0_i32 = arith.constant 0 : i32
    %c0_i32_0 = arith.constant 0 : i32
    %c0_i32_1 = arith.constant 0 : i32
    return %c0_i32, %c0_i32_0 : i32, i32
  }
  func.func @transform_2(%arg0: i32) -> (i32, i32) {
    %c0_i32 = arith.constant 0 : i32
    %c0_i32_0 = arith.constant 0 : i32
    %c0_i32_1 = arith.constant 0 : i32
    return %c0_i32, %c0_i32_0 : i32, i32
  }
  func.func @transform_3(%arg0: i32) -> (i32, i32) {
    %c0_i32 = arith.constant 0 : i32
    %c0_i32_0 = arith.constant 0 : i32
    %c0_i32_1 = arith.constant 0 : i32
    return %c0_i32, %c0_i32_0 : i32, i32
  }
  func.func @transform_4(%arg0: i32) -> (i32, i32) {
    %c0_i32 = arith.constant 0 : i32
    %c0_i32_0 = arith.constant 0 : i32
    %c0_i32_1 = arith.constant 0 : i32
    return %c0_i32, %c0_i32_0 : i32, i32
  }
  func.func @transform_5(%arg0: i32) -> (i32, i32) {
    %c0_i32 = arith.constant 0 : i32
    %c0_i32_0 = arith.constant 0 : i32
    return %arg0, %c0_i32 : i32, i32
  }
}

module attributes {stable_mosaic.version = 11 : i64} {
  func.func @_spectral_mul_kernel(%arg0: i32, %arg1: memref<16x2x16xf32, #tpu.memory_space<vmem>>, %arg2: memref<16x2x16xf32, #tpu.memory_space<vmem>>, %arg3: memref<16x16x16xbf16, #tpu.memory_space<vmem>>, %arg4: memref<16x16x16xbf16, #tpu.memory_space<vmem>>, %arg5: memref<16x2x16xf32, #tpu.memory_space<vmem>>, %arg6: memref<16x2x16xf32, #tpu.memory_space<vmem>>) attributes {dimension_semantics = [#tpu.dimension_semantics<parallel>], iteration_bounds = array<i64: 2>, scalar_prefetch = 0 : i64, scratch_operands = 0 : i64, tpu.core_type = #tpu.core_type<tc>, window_params = [{transform_indices = @transform_0, window_bounds = array<i64: 16, 2, 16>}, {transform_indices = @transform_1, window_bounds = array<i64: 16, 2, 16>}, {transform_indices = @transform_2, window_bounds = array<i64: 16, 16, 16>}, {transform_indices = @transform_3, window_bounds = array<i64: 16, 16, 16>}, {transform_indices = @transform_4, window_bounds = array<i64: 16, 2, 16>}, {transform_indices = @transform_5, window_bounds = array<i64: 16, 2, 16>}]} {
    %c0 = arith.constant 0 : index
    %c0_0 = arith.constant 0 : index
    %c0_1 = arith.constant 0 : index
    %0 = vector.load %arg1[%c0, %c0_0, %c0_1] : memref<16x2x16xf32, #tpu.memory_space<vmem>>, vector<16x2x16xf32>
    %1 = arith.truncf %0 : vector<16x2x16xf32> to vector<16x2x16xbf16>
    %c0_2 = arith.constant 0 : index
    %c0_3 = arith.constant 0 : index
    %c0_4 = arith.constant 0 : index
    %2 = vector.load %arg2[%c0_2, %c0_3, %c0_4] : memref<16x2x16xf32, #tpu.memory_space<vmem>>, vector<16x2x16xf32>
    %3 = arith.truncf %2 : vector<16x2x16xf32> to vector<16x2x16xbf16>
    %c0_5 = arith.constant 0 : index
    %c0_6 = arith.constant 0 : index
    %c0_7 = arith.constant 0 : index
    %4 = vector.load %arg3[%c0_5, %c0_6, %c0_7] : memref<16x16x16xbf16, #tpu.memory_space<vmem>>, vector<16x16x16xbf16>
    %c0_8 = arith.constant 0 : index
    %c0_9 = arith.constant 0 : index
    %c0_10 = arith.constant 0 : index
    %5 = vector.load %arg4[%c0_8, %c0_9, %c0_10] : memref<16x16x16xbf16, #tpu.memory_space<vmem>>, vector<16x16x16xbf16>
    %cst = arith.constant dense<0.000000e+00> : vector<16x2x16xf32>
    %6 = tpu.matmul %1, %4, %cst {dimension_numbers = #tpu.dot_dimension_numbers<[2], [1], [1], [2], [0, 0, 0, 1, 1, 2], [0], [0]>} : vector<16x2x16xbf16>, vector<16x16x16xbf16>, vector<16x2x16xf32> -> vector<16x2x16xf32>
    %cst_11 = arith.constant dense<0.000000e+00> : vector<16x2x16xf32>
    %7 = tpu.matmul %3, %5, %cst_11 {dimension_numbers = #tpu.dot_dimension_numbers<[2], [1], [1], [2], [0, 0, 0, 1, 1, 2], [0], [0]>} : vector<16x2x16xbf16>, vector<16x16x16xbf16>, vector<16x2x16xf32> -> vector<16x2x16xf32>
    %cst_12 = arith.constant dense<0.000000e+00> : vector<16x2x16xf32>
    %8 = tpu.matmul %1, %5, %cst_12 {dimension_numbers = #tpu.dot_dimension_numbers<[2], [1], [1], [2], [0, 0, 0, 1, 1, 2], [0], [0]>} : vector<16x2x16xbf16>, vector<16x16x16xbf16>, vector<16x2x16xf32> -> vector<16x2x16xf32>
    %cst_13 = arith.constant dense<0.000000e+00> : vector<16x2x16xf32>
    %9 = tpu.matmul %3, %4, %cst_13 {dimension_numbers = #tpu.dot_dimension_numbers<[2], [1], [1], [2], [0, 0, 0, 1, 1, 2], [0], [0]>} : vector<16x2x16xbf16>, vector<16x16x16xbf16>, vector<16x2x16xf32> -> vector<16x2x16xf32>
    %10 = arith.subf %6, %7 : vector<16x2x16xf32>
    %c0_14 = arith.constant 0 : index
    %c0_15 = arith.constant 0 : index
    %c0_16 = arith.constant 0 : index
    %11 = vector.load %arg5[%c0_14, %c0_15, %c0_16] : memref<16x2x16xf32, #tpu.memory_space<vmem>>, vector<16x2x16xf32>
    tpu.vector_store %arg5[%c0_14, %c0_15, %c0_16], %10 {strides = array<i32>} : memref<16x2x16xf32, #tpu.memory_space<vmem>>, vector<16x2x16xf32>,
    %12 = arith.addf %8, %9 : vector<16x2x16xf32>
    %c0_17 = arith.constant 0 : index
    %c0_18 = arith.constant 0 : index
    %c0_19 = arith.constant 0 : index
    %13 = vector.load %arg6[%c0_17, %c0_18, %c0_19] : memref<16x2x16xf32, #tpu.memory_space<vmem>>, vector<16x2x16xf32>
    tpu.vector_store %arg6[%c0_17, %c0_18, %c0_19], %12 {strides = array<i32>} : memref<16x2x16xf32, #tpu.memory_space<vmem>>, vector<16x2x16xf32>,
    return
  }
  func.func @transform_0(%arg0: i32) -> (i32, i32, i32) {
    %c0_i32 = arith.constant 0 : i32
    %c0_i32_0 = arith.constant 0 : i32
    %c0_i32_1 = arith.constant 0 : i32
    return %arg0, %c0_i32, %c0_i32_0 : i32, i32, i32
  }
  func.func @transform_1(%arg0: i32) -> (i32, i32, i32) {
    %c0_i32 = arith.constant 0 : i32
    %c0_i32_0 = arith.constant 0 : i32
    %c0_i32_1 = arith.constant 0 : i32
    return %arg0, %c0_i32, %c0_i32_0 : i32, i32, i32
  }
  func.func @transform_2(%arg0: i32) -> (i32, i32, i32) {
    %c0_i32 = arith.constant 0 : i32
    %c0_i32_0 = arith.constant 0 : i32
    %c0_i32_1 = arith.constant 0 : i32
    return %arg0, %c0_i32, %c0_i32_0 : i32, i32, i32
  }
  func.func @transform_3(%arg0: i32) -> (i32, i32, i32) {
    %c0_i32 = arith.constant 0 : i32
    %c0_i32_0 = arith.constant 0 : i32
    %c0_i32_1 = arith.constant 0 : i32
    return %arg0, %c0_i32, %c0_i32_0 : i32, i32, i32
  }
  func.func @transform_4(%arg0: i32) -> (i32, i32, i32) {
    %c0_i32 = arith.constant 0 : i32
    %c0_i32_0 = arith.constant 0 : i32
    %c0_i32_1 = arith.constant 0 : i32
    return %arg0, %c0_i32, %c0_i32_0 : i32, i32, i32
  }
  func.func @transform_5(%arg0: i32) -> (i32, i32, i32) {
    %c0_i32 = arith.constant 0 : i32
    %c0_i32_0 = arith.constant 0 : i32
    %c0_i32_1 = arith.constant 0 : i32
    return %arg0, %c0_i32, %c0_i32_0 : i32, i32, i32
  }
}

module attributes {stable_mosaic.version = 11 : i64} {
  func.func @_fno_fuse_kernel(%arg0: i32, %arg1: memref<256x16xf32, #tpu.memory_space<vmem>>, %arg2: memref<256x16xbf16, #tpu.memory_space<vmem>>, %arg3: memref<16x16xbf16, #tpu.memory_space<vmem>>, %arg4: memref<1x16xf32, #tpu.memory_space<vmem>>, %arg5: memref<256x16xbf16, #tpu.memory_space<vmem>>) attributes {dimension_semantics = [#tpu.dimension_semantics<parallel>], iteration_bounds = array<i64: 2>, scalar_prefetch = 0 : i64, scratch_operands = 0 : i64, tpu.core_type = #tpu.core_type<tc>, window_params = [{transform_indices = @transform_0, window_bounds = array<i64: 256, 16>}, {transform_indices = @transform_1, window_bounds = array<i64: 256, 16>}, {pipeline_mode = #tpu.pipeline_mode<synchronous>, transform_indices = @transform_2, window_bounds = array<i64: 16, 16>}, {pipeline_mode = #tpu.pipeline_mode<synchronous>, transform_indices = @transform_3, window_bounds = array<i64: 1, 16>}, {transform_indices = @transform_4, window_bounds = array<i64: 256, 16>}]} {
    %c0 = arith.constant 0 : index
    %c0_0 = arith.constant 0 : index
    %0 = vector.load %arg2[%c0, %c0_0] : memref<256x16xbf16, #tpu.memory_space<vmem>>, vector<256x16xbf16>
    %c0_1 = arith.constant 0 : index
    %c0_2 = arith.constant 0 : index
    %1 = vector.load %arg3[%c0_1, %c0_2] : memref<16x16xbf16, #tpu.memory_space<vmem>>, vector<16x16xbf16>
    %cst = arith.constant dense<0.000000e+00> : vector<256x16xf32>
    %2 = tpu.matmul %0, %1, %cst {dimension_numbers = #tpu.dot_dimension_numbers<[1], [0], [0], [1], [0, 0, 1, 1], [], []>} : vector<256x16xbf16>, vector<16x16xbf16>, vector<256x16xf32> -> vector<256x16xf32>
    %c0_3 = arith.constant 0 : index
    %c0_4 = arith.constant 0 : index
    %3 = vector.load %arg4[%c0_3, %c0_4] : memref<1x16xf32, #tpu.memory_space<vmem>>, vector<1x16xf32>
    %4 = vector.broadcast %3 : vector<1x16xf32> to vector<256x16xf32>
    %5 = arith.addf %2, %4 : vector<256x16xf32>
    %c0_5 = arith.constant 0 : index
    %c0_6 = arith.constant 0 : index
    %6 = vector.load %arg1[%c0_5, %c0_6] : memref<256x16xf32, #tpu.memory_space<vmem>>, vector<256x16xf32>
    %7 = arith.addf %5, %6 : vector<256x16xf32>
    %cst_7 = arith.constant 5.000000e-01 : f32
    %8 = vector.broadcast %cst_7 : f32 to vector<256x16xf32>
    %9 = arith.mulf %8, %7 : vector<256x16xf32>
    %cst_8 = arith.constant 0.707106769 : f32
    %10 = vector.broadcast %cst_8 : f32 to vector<256x16xf32>
    %11 = arith.mulf %7, %10 : vector<256x16xf32>
    %12 = math.erf %11 : vector<256x16xf32>
    %cst_9 = arith.constant 1.000000e+00 : f32
    %13 = vector.broadcast %cst_9 : f32 to vector<256x16xf32>
    %14 = arith.addf %13, %12 : vector<256x16xf32>
    %15 = arith.mulf %9, %14 : vector<256x16xf32>
    %16 = arith.truncf %15 : vector<256x16xf32> to vector<256x16xbf16>
    %c0_10 = arith.constant 0 : index
    %c0_11 = arith.constant 0 : index
    %17 = vector.load %arg5[%c0_10, %c0_11] : memref<256x16xbf16, #tpu.memory_space<vmem>>, vector<256x16xbf16>
    tpu.vector_store %arg5[%c0_10, %c0_11], %16 {strides = array<i32>} : memref<256x16xbf16, #tpu.memory_space<vmem>>, vector<256x16xbf16>,
    return
  }
  func.func @transform_0(%arg0: i32) -> (i32, i32) {
    %c0_i32 = arith.constant 0 : i32
    %c0_i32_0 = arith.constant 0 : i32
    return %arg0, %c0_i32 : i32, i32
  }
  func.func @transform_1(%arg0: i32) -> (i32, i32) {
    %c0_i32 = arith.constant 0 : i32
    %c0_i32_0 = arith.constant 0 : i32
    return %arg0, %c0_i32 : i32, i32
  }
  func.func @transform_2(%arg0: i32) -> (i32, i32) {
    %c0_i32 = arith.constant 0 : i32
    %c0_i32_0 = arith.constant 0 : i32
    %c0_i32_1 = arith.constant 0 : i32
    return %c0_i32, %c0_i32_0 : i32, i32
  }
  func.func @transform_3(%arg0: i32) -> (i32, i32) {
    %c0_i32 = arith.constant 0 : i32
    %c0_i32_0 = arith.constant 0 : i32
    %c0_i32_1 = arith.constant 0 : i32
    return %c0_i32, %c0_i32_0 : i32, i32
  }
  func.func @transform_4(%arg0: i32) -> (i32, i32) {
    %c0_i32 = arith.constant 0 : i32
    %c0_i32_0 = arith.constant 0 : i32
    return %arg0, %c0_i32 : i32, i32
  }
}

module attributes {stable_mosaic.version = 11 : i64} {
  func.func @_mlp2_kernel(%arg0: i32, %arg1: memref<256x16xbf16, #tpu.memory_space<vmem>>, %arg2: memref<16x32xbf16, #tpu.memory_space<vmem>>, %arg3: memref<1x32xf32, #tpu.memory_space<vmem>>, %arg4: memref<32x8xbf16, #tpu.memory_space<vmem>>, %arg5: memref<1x8xf32, #tpu.memory_space<vmem>>, %arg6: memref<256x8xf32, #tpu.memory_space<vmem>>) attributes {dimension_semantics = [#tpu.dimension_semantics<parallel>], iteration_bounds = array<i64: 2>, scalar_prefetch = 0 : i64, scratch_operands = 0 : i64, tpu.core_type = #tpu.core_type<tc>, window_params = [{transform_indices = @transform_0, window_bounds = array<i64: 256, 16>}, {pipeline_mode = #tpu.pipeline_mode<synchronous>, transform_indices = @transform_1, window_bounds = array<i64: 16, 32>}, {pipeline_mode = #tpu.pipeline_mode<synchronous>, transform_indices = @transform_2, window_bounds = array<i64: 1, 32>}, {pipeline_mode = #tpu.pipeline_mode<synchronous>, transform_indices = @transform_3, window_bounds = array<i64: 32, 8>}, {pipeline_mode = #tpu.pipeline_mode<synchronous>, transform_indices = @transform_4, window_bounds = array<i64: 1, 8>}, {transform_indices = @transform_5, window_bounds = array<i64: 256, 8>}]} {
    %c0 = arith.constant 0 : index
    %c0_0 = arith.constant 0 : index
    %0 = vector.load %arg1[%c0, %c0_0] : memref<256x16xbf16, #tpu.memory_space<vmem>>, vector<256x16xbf16>
    %c0_1 = arith.constant 0 : index
    %c0_2 = arith.constant 0 : index
    %1 = vector.load %arg2[%c0_1, %c0_2] : memref<16x32xbf16, #tpu.memory_space<vmem>>, vector<16x32xbf16>
    %cst = arith.constant dense<0.000000e+00> : vector<256x32xf32>
    %2 = tpu.matmul %0, %1, %cst {dimension_numbers = #tpu.dot_dimension_numbers<[1], [0], [0], [1], [0, 0, 1, 1], [], []>} : vector<256x16xbf16>, vector<16x32xbf16>, vector<256x32xf32> -> vector<256x32xf32>
    %c0_3 = arith.constant 0 : index
    %c0_4 = arith.constant 0 : index
    %3 = vector.load %arg3[%c0_3, %c0_4] : memref<1x32xf32, #tpu.memory_space<vmem>>, vector<1x32xf32>
    %4 = vector.broadcast %3 : vector<1x32xf32> to vector<256x32xf32>
    %5 = arith.addf %2, %4 : vector<256x32xf32>
    %cst_5 = arith.constant 5.000000e-01 : f32
    %6 = vector.broadcast %cst_5 : f32 to vector<256x32xf32>
    %7 = arith.mulf %6, %5 : vector<256x32xf32>
    %cst_6 = arith.constant 0.707106769 : f32
    %8 = vector.broadcast %cst_6 : f32 to vector<256x32xf32>
    %9 = arith.mulf %5, %8 : vector<256x32xf32>
    %10 = math.erf %9 : vector<256x32xf32>
    %cst_7 = arith.constant 1.000000e+00 : f32
    %11 = vector.broadcast %cst_7 : f32 to vector<256x32xf32>
    %12 = arith.addf %11, %10 : vector<256x32xf32>
    %13 = arith.mulf %7, %12 : vector<256x32xf32>
    %14 = arith.truncf %13 : vector<256x32xf32> to vector<256x32xbf16>
    %c0_8 = arith.constant 0 : index
    %c0_9 = arith.constant 0 : index
    %15 = vector.load %arg4[%c0_8, %c0_9] : memref<32x8xbf16, #tpu.memory_space<vmem>>, vector<32x8xbf16>
    %cst_10 = arith.constant dense<0.000000e+00> : vector<256x8xf32>
    %16 = tpu.matmul %14, %15, %cst_10 {dimension_numbers = #tpu.dot_dimension_numbers<[1], [0], [0], [1], [0, 0, 1, 1], [], []>} : vector<256x32xbf16>, vector<32x8xbf16>, vector<256x8xf32> -> vector<256x8xf32>
    %c0_11 = arith.constant 0 : index
    %c0_12 = arith.constant 0 : index
    %17 = vector.load %arg5[%c0_11, %c0_12] : memref<1x8xf32, #tpu.memory_space<vmem>>, vector<1x8xf32>
    %18 = vector.broadcast %17 : vector<1x8xf32> to vector<256x8xf32>
    %19 = arith.addf %16, %18 : vector<256x8xf32>
    %c0_13 = arith.constant 0 : index
    %c0_14 = arith.constant 0 : index
    %20 = vector.load %arg6[%c0_13, %c0_14] : memref<256x8xf32, #tpu.memory_space<vmem>>, vector<256x8xf32>
    tpu.vector_store %arg6[%c0_13, %c0_14], %19 {strides = array<i32>} : memref<256x8xf32, #tpu.memory_space<vmem>>, vector<256x8xf32>,
    return
  }
  func.func @transform_0(%arg0: i32) -> (i32, i32) {
    %c0_i32 = arith.constant 0 : i32
    %c0_i32_0 = arith.constant 0 : i32
    return %arg0, %c0_i32 : i32, i32
  }
  func.func @transform_1(%arg0: i32) -> (i32, i32) {
    %c0_i32 = arith.constant 0 : i32
    %c0_i32_0 = arith.constant 0 : i32
    %c0_i32_1 = arith.constant 0 : i32
    return %c0_i32, %c0_i32_0 : i32, i32
  }
  func.func @transform_2(%arg0: i32) -> (i32, i32) {
    %c0_i32 = arith.constant 0 : i32
    %c0_i32_0 = arith.constant 0 : i32
    %c0_i32_1 = arith.constant 0 : i32
    return %c0_i32, %c0_i32_0 : i32, i32
  }
  func.func @transform_3(%arg0: i32) -> (i32, i32) {
    %c0_i32 = arith.constant 0 : i32
    %c0_i32_0 = arith.constant 0 : i32
    %c0_i32_1 = arith.constant 0 : i32
    return %c0_i32, %c0_i32_0 : i32, i32
  }
  func.func @transform_4(%arg0: i32) -> (i32, i32) {
    %c0_i32 = arith.constant 0 : i32
    %c0_i32_0 = arith.constant 0 : i32
    %c0_i32_1 = arith.constant 0 : i32
    return %c0_i32, %c0_i32_0 : i32, i32
  }
  func.func @transform_5(%arg0: i32) -> (i32, i32) {
    %c0_i32 = arith.constant 0 : i32
    %c0_i32_0 = arith.constant 0 : i32
    return %arg0, %c0_i32 : i32, i32
  }
}

</mosaic_0001>

<bundles_post_ra>
// kernel: fno2d_forward.6
= control target key start
LH: loop header
LB: loop body
LE: loop exit
PB: predicated region body
PF: predicated region fallthrough
CT: control target
= control target key end

     0   :  { %s1458_s18 = smov 0   ;;  %s1750_s0 = inlined_call_operand.vmem [shape: f32[512,3], index: 0, kind: input, shape index: {}]   ;;  %s1751_s1 = inlined_call_operand.vmem [shape: bf16[3,32], index: 1, kind: input, shape index: {}]   ;;  %s1752_s2 = inlined_call_operand.vmem [shape: f32[1,32], index: 2, kind: input, shape index: {}]   ;;  %s1753_s3 = inlined_call_operand.vmem [shape: bf16[32,16], index: 3, kind: input, shape index: {}]   ;;  %s1754_s4 = inlined_call_operand.vmem [shape: f32[1,16], index: 4, kind: input, shape index: {}]   ;;  %s1755_s5 = inlined_call_operand.vmem [shape: bf16[512,16], index: 5, kind: output, shape index: {}]  }
   0x1 LB: > { %s1128_s19 = sadd.s32 4294967295, %s1425_s18   ;;  %p1132_p0 = scmp.ge.s32.totalorder %s1425_s18, 1  ;;  %s1425_s18 = sphi %s1458_s18, %s15_s18  }
   0x2   : > { %p188_p1 = scmp.lt.s32.totalorder %s1425_s18, 3 }
   0x4   : > { %p189_p2 = pnand %p1132_p0, %p188_p1 }
   0x5   : > { %v277_v0 = vld [vmem:[%s1751_s1] sm:$0x3] (!%p189_p2)  ;;  %vm334_vm0 = vcmask (!%p189_p2), 1040384   ;;  %vm335_vm1 = vcmask (!%p189_p2), 1041408   ;;  %s1133_s22 = sshll.u32 (!%p189_p2), %s1128_s19, 5  ;;  %v1427_v1 = vmov (!%p189_p2), 65535  }
   0x6   : > { %192 = sbr.rel (%p189_p2) target bundleno = 533 (0x215), region = 40  ;;  %v336_v2 = vsel (!%p189_p2), %vm334_vm0, 4294967295, %v1427_v1  ;;  %p217_p3 = scmp.lt.s32.totalorder (!%p189_p2), %s1133_s22, 63  ;;  %vm285_vm2 = vcmask (!%p189_p2), 23552   ;;  %v1353_v53 = vld [vmem:[%s1753_s3] sm:$0xff] (!%p189_p2)   ;;  %v1354_v54 = vld [vmem:[%s1753_s3 + $0x8] sm:$0xff] (!%p189_p2)  }
   0x7   : > { %v337_v3 = vsel (!%p189_p2), %vm335_vm1, %v336_v2, 0  ;;  %1308 = vmatprep.subr.bf16.mxu1 (!%p189_p2), %v1353_v53  ;;  %v1534_v55 = vld [vmem:[%s1752_s2] ss:$0 sm:$0xff] (!%p189_p2)  ;;  %vm701_vm3 = vcmask (!%p189_p2), 261120   ;;  %vm1039_vm4 = vcmask (!%p189_p2), 125952  }
   0x8   : > { %v339_v4 = vand.u32 (!%p189_p2), %v337_v3, %v277_v0  ;;  %1309 = vmatpush3.bf16.msra.mxu1 (!%p189_p2), %v1353_v53 }
   0x9   : > { %1310 = vmatprep.subr.bf16.mxu1 (!%p189_p2), %v1354_v54 }
   0xa   : > { %1274 = vmatprep.subr.bf16.mxu0 (!%p189_p2), %v339_v4 }
   0xb   : > { %1275 = vmatpush3.bf16.msra.mxu0 (!%p189_p2), %v339_v4 }
   0xc   : > { %1311 = vmatpush3.bf16.msra.mxu1 (!%p189_p2), %v1354_v54 }
   0xd   : > { %s1757_s22 = smov (!%p217_p3, %s1133_s22), 63 }
   0xe   : > { %s1134_s23 = sshll.u32 %s1757_s22, 3  ;;  %s1136_s10 = sshll.u32 %s1757_s22, 2 }
   0xf   : > { %s1475_s26 = scalar_lea.vmem %s1750_s0, %s1134_s23  ;;  %s1650_s13 = scalar_lea.vmem %s1755_s5, %s1136_s10 }
  0x10   : > { %v229_v5 = vld [vmem:[%s1475_s26] sm:$0xff]  ;;  %v230_v6 = vld [vmem:[%s1475_s26 + $0x8] sm:$0xff]  ;;  %v231_v7 = vld [vmem:[%s1475_s26 + $0x10] sm:$0xff] }
  0x11   : > { %v261_v8 = vpack.c.bf16 %v230_v6, %v229_v5  ;;  %v232_v9 = vld [vmem:[%s1475_s26 + $0x18] sm:$0xff]  ;;  %v233_v10 = vld [vmem:[%s1475_s26 + $0x20] sm:$0xff]  ;;  %v234_v11 = vld [vmem:[%s1475_s26 + $0x28] sm:$0xff] }
  0x12   : > { %v262_v12 = vpack.c.bf16 %v232_v9, %v231_v7  ;;  %v263_v13 = vpack.c.bf16 %v234_v11, %v233_v10  ;;  %v235_v14 = vld [vmem:[%s1475_s26 + $0x30] sm:$0xff]  ;;  %v236_v15 = vld [vmem:[%s1475_s26 + $0x38] sm:$0xff]  ;;  %v237_v16 = vld [vmem:[%s1475_s26 + $0x40] sm:$0xff] }
  0x13   : > { %1276 = vmatprep.mubr.msk.bf16.mxu0 %vm285_vm2, %v261_v8  ;;  %v238_v17 = vld [vmem:[%s1475_s26 + $0x48] sm:$0xff]  ;;  %v264_v18 = vpack.c.bf16 %v236_v15, %v235_v14  ;;  %v239_v20 = vld [vmem:[%s1475_s26 + $0x50] sm:$0xff]  ;;  %v240_v21 = vld [vmem:[%s1475_s26 + $0x58] sm:$0xff] }
  0x14   : > { %1277 = vmatmul.mubr.msk.bf16.vlgmr.msra.gmra.mrb[0].mxu0 %vm285_vm2, %v262_v12  ;;  %v265_v19 = vpack.c.bf16 %v238_v17, %v237_v16  ;;  %v241_v22 = vld [vmem:[%s1475_s26 + $0x60] sm:$0xff]  ;;  %v242_v23 = vld [vmem:[%s1475_s26 + $0x68] sm:$0xff]  ;;  %v266_v24 = vpack.c.bf16 %v240_v21, %v239_v20  ;;  %v243_v26 = vld [vmem:[%s1475_s26 + $0x70] sm:$0xff] }
  0x15   : > { %1280 = vmatprep.mubr.msk.bf16.mxu0 %vm285_vm2, %v263_v13  ;;  %v267_v25 = vpack.c.bf16 %v242_v23, %v241_v22  ;;  %v244_v27 = vld [vmem:[%s1475_s26 + $0x78] sm:$0xff]  ;;  %v245_v28 = vld [vmem:[%s1475_s26 + $0x80] sm:$0xff]  ;;  %v246_v29 = vld [vmem:[%s1475_s26 + $0x88] sm:$0xff] }
  0x16   : > { %v268_v30 = vpack.c.bf16 %v244_v27, %v243_v26  ;;  %v269_v31 = vpack.c.bf16 %v246_v29, %v245_v28  ;;  %v247_v32 = vld [vmem:[%s1475_s26 + $0x90] sm:$0xff]  ;;  %v248_v33 = vld [vmem:[%s1475_s26 + $0x98] sm:$0xff]  ;;  %v249_v34 = vld [vmem:[%s1475_s26 + $0xa0] sm:$0xff] }
  0x17   : > { %v250_v35 = vld [vmem:[%s1475_s26 + $0xa8] sm:$0xff]  ;;  %v270_v36 = vpack.c.bf16 %v248_v33, %v247_v32  ;;  %v251_v38 = vld [vmem:[%s1475_s26 + $0xb0] sm:$0xff]  ;;  %v252_v39 = vld [vmem:[%s1475_s26 + $0xb8] sm:$0xff] }
  0x18   : > { %v271_v37 = vpack.c.bf16 %v250_v35, %v249_v34  ;;  %v253_v40 = vld [vmem:[%s1475_s26 + $0xc0] sm:$0xff]  ;;  %v254_v41 = vld [vmem:[%s1475_s26 + $0xc8] sm:$0xff]  ;;  %v272_v42 = vpack.c.bf16 %v252_v39, %v251_v38  ;;  %v255_v44 = vld [vmem:[%s1475_s26 + $0xd0] sm:$0xff] }
  0x19   : > { %v273_v43 = vpack.c.bf16 %v254_v41, %v253_v40  ;;  %v256_v45 = vld [vmem:[%s1475_s26 + $0xd8] sm:$0xff]  ;;  %v257_v46 = vld [vmem:[%s1475_s26 + $0xe0] sm:$0xff]  ;;  %v258_v47 = vld [vmem:[%s1475_s26 + $0xe8] sm:$0xff] }
  0x1a   : > { %v274_v48 = vpack.c.bf16 %v256_v45, %v255_v44  ;;  %v275_v49 = vpack.c.bf16 %v258_v47, %v257_v46  ;;  %v259_v50 = vld [vmem:[%s1475_s26 + $0xf0] sm:$0xff]  ;;  %v260_v51 = vld [vmem:[%s1475_s26 + $0xf8] sm:$0xff] }
  0x1b   : > { %v276_v52 = vpack.c.bf16 %v260_v51, %v259_v50 }
  0x1c   : > { %1281 = vmatmul.mubr.msk.bf16.gmra.mrb[4].mxu0 %vm285_vm2, %v264_v18 }
  0x1d   : > { %1284 = vmatprep.mubr.msk.bf16.mxu0 %vm285_vm2, %v265_v19 }
  0x24   : > { %1285 = vmatmul.mubr.msk.bf16.gmra.mrb[8].mxu0 %vm285_vm2, %v266_v24 }
  0x25   : > { %1288 = vmatprep.mubr.msk.bf16.mxu0 %vm285_vm2, %v267_v25 }
  0x2c   : > { %1289 = vmatmul.mubr.msk.bf16.gmra.mrb[12].mxu0 %vm285_vm2, %v268_v30 }
  0x2d   : > { %1292 = vmatprep.mubr.msk.bf16.mxu0 %vm285_vm2, %v269_v31 }
  0x34   : > { %1293 = vmatmul.mubr.msk.bf16.gmra.mrb[16].mxu0 %vm285_vm2, %v270_v36 }
  0x35   : > { %1296 = vmatprep.mubr.msk.bf16.mxu0 %vm285_vm2, %v271_v37 }
  0x3c   : > { %1297 = vmatmul.mubr.msk.bf16.gmra.mrb[20].mxu0 %vm285_vm2, %v272_v42 }
  0x3d   : > { %1300 = vmatprep.mubr.msk.bf16.mxu0 %vm285_vm2, %v273_v43 }
  0x44   : > { %1301 = vmatmul.mubr.msk.bf16.gmra.mrb[24].mxu0 %vm285_vm2, %v274_v48 }
  0x45   : > { %1304 = vmatprep.mubr.msk.bf16.mxu0 %vm285_vm2, %v275_v49 }
  0x4c   : > { %1305 = vmatmul.mubr.msk.bf16.gmra.mrb[28].mxu0 %vm285_vm2, %v276_v52 }
  0xe7   : > { %v1278_v56 = vpop.f32.mrb[0].mxu0 }
  0xe8   : > { %v384_v57 = vadd.f32 %v1278_v56, %v1534_v55  ;;  %v375_v58 = vpop.f32.mrb[1].mxu0 }
  0xe9   : > { %v376_v59 = vadd.f32 %v1534_v55, %v375_v58  ;;  %v1279_v60 = vpop.f32.mrb[2].mxu0 }
  0xea   : > { %v536_v61 = vmul.f32 0.70710677, %v384_v57  ;;  %v387_v62 = vadd.f32 %v1279_v60, %v1534_v55  ;;  %v378_v63 = vpop.f32.mrb[3].mxu0  ;;  %v504_v24 = vmul.f32 0.5, %v384_v57 }
  0xeb   : > { %v534_v0 = vmul.f32 0.70710677, %v376_v59  ;;  %v379_v1 = vadd.f32 %v1534_v55, %v378_v63  ;;  %v502_v38 = vmul.f32 0.5, %v376_v59 }
  0xec   : > { %1355 = verf.f32 %v536_v61  ;;  %v537_v2 = vmul.f32 0.70710677, %v387_v62  ;;  %v505_v25 = vmul.f32 0.5, %v387_v62 }
  0xed   : > { %1357 = verf.f32 %v534_v0  ;;  %v535_v3 = vmul.f32 0.70710677, %v379_v1  ;;  %v503_v39 = vmul.f32 0.5, %v379_v1 }
  0xee   : > { %1359 = verf.f32 %v537_v2 }
  0xef   : > { %1361 = verf.f32 %v535_v3  ;;  %v1282_v4 = vpop.f32.mrb[4].mxu0 }
  0xf0   : > { %v400_v5 = vadd.f32 %v1282_v4, %v1534_v55  ;;  %v391_v6 = vpop.f32.mrb[5].mxu0 }
  0xf1   : > { %v392_v7 = vadd.f32 %v1534_v55, %v391_v6  ;;  %v1283_v8 = vpop.f32.mrb[6].mxu0 }
  0xf2   : > { %v540_v9 = vmul.f32 0.70710677, %v400_v5  ;;  %v403_v10 = vadd.f32 %v1283_v8, %v1534_v55  ;;  %v394_v11 = vpop.f32.mrb[7].mxu0  ;;  %v508_v56 = vmul.f32 0.5, %v400_v5 }
  0xf3   : > { %v538_v12 = vmul.f32 0.70710677, %v392_v7  ;;  %v395_v13 = vadd.f32 %v1534_v55, %v394_v11  ;;  %v506_v61 = vmul.f32 0.5, %v392_v7 }
  0xf4   : > { %1363 = verf.f32 %v540_v9  ;;  %v541_v14 = vmul.f32 0.70710677, %v403_v10  ;;  %v509_v57 = vmul.f32 0.5, %v403_v10 }
  0xf5   : > { %1365 = verf.f32 %v538_v12  ;;  %v539_v15 = vmul.f32 0.70710677, %v395_v13  ;;  %v507_v62 = vmul.f32 0.5, %v395_v13 }
  0xf6   : > { %v1356_v16 = vpop.eup %1355  ;;  %1367 = verf.f32 %v541_v14 }
  0xf7   : > { %v1358_v17 = vpop.eup %1357  ;;  %v600_v18 = vadd.f32 1.0, %v1356_v16  ;;  %1369 = verf.f32 %v539_v15  ;;  %v1286_v19 = vpop.f32.mrb[8].mxu0 }
  0xf8   : > { %v1360_v20 = vpop.eup %1359  ;;  %v1545_v21 = vadd.f32 %v1286_v19, %v1534_v55  ;;  %v407_v22 = vpop.f32.mrb[9].mxu0  ;;  %v598_v32 = vadd.f32 1.0, %v1358_v17 }
  0xf9   : > { %v1362_v23 = vpop.eup %1361  ;;  %v601_v26 = vadd.f32 1.0, %v1360_v20  ;;  %v1548_v27 = vadd.f32 %v1534_v55, %v407_v22  ;;  %v1287_v28 = vpop.f32.mrb[10].mxu0  ;;  %v632_v34 = vmul.f32 %v600_v18, %v504_v24 }
  0xfa   : > { %v544_v29 = vmul.f32 0.70710677, %v1545_v21  ;;  %v1552_v30 = vadd.f32 %v1287_v28, %v1534_v55  ;;  %v410_v31 = vpop.f32.mrb[11].mxu0  ;;  %v599_v33 = vadd.f32 1.0, %v1362_v23  ;;  %v630_v44 = vmul.f32 %v598_v32, %v502_v38 }
  0xfb   : > { %v633_v35 = vmul.f32 %v601_v26, %v505_v25  ;;  %v542_v36 = vmul.f32 0.70710677, %v1548_v27  ;;  %v1556_v37 = vadd.f32 %v1534_v55, %v410_v31  ;;  %v512_v23 = vmul.f32 0.5, %v1545_v21 }
  0xfc   : > { %1371 = verf.f32 %v544_v29  ;;  %v545_v40 = vmul.f32 0.70710677, %v1552_v30  ;;  %v631_v45 = vmul.f32 %v599_v33, %v503_v39  ;;  %v513_v24 = vmul.f32 0.5, %v1552_v30 }
  0xfd   : > { %v663_v41 = vpack.c.bf16 %v633_v35, %v632_v34  ;;  %1373 = verf.f32 %v542_v36  ;;  %v543_v42 = vmul.f32 0.70710677, %v1556_v37  ;;  %v510_v29 = vmul.f32 0.5, %v1548_v27 }
  0xfe   : > { %v1364_v43 = vpop.eup %1363  ;;  %1375 = verf.f32 %v545_v40  ;;  %v662_v53 = vpack.c.bf16 %v631_v45, %v630_v44  ;;  %v511_v31 = vmul.f32 0.5, %v1556_v37 }
  0xff   : > { %v1366_v46 = vpop.eup %1365  ;;  %v604_v47 = vadd.f32 1.0, %v1364_v43  ;;  %1377 = verf.f32 %v543_v42  ;;  %v1290_v48 = vpop.f32.mrb[12].mxu0 }
 0x100   : > { %v1368_v49 = vpop.eup %1367  ;;  %v602_v50 = vadd.f32 1.0, %v1366_v46  ;;  %v1561_v51 = vadd.f32 %v1290_v48, %v1534_v55  ;;  %v423_v52 = vpop.f32.mrb[13].mxu0  ;;  %1312 = vmatprep.mubr.msk.bf16.mxu1 %vm701_vm3, %v662_v53 }
 0x101   : > { %v1370_v54 = vpop.eup %1369  ;;  %v605_v58 = vadd.f32 1.0, %v1368_v49  ;;  %v1564_v59 = vadd.f32 %v1534_v55, %v423_v52  ;;  %v1291_v60 = vpop.f32.mrb[14].mxu0  ;;  %v636_v2 = vmul.f32 %v604_v47, %v508_v56  ;;  %1313 = vmatmul.mubr.msk.bf16.vlgmr.msra.gmra.mrb[0].mxu1 %vm701_vm3, %v663_v41 }
 0x102   : > { %v603_v63 = vadd.f32 1.0, %v1370_v54  ;;  %v548_v0 = vmul.f32 0.70710677, %v1561_v51  ;;  %v426_v1 = vpop.f32.mrb[15].mxu0  ;;  %v435_v5 = vadd.f32 %v1291_v60, %v1534_v55  ;;  %v634_v6 = vmul.f32 %v602_v50, %v506_v61 }
 0x103   : > { %v637_v3 = vmul.f32 %v605_v58, %v509_v57  ;;  %v546_v4 = vmul.f32 0.70710677, %v1564_v59  ;;  %v427_v7 = vadd.f32 %v1534_v55, %v426_v1  ;;  %v516_v50 = vmul.f32 0.5, %v1561_v51 }
 0x104   : > { %v635_v8 = vmul.f32 %v603_v63, %v507_v62  ;;  %1379 = verf.f32 %v548_v0  ;;  %v549_v10 = vmul.f32 0.70710677, %v435_v5  ;;  %v514_v57 = vmul.f32 0.5, %v1564_v59 }
 0x105   : > { %v665_v9 = vpack.c.bf16 %v637_v3, %v636_v2  ;;  %1381 = verf.f32 %v546_v4  ;;  %v547_v13 = vmul.f32 0.70710677, %v427_v7  ;;  %v517_v58 = vmul.f32 0.5, %v435_v5 }
 0x106   : > { %v1372_v11 = vpop.eup %1371  ;;  %v664_v12 = vpack.c.bf16 %v635_v8, %v634_v6  ;;  %1383 = verf.f32 %v549_v10  ;;  %v515_v63 = vmul.f32 0.5, %v427_v7 }
 0x107   : > { %v1374_v14 = vpop.eup %1373  ;;  %v608_v15 = vadd.f32 1.0, %v1372_v11  ;;  %v1294_v16 = vpop.f32.mrb[16].mxu0  ;;  %1385 = verf.f32 %v547_v13 }
 0x108   : > { %v1376_v17 = vpop.eup %1375  ;;  %v606_v18 = vadd.f32 1.0, %v1374_v14  ;;  %v1573_v19 = vadd.f32 %v1294_v16, %v1534_v55  ;;  %v439_v20 = vpop.f32.mrb[17].mxu0  ;;  %1316 = vmatprep.mubr.msk.bf16.mxu1 %vm701_vm3, %v664_v12 }
 0x109   : > { %v1378_v22 = vpop.eup %1377  ;;  %v609_v25 = vadd.f32 1.0, %v1376_v17  ;;  %v1579_v26 = vadd.f32 %v1534_v55, %v439_v20  ;;  %v1295_v28 = vpop.f32.mrb[18].mxu0  ;;  %v640_v35 = vmul.f32 %v608_v15, %v512_v23  ;;  %1317 = vmatmul.mubr.msk.bf16.gmra.mrb[4].mxu1 %vm701_vm3, %v665_v9 }
 0x10a   : > { %v607_v32 = vadd.f32 1.0, %v1378_v22  ;;  %v552_v33 = vmul.f32 0.70710677, %v1573_v19  ;;  %v442_v34 = vpop.f32.mrb[19].mxu0  ;;  %v451_v21 = vadd.f32 %v1295_v28, %v1534_v55  ;;  %v638_v30 = vmul.f32 %v606_v18, %v510_v29 }
 0x10b   : > { %v641_v36 = vmul.f32 %v609_v25, %v513_v24  ;;  %v550_v38 = vmul.f32 0.70710677, %v1579_v26  ;;  %v443_v40 = vadd.f32 %v1534_v55, %v442_v34  ;;  %v520_v17 = vmul.f32 0.5, %v1573_v19 }
 0x10c   : > { %v639_v39 = vmul.f32 %v607_v32, %v511_v31  ;;  %1387 = verf.f32 %v552_v33  ;;  %v553_v37 = vmul.f32 0.70710677, %v451_v21  ;;  %v518_v24 = vmul.f32 0.5, %v1579_v26 }
 0x10d   : > { %v667_v27 = vpack.c.bf16 %v641_v36, %v640_v35  ;;  %1389 = verf.f32 %v550_v38  ;;  %v551_v43 = vmul.f32 0.70710677, %v443_v40  ;;  %v521_v25 = vmul.f32 0.5, %v451_v21 }
 0x10e   : > { %v1380_v41 = vpop.eup %1379  ;;  %v666_v42 = vpack.c.bf16 %v639_v39, %v638_v30  ;;  %1391 = verf.f32 %v553_v37  ;;  %v519_v32 = vmul.f32 0.5, %v443_v40 }
 0x10f   : > { %v1382_v44 = vpop.eup %1381  ;;  %v1298_v45 = vpop.f32.mrb[20].mxu0  ;;  %v612_v46 = vadd.f32 1.0, %v1380_v41  ;;  %1393 = verf.f32 %v551_v43 }
 0x110   : > { %v1589_v47 = vadd.f32 %v1298_v45, %v1534_v55  ;;  %v455_v48 = vpop.f32.mrb[21].mxu0  ;;  %1320 = vmatprep.mubr.msk.bf16.mxu1 %vm701_vm3, %v666_v42  ;;  %v1384_v49 = vpop.eup %1383  ;;  %v610_v52 = vadd.f32 1.0, %v1382_v44 }
 0x111   : > { %v1594_v53 = vadd.f32 %v1534_v55, %v455_v48  ;;  %v1299_v54 = vpop.f32.mrb[22].mxu0  ;;  %v1386_v56 = vpop.eup %1385  ;;  %v613_v60 = vadd.f32 1.0, %v1384_v49  ;;  %1321 = vmatmul.mubr.msk.bf16.gmra.mrb[8].mxu1 %vm701_vm3, %v667_v27  ;;  %v644_v51 = vmul.f32 %v612_v46, %v516_v50 }
 0x112   : > { %v556_v61 = vmul.f32 0.70710677, %v1589_v47  ;;  %v458_v62 = vpop.f32.mrb[23].mxu0  ;;  %v611_v0 = vadd.f32 1.0, %v1386_v56  ;;  %v1600_v2 = vadd.f32 %v1299_v54, %v1534_v55  ;;  %v642_v59 = vmul.f32 %v610_v52, %v514_v57 }
 0x113   : > { %v554_v1 = vmul.f32 0.70710677, %v1594_v53  ;;  %v645_v3 = vmul.f32 %v613_v60, %v517_v58  ;;  %v1604_v4 = vadd.f32 %v1534_v55, %v458_v62  ;;  %v524_v48 = vmul.f32 0.5, %v1589_v47 }
 0x114   : > { %1395 = verf.f32 %v556_v61  ;;  %v643_v5 = vmul.f32 %v611_v0, %v515_v63  ;;  %v557_v6 = vmul.f32 0.70710677, %v1600_v2  ;;  %v522_v56 = vmul.f32 0.5, %v1594_v53 }
 0x115   : > { %1397 = verf.f32 %v554_v1  ;;  %v669_v7 = vpack.c.bf16 %v645_v3, %v644_v51  ;;  %v555_v9 = vmul.f32 0.70710677, %v1604_v4  ;;  %v525_v57 = vmul.f32 0.5, %v1600_v2 }
 0x116   : > { %v1388_v8 = vpop.eup %1387  ;;  %v668_v11 = vpack.c.bf16 %v643_v5, %v642_v59  ;;  %1399 = verf.f32 %v557_v6  ;;  %v523_v62 = vmul.f32 0.5, %v1604_v4 }
 0x117   : > { %v1390_v10 = vpop.eup %1389  ;;  %v1302_v12 = vpop.f32.mrb[24].mxu0  ;;  %v616_v13 = vadd.f32 1.0, %v1388_v8  ;;  %1401 = verf.f32 %v555_v9 }
 0x118   : > { %v1609_v14 = vadd.f32 %v1302_v12, %v1534_v55  ;;  %v471_v15 = vpop.f32.mrb[25].mxu0  ;;  %v1392_v16 = vpop.eup %1391  ;;  %v614_v18 = vadd.f32 1.0, %v1390_v10  ;;  %1324 = vmatprep.mubr.msk.bf16.mxu1 %vm701_vm3, %v668_v11 }
 0x119   : > { %v1613_v20 = vadd.f32 %v1534_v55, %v471_v15  ;;  %v1303_v22 = vpop.f32.mrb[26].mxu0  ;;  %v1394_v23 = vpop.eup %1393  ;;  %v617_v28 = vadd.f32 1.0, %v1392_v16  ;;  %1325 = vmatmul.mubr.msk.bf16.gmra.mrb[12].mxu1 %vm701_vm3, %v669_v7  ;;  %v648_v35 = vmul.f32 %v616_v13, %v520_v17 }
 0x11a   : > { %v560_v29 = vmul.f32 0.70710677, %v1609_v14  ;;  %v474_v31 = vpop.f32.mrb[27].mxu0  ;;  %v615_v33 = vadd.f32 1.0, %v1394_v23  ;;  %v483_v19 = vadd.f32 %v1303_v22, %v1534_v55  ;;  %v646_v30 = vmul.f32 %v614_v18, %v518_v24 }
 0x11b   : > { %v558_v34 = vmul.f32 0.70710677, %v1613_v20  ;;  %v649_v36 = vmul.f32 %v617_v28, %v521_v25  ;;  %v475_v38 = vadd.f32 %v1534_v55, %v474_v31  ;;  %v528_v13 = vmul.f32 0.5, %v1609_v14 }
 0x11c   : > { %1403 = verf.f32 %v560_v29  ;;  %v647_v26 = vmul.f32 %v615_v33, %v519_v32  ;;  %v561_v21 = vmul.f32 0.70710677, %v483_v19  ;;  %v526_v16 = vmul.f32 0.5, %v1613_v20 }
 0x11d   : > { %1405 = verf.f32 %v558_v34  ;;  %v671_v27 = vpack.c.bf16 %v649_v36, %v648_v35  ;;  %v559_v37 = vmul.f32 0.70710677, %v475_v38  ;;  %v527_v17 = vmul.f32 0.5, %v475_v38 }
 0x11e   : > { %v1396_v39 = vpop.eup %1395  ;;  %v670_v41 = vpack.c.bf16 %v647_v26, %v646_v30  ;;  %1407 = verf.f32 %v561_v21 }
 0x11f   : > { %v1398_v40 = vpop.eup %1397  ;;  %v1306_v42 = vpop.f32.mrb[28].mxu0  ;;  %v620_v43 = vadd.f32 1.0, %v1396_v39  ;;  %1409 = verf.f32 %v559_v37 }
 0x120   : > { %v496_v44 = vadd.f32 %v1306_v42, %v1534_v55  ;;  %v487_v45 = vpop.f32.mrb[29].mxu0  ;;  %v1400_v46 = vpop.eup %1399  ;;  %v618_v49 = vadd.f32 1.0, %v1398_v40  ;;  %1328 = vmatprep.mubr.msk.bf16.mxu1 %vm701_vm3, %v670_v41  ;;  %v1643_v42 = vld [vmem:[%s1754_s4] ss:$0 sm:$0xff] }
 0x121   : > { %v488_v50 = vadd.f32 %v1534_v55, %v487_v45  ;;  %v1307_v52 = vpop.f32.mrb[30].mxu0  ;;  %v1402_v54 = vpop.eup %1401  ;;  %v621_v58 = vadd.f32 1.0, %v1400_v46  ;;  %1329 = vmatmul.mubr.msk.bf16.gmra.mrb[16].mxu1 %vm701_vm3, %v671_v27  ;;  %v652_v1 = vmul.f32 %v620_v43, %v524_v48 }
 0x122   : > { %v564_v60 = vmul.f32 0.70710677, %v496_v44  ;;  %v490_v61 = vpop.f32.mrb[31].mxu0  ;;  %v619_v63 = vadd.f32 1.0, %v1402_v54  ;;  %v499_v47 = vadd.f32 %v1307_v52, %v1534_v55  ;;  %v650_v59 = vmul.f32 %v618_v49, %v522_v56 }
 0x123   : > { %v562_v0 = vmul.f32 0.70710677, %v488_v50  ;;  %v653_v51 = vmul.f32 %v621_v58, %v525_v57  ;;  %v491_v3 = vadd.f32 %v1534_v55, %v490_v61  ;;  %v529_v55 = vmul.f32 0.5, %v483_v19 }
 0x124   : > { %1411 = verf.f32 %v564_v60  ;;  %v651_v53 = vmul.f32 %v619_v63, %v523_v62  ;;  %v565_v2 = vmul.f32 0.70710677, %v499_v47  ;;  %v532_v19 = vmul.f32 0.5, %v496_v44 }
 0x125   : > { %1413 = verf.f32 %v562_v0  ;;  %v673_v6 = vpack.c.bf16 %v653_v51, %v652_v1  ;;  %v563_v8 = vmul.f32 0.70710677, %v491_v3  ;;  %v533_v20 = vmul.f32 0.5, %v499_v47 }
 0x126   : > { %v1404_v5 = vpop.eup %1403  ;;  %v672_v4 = vpack.c.bf16 %v651_v53, %v650_v59  ;;  %1415 = verf.f32 %v565_v2  ;;  %v530_v38 = vmul.f32 0.5, %v488_v50  ;;  %v531_v30 = vmul.f32 0.5, %v491_v3 }
 0x127   : > { %v1406_v7 = vpop.eup %1405  ;;  %v624_v9 = vadd.f32 1.0, %v1404_v5  ;;  %1417 = verf.f32 %v563_v8 }
 0x128   : > { %v1408_v10 = vpop.eup %1407  ;;  %v622_v11 = vadd.f32 1.0, %v1406_v7  ;;  %1332 = vmatprep.mubr.msk.bf16.mxu1 %vm701_vm3, %v672_v4 }
 0x129   : > { %v1410_v12 = vpop.eup %1409  ;;  %v625_v15 = vadd.f32 1.0, %v1408_v10  ;;  %1333 = vmatmul.mubr.msk.bf16.gmra.mrb[20].mxu1 %vm701_vm3, %v673_v6  ;;  %v656_v22 = vmul.f32 %v624_v9, %v528_v13 }
 0x12a   : > { %v623_v18 = vadd.f32 1.0, %v1410_v12  ;;  %v654_v24 = vmul.f32 %v622_v11, %v526_v16 }
 0x12b   : > { %v657_v23 = vmul.f32 %v625_v15, %v529_v55 }
 0x12c   : > { %v655_v25 = vmul.f32 %v623_v18, %v527_v17 }
 0x12d   : > { %v675_v29 = vpack.c.bf16 %v657_v23, %v656_v22 }
 0x12e   : > { %v1412_v28 = vpop.eup %1411  ;;  %v674_v32 = vpack.c.bf16 %v655_v25, %v654_v24 }
 0x12f   : > { %v1414_v31 = vpop.eup %1413  ;;  %v628_v33 = vadd.f32 1.0, %v1412_v28 }
 0x130   : > { %v1416_v34 = vpop.eup %1415  ;;  %v626_v35 = vadd.f32 1.0, %v1414_v31  ;;  %1336 = vmatprep.mubr.msk.bf16.mxu1 %vm701_vm3, %v674_v32 }
 0x131   : > { %v1418_v14 = vpop.eup %1417  ;;  %v629_v36 = vadd.f32 1.0, %v1416_v34  ;;  %1337 = vmatmul.mubr.msk.bf16.gmra.mrb[24].mxu1 %vm701_vm3, %v675_v29  ;;  %v660_v21 = vmul.f32 %v628_v33, %v532_v19 }
 0x132   : > { %v627_v26 = vadd.f32 1.0, %v1418_v14  ;;  %v658_v27 = vmul.f32 %v626_v35, %v530_v38 }
 0x133   : > { %v661_v39 = vmul.f32 %v629_v36, %v533_v20 }
 0x134   : > { %v659_v37 = vmul.f32 %v627_v26, %v531_v30 }
 0x135   : > { %v677_v40 = vpack.c.bf16 %v661_v39, %v660_v21 }
 0x136   : > { %v676_v41 = vpack.c.bf16 %v659_v37, %v658_v27 }
 0x138   : > { %1340 = vmatprep.mubr.msk.bf16.mxu1 %vm701_vm3, %v676_v41 }
 0x139   : > { %1341 = vmatmul.mubr.msk.bf16.gmra.mrb[28].mxu1 %vm701_vm3, %v677_v40 }
 0x1d4   : > { %v1314_v43 = vpop.f32.mrb[0].mxu1 }
 0x1d5   : > { %v793_v44 = vadd.f32 %v1314_v43, %v1643_v42  ;;  %v784_v45 = vpop.f32.mrb[1].mxu1 }
 0x1d6   : > { %v785_v46 = vadd.f32 %v1643_v42, %v784_v45  ;;  %v1315_v48 = vpop.f32.mrb[2].mxu1 }
 0x1d7   : > { %v1209_v49 = vpack.c.bf16 %v793_v44, %v793_v44  ;;  %v796_v50 = vadd.f32 %v1315_v48, %v1643_v42  ;;  %v787_v52 = vpop.f32.mrb[3].mxu1 }
 0x1d8   : > { %v1207_v54 = vpack.c.bf16 %v785_v46, %v785_v46  ;;  %v788_v56 = vadd.f32 %v1643_v42, %v787_v52 }
 0x1d9   : > { %1042 = vst.msk [vmem:[%s1650_s13 + $0x8] sm:$0xf] %vm1039_vm4, %v1209_v49  ;;  %v1210_v57 = vpack.c.bf16 %v796_v50, %v796_v50 }
 0x1da   : > { %1040 = vst.msk [vmem:[%s1650_s13] sm:$0xf] %vm1039_vm4, %v1207_v54  ;;  %v1208_v58 = vpack.c.bf16 %v788_v56, %v788_v56 }
 0x1db   : > { %1043 = vst.msk [vmem:[%s1650_s13 + $0xc] sm:$0xf] %vm1039_vm4, %v1210_v57 }
 0x1dc   : > { %1041 = vst.msk [vmem:[%s1650_s13 + $0x4] sm:$0xf] %vm1039_vm4, %v1208_v58  ;;  %v1318_v60 = vpop.f32.mrb[4].mxu1 }
 0x1dd   : > { %v809_v61 = vadd.f32 %v1318_v60, %v1643_v42  ;;  %v800_v62 = vpop.f32.mrb[5].mxu1 }
 0x1de   : > { %v801_v63 = vadd.f32 %v1643_v42, %v800_v62  ;;  %v1319_v0 = vpop.f32.mrb[6].mxu1 }
 0x1df   : > { %v1213_v47 = vpack.c.bf16 %v809_v61, %v809_v61  ;;  %v812_v1 = vadd.f32 %v1319_v0, %v1643_v42  ;;  %v803_v51 = vpop.f32.mrb[7].mxu1 }
 0x1e0   : > { %v1211_v3 = vpack.c.bf16 %v801_v63, %v801_v63  ;;  %v804_v59 = vadd.f32 %v1643_v42, %v803_v51 }
 0x1e1   : > { %1046 = vst.msk [vmem:[%s1650_s13 + $0x18] sm:$0xf] %vm1039_vm4, %v1213_v47  ;;  %v1214_v53 = vpack.c.bf16 %v812_v1, %v812_v1 }
 0x1e2   : > { %1044 = vst.msk [vmem:[%s1650_s13 + $0x10] sm:$0xf] %vm1039_vm4, %v1211_v3  ;;  %v1212_v2 = vpack.c.bf16 %v804_v59, %v804_v59 }
 0x1e3   : > { %1047 = vst.msk [vmem:[%s1650_s13 + $0x1c] sm:$0xf] %vm1039_vm4, %v1214_v53 }
 0x1e4   : > { %1045 = vst.msk [vmem:[%s1650_s13 + $0x14] sm:$0xf] %vm1039_vm4, %v1212_v2  ;;  %v1322_v5 = vpop.f32.mrb[8].mxu1 }
 0x1e5   : > { %v825_v6 = vadd.f32 %v1322_v5, %v1643_v42  ;;  %v816_v8 = vpop.f32.mrb[9].mxu1 }
 0x1e6   : > { %v817_v7 = vadd.f32 %v1643_v42, %v816_v8  ;;  %v1323_v4 = vpop.f32.mrb[10].mxu1 }
 0x1e7   : > { %v1217_v9 = vpack.c.bf16 %v825_v6, %v825_v6  ;;  %v828_v10 = vadd.f32 %v1323_v4, %v1643_v42  ;;  %v819_v11 = vpop.f32.mrb[11].mxu1 }
 0x1e8   : > { %v1215_v12 = vpack.c.bf16 %v817_v7, %v817_v7  ;;  %v820_v13 = vadd.f32 %v1643_v42, %v819_v11 }
 0x1e9   : > { %1050 = vst.msk [vmem:[%s1650_s13 + $0x28] sm:$0xf] %vm1039_vm4, %v1217_v9  ;;  %v1218_v55 = vpack.c.bf16 %v828_v10, %v828_v10 }
 0x1ea   : > { %1048 = vst.msk [vmem:[%s1650_s13 + $0x20] sm:$0xf] %vm1039_vm4, %v1215_v12  ;;  %v1216_v15 = vpack.c.bf16 %v820_v13, %v820_v13 }
 0x1eb   : > { %1051 = vst.msk [vmem:[%s1650_s13 + $0x2c] sm:$0xf] %vm1039_vm4, %v1218_v55 }
 0x1ec   : > { %1049 = vst.msk [vmem:[%s1650_s13 + $0x24] sm:$0xf] %vm1039_vm4, %v1216_v15  ;;  %v1326_v16 = vpop.f32.mrb[12].mxu1 }
 0x1ed   : > { %v841_v17 = vadd.f32 %v1326_v16, %v1643_v42  ;;  %v832_v18 = vpop.f32.mrb[13].mxu1 }
 0x1ee   : > { %v833_v22 = vadd.f32 %v1643_v42, %v832_v18  ;;  %v1327_v23 = vpop.f32.mrb[14].mxu1 }
 0x1ef   : > { %v1221_v24 = vpack.c.bf16 %v841_v17, %v841_v17  ;;  %v844_v25 = vadd.f32 %v1327_v23, %v1643_v42  ;;  %v835_v28 = vpop.f32.mrb[15].mxu1 }
 0x1f0   : > { %v1219_v29 = vpack.c.bf16 %v833_v22, %v833_v22  ;;  %v836_v31 = vadd.f32 %v1643_v42, %v835_v28 }
 0x1f1   : > { %1054 = vst.msk [vmem:[%s1650_s13 + $0x38] sm:$0xf] %vm1039_vm4, %v1221_v24  ;;  %v1222_v32 = vpack.c.bf16 %v844_v25, %v844_v25 }
 0x1f2   : > { %1052 = vst.msk [vmem:[%s1650_s13 + $0x30] sm:$0xf] %vm1039_vm4, %v1219_v29  ;;  %v1220_v33 = vpack.c.bf16 %v836_v31, %v836_v31 }
 0x1f3   : > { %1055 = vst.msk [vmem:[%s1650_s13 + $0x3c] sm:$0xf] %vm1039_vm4, %v1222_v32 }
 0x1f4   : > { %1053 = vst.msk [vmem:[%s1650_s13 + $0x34] sm:$0xf] %vm1039_vm4, %v1220_v33  ;;  %v1330_v34 = vpop.f32.mrb[16].mxu1 }
 0x1f5   : > { %v857_v35 = vadd.f32 %v1330_v34, %v1643_v42  ;;  %v848_v14 = vpop.f32.mrb[17].mxu1 }
 0x1f6   : > { %v849_v19 = vadd.f32 %v1643_v42, %v848_v14  ;;  %v1331_v20 = vpop.f32.mrb[18].mxu1 }
 0x1f7   : > { %v1225_v36 = vpack.c.bf16 %v857_v35, %v857_v35  ;;  %v860_v38 = vadd.f32 %v1331_v20, %v1643_v42  ;;  %v851_v30 = vpop.f32.mrb[19].mxu1 }
 0x1f8   : > { %v1223_v26 = vpack.c.bf16 %v849_v19, %v849_v19  ;;  %v852_v21 = vadd.f32 %v1643_v42, %v851_v30 }
 0x1f9   : > { %1058 = vst.msk [vmem:[%s1650_s13 + $0x48] sm:$0xf] %vm1039_vm4, %v1225_v36  ;;  %v1226_v39 = vpack.c.bf16 %v860_v38, %v860_v38 }
 0x1fa   : > { %1056 = vst.msk [vmem:[%s1650_s13 + $0x40] sm:$0xf] %vm1039_vm4, %v1223_v26  ;;  %v1224_v27 = vpack.c.bf16 %v852_v21, %v852_v21 }
 0x1fb   : > { %1059 = vst.msk [vmem:[%s1650_s13 + $0x4c] sm:$0xf] %vm1039_vm4, %v1226_v39 }
 0x1fc   : > { %1057 = vst.msk [vmem:[%s1650_s13 + $0x44] sm:$0xf] %vm1039_vm4, %v1224_v27  ;;  %v1334_v37 = vpop.f32.mrb[20].mxu1 }
 0x1fd   : > { %v873_v40 = vadd.f32 %v1334_v37, %v1643_v42  ;;  %v864_v41 = vpop.f32.mrb[21].mxu1 }
 0x1fe   : > { %v865_v43 = vadd.f32 %v1643_v42, %v864_v41  ;;  %v1335_v44 = vpop.f32.mrb[22].mxu1 }
 0x1ff   : > { %v1229_v45 = vpack.c.bf16 %v873_v40, %v873_v40  ;;  %v876_v46 = vadd.f32 %v1335_v44, %v1643_v42  ;;  %v867_v48 = vpop.f32.mrb[23].mxu1 }
 0x200   : > { %v1227_v49 = vpack.c.bf16 %v865_v43, %v865_v43  ;;  %v868_v50 = vadd.f32 %v1643_v42, %v867_v48 }
 0x201   : > { %1062 = vst.msk [vmem:[%s1650_s13 + $0x58] sm:$0xf] %vm1039_vm4, %v1229_v45  ;;  %v1230_v52 = vpack.c.bf16 %v876_v46, %v876_v46 }
 0x202   : > { %1060 = vst.msk [vmem:[%s1650_s13 + $0x50] sm:$0xf] %vm1039_vm4, %v1227_v49  ;;  %v1228_v54 = vpack.c.bf16 %v868_v50, %v868_v50 }
 0x203   : > { %1063 = vst.msk [vmem:[%s1650_s13 + $0x5c] sm:$0xf] %vm1039_vm4, %v1230_v52 }
 0x204   : > { %1061 = vst.msk [vmem:[%s1650_s13 + $0x54] sm:$0xf] %vm1039_vm4, %v1228_v54  ;;  %v1338_v56 = vpop.f32.mrb[24].mxu1 }
 0x205   : > { %v889_v57 = vadd.f32 %v1338_v56, %v1643_v42  ;;  %v880_v58 = vpop.f32.mrb[25].mxu1 }
 0x206   : > { %v881_v60 = vadd.f32 %v1643_v42, %v880_v58  ;;  %v1339_v61 = vpop.f32.mrb[26].mxu1 }
 0x207   : > { %v1233_v62 = vpack.c.bf16 %v889_v57, %v889_v57  ;;  %v892_v63 = vadd.f32 %v1339_v61, %v1643_v42  ;;  %v883_v0 = vpop.f32.mrb[27].mxu1 }
 0x208   : > { %v1231_v47 = vpack.c.bf16 %v881_v60, %v881_v60  ;;  %v884_v1 = vadd.f32 %v1643_v42, %v883_v0 }
 0x209   : > { %1066 = vst.msk [vmem:[%s1650_s13 + $0x68] sm:$0xf] %vm1039_vm4, %v1233_v62  ;;  %v1234_v51 = vpack.c.bf16 %v892_v63, %v892_v63 }
 0x20a   : > { %1064 = vst.msk [vmem:[%s1650_s13 + $0x60] sm:$0xf] %vm1039_vm4, %v1231_v47  ;;  %v1232_v3 = vpack.c.bf16 %v884_v1, %v884_v1 }
 0x20b   : > { %1067 = vst.msk [vmem:[%s1650_s13 + $0x6c] sm:$0xf] %vm1039_vm4, %v1234_v51 }
 0x20c   : > { %1065 = vst.msk [vmem:[%s1650_s13 + $0x64] sm:$0xf] %vm1039_vm4, %v1232_v3  ;;  %v1342_v59 = vpop.f32.mrb[28].mxu1 }
 0x20d   : > { %v905_v53 = vadd.f32 %v1342_v59, %v1643_v42  ;;  %v896_v2 = vpop.f32.mrb[29].mxu1 }
 0x20e   : > { %v897_v5 = vadd.f32 %v1643_v42, %v896_v2  ;;  %v1343_v6 = vpop.f32.mrb[30].mxu1 }
 0x20f   : > { %v1237_v8 = vpack.c.bf16 %v905_v53, %v905_v53  ;;  %v908_v7 = vadd.f32 %v1343_v6, %v1643_v42  ;;  %v899_v4 = vpop.f32.mrb[31].mxu1 }
 0x210   : > { %v1235_v9 = vpack.c.bf16 %v897_v5, %v897_v5  ;;  %v900_v10 = vadd.f32 %v1643_v42, %v899_v4 }
 0x211   : > { %1070 = vst.msk [vmem:[%s1650_s13 + $0x78] sm:$0xf] %vm1039_vm4, %v1237_v8  ;;  %v1238_v11 = vpack.c.bf16 %v908_v7, %v908_v7 }
 0x212   : > { %1068 = vst.msk [vmem:[%s1650_s13 + $0x70] sm:$0xf] %vm1039_vm4, %v1235_v9  ;;  %v1236_v12 = vpack.c.bf16 %v900_v10, %v900_v10 }
 0x213   : > { %1071 = vst.msk [vmem:[%s1650_s13 + $0x7c] sm:$0xf] %vm1039_vm4, %v1238_v11 }
 0x214   : > { %1069 = vst.msk [vmem:[%s1650_s13 + $0x74] sm:$0xf] %vm1039_vm4, %v1236_v12 }
 0x215 PF: > { %s15_s18 = sadd.s32 1, %s1425_s18  }
 0x216   : > { %p12_p4 = scmp.ge.s32.totalorder %s15_s18, 4  }
 0x218   :  { %14 = sbr.rel (!%p12_p4) target bundleno = 1 (0x1), region = 70 }

// kernel: reverse.4
= control target key start
LH: loop header
LB: loop body
LE: loop exit
PB: predicated region body
PF: predicated region fallthrough
CT: control target
= control target key end

     0   :  { %s344_s0 = inlined_call_operand.vmem [shape: f32[2,16,16,7], index: 0, kind: input, shape index: {}]   ;;  %s345_s1 = inlined_call_operand.vmem [shape: f32[2,16,16,7], index: 1, kind: output, shape index: {}]  }
   0x1   :  { %v112_v0 = vld [vmem:[%s344_s0 + $0x60] sm:$0xff]  ;;  %v113_v1 = vld [vmem:[%s344_s0 + $0xd0] sm:$0xff]  ;;  %v138_v14 = vld [vmem:[%s344_s0 + $0x68] sm:$0xff] }
   0x2   :  { %v115_v2 = vld [vmem:[%s344_s0 + $0x50] sm:$0xff]  ;;  %4 = vst [vmem:[%s345_s1] sm:$0xff] %v112_v0  ;;  %114 = vst [vmem:[%s345_s1 + $0x70] sm:$0xff] %v113_v1  ;;  %v117_v3 = vld [vmem:[%s344_s0 + $0xc0] sm:$0xff] }
   0x3   :  { %116 = vst [vmem:[%s345_s1 + $0x10] sm:$0xff] %v115_v2  ;;  %v119_v4 = vld [vmem:[%s344_s0 + $0x40] sm:$0xff]  ;;  %v121_v5 = vld [vmem:[%s344_s0 + $0xb0] sm:$0xff]  ;;  %118 = vst [vmem:[%s345_s1 + $0x80] sm:$0xff] %v117_v3 }
   0x4   :  { %120 = vst [vmem:[%s345_s1 + $0x20] sm:$0xff] %v119_v4  ;;  %122 = vst [vmem:[%s345_s1 + $0x90] sm:$0xff] %v121_v5  ;;  %v123_v6 = vld [vmem:[%s344_s0 + $0x30] sm:$0xff]  ;;  %v125_v7 = vld [vmem:[%s344_s0 + $0xa0] sm:$0xff] }
   0x5   :  { %v127_v8 = vld [vmem:[%s344_s0 + $0x20] sm:$0xff]  ;;  %124 = vst [vmem:[%s345_s1 + $0x30] sm:$0xff] %v123_v6  ;;  %126 = vst [vmem:[%s345_s1 + $0xa0] sm:$0xff] %v125_v7  ;;  %v129_v9 = vld [vmem:[%s344_s0 + $0x90] sm:$0xff] }
   0x6   :  { %128 = vst [vmem:[%s345_s1 + $0x40] sm:$0xff] %v127_v8  ;;  %v131_v10 = vld [vmem:[%s344_s0 + $0x10] sm:$0xff]  ;;  %v133_v11 = vld [vmem:[%s344_s0 + $0x80] sm:$0xff]  ;;  %130 = vst [vmem:[%s345_s1 + $0xb0] sm:$0xff] %v129_v9 }
   0x7   :  { %132 = vst [vmem:[%s345_s1 + $0x50] sm:$0xff] %v131_v10  ;;  %134 = vst [vmem:[%s345_s1 + $0xc0] sm:$0xff] %v133_v11  ;;  %v49_v12 = vld [vmem:[%s344_s0] sm:$0xff]  ;;  %v136_v13 = vld [vmem:[%s344_s0 + $0x70] sm:$0xff] }
   0x8   :  { %135 = vst [vmem:[%s345_s1 + $0x60] sm:$0xff] %v49_v12  ;;  %137 = vst [vmem:[%s345_s1 + $0xd0] sm:$0xff] %v136_v13  ;;  %v140_v15 = vld [vmem:[%s344_s0 + $0xd8] sm:$0xff]  ;;  %v144_v17 = vld [vmem:[%s344_s0 + $0xc8] sm:$0xff] }
   0x9   :  { %139 = vst [vmem:[%s345_s1 + $0x8] sm:$0xff] %v138_v14  ;;  %v142_v16 = vld [vmem:[%s344_s0 + $0x58] sm:$0xff]  ;;  %141 = vst [vmem:[%s345_s1 + $0x78] sm:$0xff] %v140_v15  ;;  %v146_v18 = vld [vmem:[%s344_s0 + $0x48] sm:$0xff] }
   0xa   :  { %143 = vst [vmem:[%s345_s1 + $0x18] sm:$0xff] %v142_v16  ;;  %145 = vst [vmem:[%s345_s1 + $0x88] sm:$0xff] %v144_v17  ;;  %v148_v19 = vld [vmem:[%s344_s0 + $0xb8] sm:$0xff]  ;;  %v152_v21 = vld [vmem:[%s344_s0 + $0xa8] sm:$0xff] }
   0xb   :  { %v150_v20 = vld [vmem:[%s344_s0 + $0x38] sm:$0xff]  ;;  %147 = vst [vmem:[%s345_s1 + $0x28] sm:$0xff] %v146_v18  ;;  %149 = vst [vmem:[%s345_s1 + $0x98] sm:$0xff] %v148_v19  ;;  %v154_v22 = vld [vmem:[%s344_s0 + $0x28] sm:$0xff] }
   0xc   :  { %151 = vst [vmem:[%s345_s1 + $0x38] sm:$0xff] %v150_v20  ;;  %v156_v23 = vld [vmem:[%s344_s0 + $0x98] sm:$0xff]  ;;  %153 = vst [vmem:[%s345_s1 + $0xa8] sm:$0xff] %v152_v21  ;;  %v160_v25 = vld [vmem:[%s344_s0 + $0x88] sm:$0xff] }
   0xd   :  { %155 = vst [vmem:[%s345_s1 + $0x48] sm:$0xff] %v154_v22  ;;  %157 = vst [vmem:[%s345_s1 + $0xb8] sm:$0xff] %v156_v23  ;;  %v158_v24 = vld [vmem:[%s344_s0 + $0x18] sm:$0xff]  ;;  %v162_v26 = vld [vmem:[%s344_s0 + $0x8] sm:$0xff] }
   0xe   :  { %159 = vst [vmem:[%s345_s1 + $0x58] sm:$0xff] %v158_v24  ;;  %161 = vst [vmem:[%s345_s1 + $0xc8] sm:$0xff] %v160_v25  ;;  %v164_v27 = vld [vmem:[%s344_s0 + $0x78] sm:$0xff] }
   0xf   :  { %163 = vst [vmem:[%s345_s1 + $0x68] sm:$0xff] %v162_v26  ;;  %165 = vst [vmem:[%s345_s1 + $0xd8] sm:$0xff] %v164_v27 }

// kernel: fno2d_forward.7
= control target key start
LH: loop header
LB: loop body
LE: loop exit
PB: predicated region body
PF: predicated region fallthrough
CT: control target
= control target key end

     0   :  { %s4244_s18 = smov 0   ;;  %s4987_s0 = inlined_call_operand.vmem [shape: f32[32,2,16], index: 0, kind: input, shape index: {}]   ;;  %s4988_s1 = inlined_call_operand.vmem [shape: f32[32,2,16], index: 1, kind: input, shape index: {}]   ;;  %s4989_s2 = inlined_call_operand.vmem [shape: bf16[32,16,16], index: 2, kind: input, shape index: {}]   ;;  %s4990_s3 = inlined_call_operand.vmem [shape: bf16[32,16,16], index: 3, kind: input, shape index: {}]   ;;  %s4991_s4 = inlined_call_operand.vmem [shape: f32[32,2,16], index: 4, kind: output, shape index: {0}]   ;;  %s4992_s5 = inlined_call_operand.vmem [shape: f32[32,2,16], index: 5, kind: output, shape index: {1}]  }
   0x1 LB: > { %s3467_s19 = sadd.s32 4294967295, %s4210_s18   ;;  %p3471_p0 = scmp.ge.s32.totalorder %s4210_s18, 1  ;;  %s4210_s18 = sphi %s4244_s18, %s16_s18  }
   0x2   : > { %p226_p1 = scmp.lt.s32.totalorder %s4210_s18, 3 }
   0x4   : > { %p227_p2 = pnand %p3471_p0, %p226_p1 }
   0x6   : > { %230 = sbr.rel (%p227_p2) target bundleno = 486 (0x1e6), region = 36 }
   0xd   : > { %s3472_s20 = sshll.u32 %s3467_s19, 4  ;;  %v4212_v0 = vmov 0.0   ;;  %vm4213_vm0 = vmmov 0   ;;  %vm449_vm1 = vcmask 130048   ;;  %vm2668_vm2 = vcmask 123904  }
   0xe   : > { %3714 = vmatprep.subr.bf16.mxu0 %v4212_v0  ;;  %3720 = vmatprep.subr.bf16.mxu1 %v4212_v0  ;;  %p277_p3 = scmp.lt.s32.totalorder %s3472_s20, 31 }
   0xf   : > { %3716 = vmatprep.mubr.msk.bf16.mxu0 %vm4213_vm0, %v4212_v0  ;;  %3722 = vmatprep.mubr.msk.bf16.mxu1 %vm4213_vm0, %v4212_v0 }
  0x10   : > { %s5003_s20 = smov (!%p277_p3, %s3472_s20), 31 }
  0x11   : > { %s3584_s21 = sshll.u32 %s5003_s20, 3  ;;  %s4262_s22 = sshll.u32 %s5003_s20, 1 }
  0x12   : > { %s4269_s25 = scalar_lea.vmem %s4989_s2, %s3584_s21  ;;  %s4278_s28 = scalar_lea.vmem %s4987_s0, %s4262_s22 }
  0x13   : > { %v4272_v1 = vld [vmem:[%s4269_s25] sm:$0xff]   ;;  %v4281_v2 = vld [vmem:[%s4269_s25 + $0x8] sm:$0xff]   ;;  %v4293_v7 = vld [vmem:[%s4269_s25 + $0x10] sm:$0xff]   ;;  %s4352_s6 = scalar_lea.vmem %s4990_s3, %s3584_s21  ;;  %s4478_s9 = scalar_lea.vmem %s4988_s1, %s4262_s22 }
  0x14   : > { %3715 = vmatpush3.bf16.msra.mxu0 %v4272_v1  ;;  %v315_v3 = vld [vmem:[%s4278_s28] sm:$0x3]  ;;  %v316_v4 = vld [vmem:[%s4278_s28 + $0x2] sm:$0x3]  ;;  %3721 = vmatpush3.bf16.msra.mxu1 %v4281_v2  ;;  %v4297_v8 = vld [vmem:[%s4269_s25 + $0x18] sm:$0xff]   ;;  %s4896_s12 = scalar_lea.vmem %s4991_s4, %s4262_s22  ;;  %s4950_s15 = scalar_lea.vmem %s4992_s5, %s4262_s22 }
  0x15   : > { %v4287_v5 = vpack.c.bf16 %v315_v3, %v315_v3  ;;  %v4289_v6 = vpack.c.bf16 %v316_v4, %v316_v4  ;;  %3726 = vmatprep.subr.bf16.mxu0 %v4212_v0  ;;  %3732 = vmatprep.subr.bf16.mxu1 %v4212_v0  ;;  %v317_v9 = vld [vmem:[%s4278_s28 + $0x4] sm:$0x3]  ;;  %v318_v10 = vld [vmem:[%s4278_s28 + $0x6] sm:$0x3]  ;;  %v4321_v14 = vld [vmem:[%s4269_s25 + $0x28] sm:$0xff]  }
  0x16   : > { %v4312_v11 = vpack.c.bf16 %v317_v9, %v317_v9  ;;  %v4315_v12 = vpack.c.bf16 %v318_v10, %v318_v10  ;;  %v4318_v13 = vld [vmem:[%s4269_s25 + $0x20] sm:$0xff]   ;;  %v319_v15 = vld [vmem:[%s4278_s28 + $0x8] sm:$0x3]  ;;  %v320_v16 = vld [vmem:[%s4278_s28 + $0xa] sm:$0x3] }
  0x17   : > { %3717 = vmatmul.mubr.msk.bf16.vlgmr.msra.gmra.mrb[0].mxu0 %vm449_vm1, %v4287_v5  ;;  %3723 = vmatmul.mubr.msk.bf16.vlgmr.msra.gmra.mrb[0].mxu1 %vm449_vm1, %v4289_v6  ;;  %v4336_v17 = vpack.c.bf16 %v319_v15, %v319_v15  ;;  %v4339_v18 = vpack.c.bf16 %v320_v16, %v320_v16  ;;  %v4342_v19 = vld [vmem:[%s4269_s25 + $0x30] sm:$0xff]   ;;  %v4345_v20 = vld [vmem:[%s4269_s25 + $0x38] sm:$0xff]   ;;  %v321_v21 = vld [vmem:[%s4278_s28 + $0xc] sm:$0x3] }
  0x18   : > { %3727 = vmatpush3.bf16.msra.mxu0 %v4293_v7  ;;  %3733 = vmatpush3.bf16.msra.mxu1 %v4297_v8  ;;  %v322_v22 = vld [vmem:[%s4278_s28 + $0xe] sm:$0x3]  ;;  %v4367_v23 = vpack.c.bf16 %v321_v21, %v321_v21  ;;  %v4373_v25 = vld [vmem:[%s4269_s25 + $0x40] sm:$0xff]   ;;  %v323_v27 = vld [vmem:[%s4278_s28 + $0x10] sm:$0x3] }
  0x19   : > { %3728 = vmatprep.mubr.msk.bf16.mxu0 %vm4213_vm0, %v4212_v0  ;;  %3734 = vmatprep.mubr.msk.bf16.mxu1 %vm4213_vm0, %v4212_v0  ;;  %v4370_v24 = vpack.c.bf16 %v322_v22, %v322_v22  ;;  %v4376_v26 = vld [vmem:[%s4269_s25 + $0x48] sm:$0xff]   ;;  %v324_v28 = vld [vmem:[%s4278_s28 + $0x12] sm:$0x3]  ;;  %v4391_v29 = vpack.c.bf16 %v323_v27, %v323_v27  ;;  %v4400_v32 = vld [vmem:[%s4269_s25 + $0x58] sm:$0xff]  }
  0x1a   : > { %3738 = vmatprep.subr.bf16.mxu0 %v4212_v0  ;;  %3744 = vmatprep.subr.bf16.mxu1 %v4212_v0  ;;  %v4394_v30 = vpack.c.bf16 %v324_v28, %v324_v28  ;;  %v4397_v31 = vld [vmem:[%s4269_s25 + $0x50] sm:$0xff]   ;;  %v4421_v37 = vld [vmem:[%s4269_s25 + $0x60] sm:$0xff]   ;;  %v4424_v38 = vld [vmem:[%s4269_s25 + $0x68] sm:$0xff]  }
  0x1b   : > { %v325_v33 = vld [vmem:[%s4278_s28 + $0x14] sm:$0x3]  ;;  %v326_v34 = vld [vmem:[%s4278_s28 + $0x16] sm:$0x3]  ;;  %v327_v39 = vld [vmem:[%s4278_s28 + $0x18] sm:$0x3] }
  0x1c   : > { %v4415_v35 = vpack.c.bf16 %v325_v33, %v325_v33  ;;  %v4418_v36 = vpack.c.bf16 %v326_v34, %v326_v34  ;;  %v328_v40 = vld [vmem:[%s4278_s28 + $0x1a] sm:$0x3]  ;;  %v4439_v41 = vpack.c.bf16 %v327_v39, %v327_v39  ;;  %v4445_v43 = vld [vmem:[%s4269_s25 + $0x70] sm:$0xff]   ;;  %v329_v45 = vld [vmem:[%s4278_s28 + $0x1c] sm:$0x3] }
  0x1d   : > { %v4442_v42 = vpack.c.bf16 %v328_v40, %v328_v40  ;;  %v4448_v44 = vld [vmem:[%s4269_s25 + $0x78] sm:$0xff]   ;;  %v4463_v47 = vpack.c.bf16 %v329_v45, %v329_v45  ;;  %v4469_v49 = vld [vmem:[%s4352_s6] sm:$0xff]   ;;  %v4472_v50 = vld [vmem:[%s4352_s6 + $0x8] sm:$0xff]  }
  0x1e   : > { %v330_v46 = vld [vmem:[%s4278_s28 + $0x1e] sm:$0x3]  ;;  %v347_v51 = vld [vmem:[%s4478_s9] sm:$0x3]  ;;  %v348_v52 = vld [vmem:[%s4478_s9 + $0x2] sm:$0x3] }
  0x1f   : > { %3729 = vmatmul.mubr.msk.bf16.vlgmr.msra.gmra.mrb[4].mxu0 %vm449_vm1, %v4312_v11  ;;  %3735 = vmatmul.mubr.msk.bf16.vlgmr.msra.gmra.mrb[4].mxu1 %vm449_vm1, %v4315_v12  ;;  %4996 = vst [vmem:[#allocation2_spill] sm:$0xff] %v4442_v42  ;;  %4997 = vst [vmem:[#allocation3_spill] sm:$0xff] %v4463_v47  ;;  %v4466_v48 = vpack.c.bf16 %v330_v46, %v330_v46  ;;  %v4493_v53 = vpack.c.bf16 %v347_v51, %v347_v51  ;;  %v4499_v55 = vld [vmem:[%s4352_s6 + $0x10] sm:$0xff]   ;;  %v4502_v56 = vld [vmem:[%s4352_s6 + $0x18] sm:$0xff]  }
  0x20   : > { %3739 = vmatpush3.bf16.msra.mxu0 %v4318_v13  ;;  %3745 = vmatpush3.bf16.msra.mxu1 %v4321_v14  ;;  %v4496_v54 = vpack.c.bf16 %v348_v52, %v348_v52  ;;  %v349_v57 = vld [vmem:[%s4478_s9 + $0x4] sm:$0x3]  ;;  %v350_v58 = vld [vmem:[%s4478_s9 + $0x6] sm:$0x3]  ;;  %v4526_v62 = vld [vmem:[%s4352_s6 + $0x28] sm:$0xff]  }
  0x21   : > { %3740 = vmatprep.mubr.msk.bf16.mxu0 %vm4213_vm0, %v4212_v0  ;;  %3746 = vmatprep.mubr.msk.bf16.mxu1 %vm4213_vm0, %v4212_v0  ;;  %4998 = vst [vmem:[#allocation4_spill] sm:$0xff] %v4466_v48  ;;  %v4517_v59 = vpack.c.bf16 %v349_v57, %v349_v57  ;;  %v4520_v60 = vpack.c.bf16 %v350_v58, %v350_v58  ;;  %v4523_v61 = vld [vmem:[%s4352_s6 + $0x20] sm:$0xff]   ;;  %v351_v63 = vld [vmem:[%s4478_s9 + $0x8] sm:$0x3]  ;;  %v352_v3 = vld [vmem:[%s4478_s9 + $0xa] sm:$0x3] }
  0x22   : > { %3750 = vmatprep.subr.bf16.mxu0 %v4212_v0  ;;  %3756 = vmatprep.subr.bf16.mxu1 %v4212_v0  ;;  %v4541_v4 = vpack.c.bf16 %v351_v63, %v351_v63  ;;  %v4544_v9 = vpack.c.bf16 %v352_v3, %v352_v3  ;;  %v4547_v10 = vld [vmem:[%s4352_s6 + $0x30] sm:$0xff]   ;;  %v4550_v15 = vld [vmem:[%s4352_s6 + $0x38] sm:$0xff]   ;;  %v353_v16 = vld [vmem:[%s4478_s9 + $0xc] sm:$0x3] }
  0x23   : > { %v354_v21 = vld [vmem:[%s4478_s9 + $0xe] sm:$0x3]  ;;  %v4565_v22 = vpack.c.bf16 %v353_v16, %v353_v16  ;;  %v4571_v28 = vld [vmem:[%s4352_s6 + $0x40] sm:$0xff]   ;;  %v355_v34 = vld [vmem:[%s4478_s9 + $0x10] sm:$0x3] }
  0x24   : > { %v4568_v27 = vpack.c.bf16 %v354_v21, %v354_v21  ;;  %v4574_v33 = vld [vmem:[%s4352_s6 + $0x48] sm:$0xff]   ;;  %v356_v39 = vld [vmem:[%s4478_s9 + $0x12] sm:$0x3]  ;;  %v4589_v40 = vpack.c.bf16 %v355_v34, %v355_v34  ;;  %v4598_v51 = vld [vmem:[%s4352_s6 + $0x58] sm:$0xff]  }
  0x25   : > { %v4592_v45 = vpack.c.bf16 %v356_v39, %v356_v39  ;;  %v4595_v46 = vld [vmem:[%s4352_s6 + $0x50] sm:$0xff]   ;;  %v4619_v3 = vld [vmem:[%s4352_s6 + $0x60] sm:$0xff]   ;;  %v4622_v16 = vld [vmem:[%s4352_s6 + $0x68] sm:$0xff]  }
  0x26   : > { %v357_v52 = vld [vmem:[%s4478_s9 + $0x14] sm:$0x3]  ;;  %v358_v57 = vld [vmem:[%s4478_s9 + $0x16] sm:$0x3]  ;;  %v359_v21 = vld [vmem:[%s4478_s9 + $0x18] sm:$0x3] }
  0x27   : > { %3741 = vmatmul.mubr.msk.bf16.vlgmr.msra.gmra.mrb[8].mxu0 %vm449_vm1, %v4336_v17  ;;  %3747 = vmatmul.mubr.msk.bf16.vlgmr.msra.gmra.mrb[8].mxu1 %vm449_vm1, %v4339_v18  ;;  %v4613_v58 = vpack.c.bf16 %v357_v52, %v357_v52  ;;  %v4616_v63 = vpack.c.bf16 %v358_v57, %v358_v57  ;;  %v360_v34 = vld [vmem:[%s4478_s9 + $0x1a] sm:$0x3]  ;;  %v4637_v39 = vpack.c.bf16 %v359_v21, %v359_v21  ;;  %v4643_v57 = vld [vmem:[%s4352_s6 + $0x70] sm:$0xff]   ;;  %v362_v21 = vld [vmem:[%s4478_s9 + $0x1e] sm:$0x3] }
  0x28   : > { %3751 = vmatpush3.bf16.msra.mxu0 %v4342_v19  ;;  %3757 = vmatpush3.bf16.msra.mxu1 %v4345_v20  ;;  %v4640_v52 = vpack.c.bf16 %v360_v34, %v360_v34 }
  0x29   : > { %3752 = vmatprep.mubr.msk.bf16.mxu0 %vm4213_vm0, %v4212_v0  ;;  %3758 = vmatprep.mubr.msk.bf16.mxu1 %vm4213_vm0, %v4212_v0 }
  0x2a   : > { %3762 = vmatprep.subr.bf16.mxu0 %v4212_v0  ;;  %3768 = vmatprep.subr.bf16.mxu1 %v4212_v0 }
  0x2f   : > { %3753 = vmatmul.mubr.msk.bf16.vlgmr.msra.gmra.mrb[12].mxu0 %vm449_vm1, %v4367_v23  ;;  %3759 = vmatmul.mubr.msk.bf16.vlgmr.msra.gmra.mrb[12].mxu1 %vm449_vm1, %v4370_v24 }
  0x30   : > { %3763 = vmatpush3.bf16.msra.mxu0 %v4373_v25  ;;  %3769 = vmatpush3.bf16.msra.mxu1 %v4376_v26 }
  0x31   : > { %3764 = vmatprep.mubr.msk.bf16.mxu0 %vm4213_vm0, %v4212_v0  ;;  %3770 = vmatprep.mubr.msk.bf16.mxu1 %vm4213_vm0, %v4212_v0 }
  0x32   : > { %3774 = vmatprep.subr.bf16.mxu0 %v4212_v0  ;;  %3780 = vmatprep.subr.bf16.mxu1 %v4212_v0 }
  0x37   : > { %3765 = vmatmul.mubr.msk.bf16.vlgmr.msra.gmra.mrb[16].mxu0 %vm449_vm1, %v4391_v29  ;;  %3771 = vmatmul.mubr.msk.bf16.vlgmr.msra.gmra.mrb[16].mxu1 %vm449_vm1, %v4394_v30 }
  0x38   : > { %3775 = vmatpush3.bf16.msra.mxu0 %v4397_v31  ;;  %3781 = vmatpush3.bf16.msra.mxu1 %v4400_v32 }
  0x39   : > { %3776 = vmatprep.mubr.msk.bf16.mxu0 %vm4213_vm0, %v4212_v0  ;;  %3782 = vmatprep.mubr.msk.bf16.mxu1 %vm4213_vm0, %v4212_v0 }
  0x3a   : > { %3786 = vmatprep.subr.bf16.mxu0 %v4212_v0  ;;  %3792 = vmatprep.subr.bf16.mxu1 %v4212_v0 }
  0x3f   : > { %3777 = vmatmul.mubr.msk.bf16.vlgmr.msra.gmra.mrb[20].mxu0 %vm449_vm1, %v4415_v35  ;;  %3783 = vmatmul.mubr.msk.bf16.vlgmr.msra.gmra.mrb[20].mxu1 %vm449_vm1, %v4418_v36 }
  0x40   : > { %3787 = vmatpush3.bf16.msra.mxu0 %v4421_v37  ;;  %3793 = vmatpush3.bf16.msra.mxu1 %v4424_v38 }
  0x41   : > { %3788 = vmatprep.mubr.msk.bf16.mxu0 %vm4213_vm0, %v4212_v0  ;;  %3794 = vmatprep.mubr.msk.bf16.mxu1 %vm4213_vm0, %v4212_v0 }
  0x42   : > { %3798 = vmatprep.subr.bf16.mxu0 %v4212_v0  ;;  %3804 = vmatprep.subr.bf16.mxu1 %v4212_v0 }
  0x47   : > { %3789 = vmatmul.mubr.msk.bf16.vlgmr.msra.gmra.mrb[24].mxu0 %vm449_vm1, %v4439_v41  ;;  %3795 = vmatmul.mubr.msk.bf16.vlgmr.msra.gmra.mrb[24].mxu1 %vm449_vm1, %v4442_v42  ;;  %v4664_v42 = vpack.c.bf16 %v362_v21, %v362_v21 }
  0x48   : > { %3799 = vmatpush3.bf16.msra.mxu0 %v4445_v43  ;;  %3805 = vmatpush3.bf16.msra.mxu1 %v4448_v44 }
  0x49   : > { %3800 = vmatprep.mubr.msk.bf16.mxu0 %vm4213_vm0, %v4212_v0  ;;  %3806 = vmatprep.mubr.msk.bf16.mxu1 %vm4213_vm0, %v4212_v0 }
  0x4a   : > { %3810 = vmatprep.subr.bf16.mxu0 %v4212_v0  ;;  %3816 = vmatprep.subr.bf16.mxu1 %v4212_v0 }
  0x4f   : > { %3801 = vmatmul.mubr.msk.bf16.vlgmr.msra.gmra.mrb[28].mxu0 %vm449_vm1, %v4463_v47  ;;  %3807 = vmatmul.mubr.msk.bf16.vlgmr.msra.gmra.mrb[28].mxu1 %vm449_vm1, %v4466_v48  ;;  %v4646_v48 = vld [vmem:[%s4352_s6 + $0x78] sm:$0xff]  }
  0x50   : > { %3811 = vmatpush3.bf16.msra.mxu0 %v4469_v49  ;;  %3817 = vmatpush3.bf16.msra.mxu1 %v4472_v50  ;;  %v361_v47 = vld [vmem:[%s4478_s9 + $0x1c] sm:$0x3] }
  0x51   : > { %3812 = vmatprep.mubr.msk.bf16.mxu0 %vm4213_vm0, %v4212_v0  ;;  %3818 = vmatprep.mubr.msk.bf16.mxu1 %vm4213_vm0, %v4212_v0  ;;  %v4661_v34 = vpack.c.bf16 %v361_v47, %v361_v47 }
  0x52   : > { %3822 = vmatprep.subr.bf16.mxu0 %v4212_v0  ;;  %3828 = vmatprep.subr.bf16.mxu1 %v4212_v0 }
  0x57   : > { %3813 = vmatmul.mubr.msk.bf16.vlgmr.msra.gmra.mrb[32].mxu0 %vm449_vm1, %v4493_v53  ;;  %3819 = vmatmul.mubr.msk.bf16.vlgmr.msra.gmra.mrb[32].mxu1 %vm449_vm1, %v4496_v54 }
  0x58   : > { %3823 = vmatpush3.bf16.msra.mxu0 %v4499_v55  ;;  %3829 = vmatpush3.bf16.msra.mxu1 %v4502_v56 }
  0x59   : > { %3824 = vmatprep.mubr.msk.bf16.mxu0 %vm4213_vm0, %v4212_v0  ;;  %3830 = vmatprep.mubr.msk.bf16.mxu1 %vm4213_vm0, %v4212_v0 }
  0x5a   : > { %3834 = vmatprep.subr.bf16.mxu0 %v4212_v0  ;;  %3840 = vmatprep.subr.bf16.mxu1 %v4212_v0 }
  0x5f   : > { %3825 = vmatmul.mubr.msk.bf16.vlgmr.msra.gmra.mrb[36].mxu0 %vm449_vm1, %v4517_v59  ;;  %3831 = vmatmul.mubr.msk.bf16.vlgmr.msra.gmra.mrb[36].mxu1 %vm449_vm1, %v4520_v60 }
  0x60   : > { %3835 = vmatpush3.bf16.msra.mxu0 %v4523_v61  ;;  %3841 = vmatpush3.bf16.msra.mxu1 %v4526_v62 }
  0x61   : > { %3836 = vmatprep.mubr.msk.bf16.mxu0 %vm4213_vm0, %v4212_v0  ;;  %3842 = vmatprep.mubr.msk.bf16.mxu1 %vm4213_vm0, %v4212_v0 }
  0x62   : > { %3846 = vmatprep.subr.bf16.mxu0 %v4212_v0  ;;  %3852 = vmatprep.subr.bf16.mxu1 %v4212_v0 }
  0x67   : > { %3837 = vmatmul.mubr.msk.bf16.vlgmr.msra.gmra.mrb[40].mxu0 %vm449_vm1, %v4541_v4  ;;  %3843 = vmatmul.mubr.msk.bf16.vlgmr.msra.gmra.mrb[40].mxu1 %vm449_vm1, %v4544_v9 }
  0x68   : > { %3847 = vmatpush3.bf16.msra.mxu0 %v4547_v10  ;;  %3853 = vmatpush3.bf16.msra.mxu1 %v4550_v15 }
  0x69   : > { %3848 = vmatprep.mubr.msk.bf16.mxu0 %vm4213_vm0, %v4212_v0  ;;  %3854 = vmatprep.mubr.msk.bf16.mxu1 %vm4213_vm0, %v4212_v0 }
  0x6a   : > { %3858 = vmatprep.subr.bf16.mxu0 %v4212_v0  ;;  %3864 = vmatprep.subr.bf16.mxu1 %v4212_v0 }
  0x6f   : > { %3849 = vmatmul.mubr.msk.bf16.vlgmr.msra.gmra.mrb[44].mxu0 %vm449_vm1, %v4565_v22  ;;  %3855 = vmatmul.mubr.msk.bf16.vlgmr.msra.gmra.mrb[44].mxu1 %vm449_vm1, %v4568_v27 }
  0x70   : > { %3859 = vmatpush3.bf16.msra.mxu0 %v4571_v28  ;;  %3865 = vmatpush3.bf16.msra.mxu1 %v4574_v33 }
  0x71   : > { %3860 = vmatprep.mubr.msk.bf16.mxu0 %vm4213_vm0, %v4212_v0  ;;  %3866 = vmatprep.mubr.msk.bf16.mxu1 %vm4213_vm0, %v4212_v0 }
  0x72   : > { %3870 = vmatprep.subr.bf16.mxu0 %v4212_v0  ;;  %3876 = vmatprep.subr.bf16.mxu1 %v4212_v0 }
  0x77   : > { %3861 = vmatmul.mubr.msk.bf16.vlgmr.msra.gmra.mrb[48].mxu0 %vm449_vm1, %v4589_v40  ;;  %3867 = vmatmul.mubr.msk.bf16.vlgmr.msra.gmra.mrb[48].mxu1 %vm449_vm1, %v4592_v45 }
  0x78   : > { %3871 = vmatpush3.bf16.msra.mxu0 %v4595_v46  ;;  %3877 = vmatpush3.bf16.msra.mxu1 %v4598_v51 }
  0x79   : > { %3872 = vmatprep.mubr.msk.bf16.mxu0 %vm4213_vm0, %v4212_v0  ;;  %3878 = vmatprep.mubr.msk.bf16.mxu1 %vm4213_vm0, %v4212_v0 }
  0x7a   : > { %3882 = vmatprep.subr.bf16.mxu0 %v4212_v0  ;;  %3888 = vmatprep.subr.bf16.mxu1 %v4212_v0 }
  0x7f   : > { %3873 = vmatmul.mubr.msk.bf16.vlgmr.msra.gmra.mrb[52].mxu0 %vm449_vm1, %v4613_v58  ;;  %3879 = vmatmul.mubr.msk.bf16.vlgmr.msra.gmra.mrb[52].mxu1 %vm449_vm1, %v4616_v63 }
  0x80   : > { %3883 = vmatpush3.bf16.msra.mxu0 %v4619_v3  ;;  %3889 = vmatpush3.bf16.msra.mxu1 %v4622_v16 }
  0x81   : > { %3884 = vmatprep.mubr.msk.bf16.mxu0 %vm4213_vm0, %v4212_v0  ;;  %3890 = vmatprep.mubr.msk.bf16.mxu1 %vm4213_vm0, %v4212_v0 }
  0x82   : > { %3894 = vmatprep.subr.bf16.mxu0 %v4212_v0  ;;  %3900 = vmatprep.subr.bf16.mxu1 %v4212_v0 }
  0x87   : > { %3885 = vmatmul.mubr.msk.bf16.vlgmr.msra.gmra.mrb[56].mxu0 %vm449_vm1, %v4637_v39  ;;  %3891 = vmatmul.mubr.msk.bf16.vlgmr.msra.gmra.mrb[56].mxu1 %vm449_vm1, %v4640_v52 }
  0x88   : > { %3895 = vmatpush3.bf16.msra.mxu0 %v4643_v57  ;;  %3901 = vmatpush3.bf16.msra.mxu1 %v4646_v48 }
  0x89   : > { %3896 = vmatprep.mubr.msk.bf16.mxu0 %vm4213_vm0, %v4212_v0  ;;  %3902 = vmatprep.mubr.msk.bf16.mxu1 %vm4213_vm0, %v4212_v0 }
  0x8a   : > { %3906 = vmatprep.subr.bf16.mxu0 %v4212_v0  ;;  %3912 = vmatprep.subr.bf16.mxu1 %v4212_v0 }
  0x8f   : > { %3897 = vmatmul.mubr.msk.bf16.vlgmr.msra.gmra.mrb[60].mxu0 %vm449_vm1, %v4661_v34  ;;  %3903 = vmatmul.mubr.msk.bf16.vlgmr.msra.gmra.mrb[60].mxu1 %vm449_vm1, %v4664_v42 }
  0x90   : > { %3907 = vmatpush3.bf16.msra.mxu0 %v4272_v1  ;;  %3913 = vmatpush3.bf16.msra.mxu1 %v4281_v2 }
  0x91   : > { %3908 = vmatprep.mubr.msk.bf16.mxu0 %vm4213_vm0, %v4212_v0  ;;  %3914 = vmatprep.mubr.msk.bf16.mxu1 %vm4213_vm0, %v4212_v0 }
  0x92   : > { %3918 = vmatprep.subr.bf16.mxu0 %v4212_v0  ;;  %3924 = vmatprep.subr.bf16.mxu1 %v4212_v0 }
  0x97   : > { %3909 = vmatmul.mubr.msk.bf16.vlgmr.msra.gmra.mrb[64].mxu0 %vm449_vm1, %v4493_v53  ;;  %3915 = vmatmul.mubr.msk.bf16.vlgmr.msra.gmra.mrb[64].mxu1 %vm449_vm1, %v4496_v54  ;;  %v4999_v53 = vld [vmem:[#allocation2_spill] sm:$0xff] }
  0x98   : > { %3919 = vmatpush3.bf16.msra.mxu0 %v4293_v7  ;;  %3925 = vmatpush3.bf16.msra.mxu1 %v4297_v8 }
  0x99   : > { %3920 = vmatprep.mubr.msk.bf16.mxu0 %vm4213_vm0, %v4212_v0  ;;  %3926 = vmatprep.mubr.msk.bf16.mxu1 %vm4213_vm0, %v4212_v0 }
  0x9a   : > { %3930 = vmatprep.subr.bf16.mxu0 %v4212_v0  ;;  %3936 = vmatprep.subr.bf16.mxu1 %v4212_v0 }
  0x9f   : > { %3921 = vmatmul.mubr.msk.bf16.vlgmr.msra.gmra.mrb[68].mxu0 %vm449_vm1, %v4517_v59  ;;  %3927 = vmatmul.mubr.msk.bf16.vlgmr.msra.gmra.mrb[68].mxu1 %vm449_vm1, %v4520_v60 }
  0xa0   : > { %3931 = vmatpush3.bf16.msra.mxu0 %v4318_v13  ;;  %3937 = vmatpush3.bf16.msra.mxu1 %v4321_v14 }
  0xa1   : > { %3932 = vmatprep.mubr.msk.bf16.mxu0 %vm4213_vm0, %v4212_v0  ;;  %3938 = vmatprep.mubr.msk.bf16.mxu1 %vm4213_vm0, %v4212_v0 }
  0xa2   : > { %3942 = vmatprep.subr.bf16.mxu0 %v4212_v0  ;;  %3948 = vmatprep.subr.bf16.mxu1 %v4212_v0 }
  0xa7   : > { %3933 = vmatmul.mubr.msk.bf16.vlgmr.msra.gmra.mrb[72].mxu0 %vm449_vm1, %v4541_v4  ;;  %3939 = vmatmul.mubr.msk.bf16.vlgmr.msra.gmra.mrb[72].mxu1 %vm449_vm1, %v4544_v9  ;;  %v5000_v4 = vld [vmem:[#allocation3_spill] sm:$0xff] }
  0xa8   : > { %3943 = vmatpush3.bf16.msra.mxu0 %v4342_v19  ;;  %3949 = vmatpush3.bf16.msra.mxu1 %v4345_v20 }
  0xa9   : > { %3944 = vmatprep.mubr.msk.bf16.mxu0 %vm4213_vm0, %v4212_v0  ;;  %3950 = vmatprep.mubr.msk.bf16.mxu1 %vm4213_vm0, %v4212_v0 }
  0xaa   : > { %3954 = vmatprep.subr.bf16.mxu0 %v4212_v0  ;;  %3960 = vmatprep.subr.bf16.mxu1 %v4212_v0 }
  0xaf   : > { %3945 = vmatmul.mubr.msk.bf16.vlgmr.msra.gmra.mrb[76].mxu0 %vm449_vm1, %v4565_v22  ;;  %3951 = vmatmul.mubr.msk.bf16.vlgmr.msra.gmra.mrb[76].mxu1 %vm449_vm1, %v4568_v27 }
  0xb0   : > { %3955 = vmatpush3.bf16.msra.mxu0 %v4373_v25  ;;  %3961 = vmatpush3.bf16.msra.mxu1 %v4376_v26 }
  0xb1   : > { %3956 = vmatprep.mubr.msk.bf16.mxu0 %vm4213_vm0, %v4212_v0  ;;  %3962 = vmatprep.mubr.msk.bf16.mxu1 %vm4213_vm0, %v4212_v0 }
  0xb2   : > { %3966 = vmatprep.subr.bf16.mxu0 %v4212_v0  ;;  %3972 = vmatprep.subr.bf16.mxu1 %v4212_v0 }
  0xb7   : > { %3957 = vmatmul.mubr.msk.bf16.vlgmr.msra.gmra.mrb[80].mxu0 %vm449_vm1, %v4589_v40  ;;  %3963 = vmatmul.mubr.msk.bf16.vlgmr.msra.gmra.mrb[80].mxu1 %vm449_vm1, %v4592_v45 }
  0xb8   : > { %3967 = vmatpush3.bf16.msra.mxu0 %v4397_v31  ;;  %3973 = vmatpush3.bf16.msra.mxu1 %v4400_v32 }
  0xb9   : > { %3968 = vmatprep.mubr.msk.bf16.mxu0 %vm4213_vm0, %v4212_v0  ;;  %3974 = vmatprep.mubr.msk.bf16.mxu1 %vm4213_vm0, %v4212_v0 }
  0xba   : > { %3978 = vmatprep.subr.bf16.mxu0 %v4212_v0  ;;  %3984 = vmatprep.subr.bf16.mxu1 %v4212_v0 }
  0xbf   : > { %3969 = vmatmul.mubr.msk.bf16.vlgmr.msra.gmra.mrb[84].mxu0 %vm449_vm1, %v4613_v58  ;;  %3975 = vmatmul.mubr.msk.bf16.vlgmr.msra.gmra.mrb[84].mxu1 %vm449_vm1, %v4616_v63 }
  0xc0   : > { %3979 = vmatpush3.bf16.msra.mxu0 %v4421_v37  ;;  %3985 = vmatpush3.bf16.msra.mxu1 %v4424_v38 }
  0xc1   : > { %3980 = vmatprep.mubr.msk.bf16.mxu0 %vm4213_vm0, %v4212_v0  ;;  %3986 = vmatprep.mubr.msk.bf16.mxu1 %vm4213_vm0, %v4212_v0 }
  0xc2   : > { %3990 = vmatprep.subr.bf16.mxu0 %v4212_v0  ;;  %3996 = vmatprep.subr.bf16.mxu1 %v4212_v0 }
  0xc7   : > { %3981 = vmatmul.mubr.msk.bf16.vlgmr.msra.gmra.mrb[88].mxu0 %vm449_vm1, %v4637_v39  ;;  %3987 = vmatmul.mubr.msk.bf16.vlgmr.msra.gmra.mrb[88].mxu1 %vm449_vm1, %v4640_v52 }
  0xc8   : > { %3991 = vmatpush3.bf16.msra.mxu0 %v4445_v43  ;;  %3997 = vmatpush3.bf16.msra.mxu1 %v4448_v44 }
  0xc9   : > { %3992 = vmatprep.mubr.msk.bf16.mxu0 %vm4213_vm0, %v4212_v0  ;;  %3998 = vmatprep.mubr.msk.bf16.mxu1 %vm4213_vm0, %v4212_v0 }
  0xca   : > { %4002 = vmatprep.subr.bf16.mxu0 %v4212_v0  ;;  %4008 = vmatprep.subr.bf16.mxu1 %v4212_v0 }
  0xcf   : > { %3993 = vmatmul.mubr.msk.bf16.vlgmr.msra.gmra.mrb[92].mxu0 %vm449_vm1, %v4661_v34  ;;  %3999 = vmatmul.mubr.msk.bf16.vlgmr.msra.gmra.mrb[92].mxu1 %vm449_vm1, %v4664_v42 }
  0xd0   : > { %4003 = vmatpush3.bf16.msra.mxu0 %v4469_v49  ;;  %4009 = vmatpush3.bf16.msra.mxu1 %v4472_v50 }
  0xd1   : > { %4004 = vmatprep.mubr.msk.bf16.mxu0 %vm4213_vm0, %v4212_v0  ;;  %4010 = vmatprep.mubr.msk.bf16.mxu1 %vm4213_vm0, %v4212_v0 }
  0xd2   : > { %4014 = vmatprep.subr.bf16.mxu0 %v4212_v0  ;;  %4020 = vmatprep.subr.bf16.mxu1 %v4212_v0 }
  0xd7   : > { %4005 = vmatmul.mubr.msk.bf16.vlgmr.msra.gmra.mrb[64].mxu0 %vm449_vm1, %v4287_v5  ;;  %4011 = vmatmul.mubr.msk.bf16.vlgmr.msra.gmra.mrb[64].mxu1 %vm449_vm1, %v4289_v6 }
  0xd8   : > { %4015 = vmatpush3.bf16.msra.mxu0 %v4499_v55  ;;  %4021 = vmatpush3.bf16.msra.mxu1 %v4502_v56 }
  0xd9   : > { %4016 = vmatprep.mubr.msk.bf16.mxu0 %vm4213_vm0, %v4212_v0  ;;  %4022 = vmatprep.mubr.msk.bf16.mxu1 %vm4213_vm0, %v4212_v0 }
  0xda   : > { %4026 = vmatprep.subr.bf16.mxu0 %v4212_v0  ;;  %4032 = vmatprep.subr.bf16.mxu1 %v4212_v0 }
  0xdf   : > { %4017 = vmatmul.mubr.msk.bf16.vlgmr.msra.gmra.mrb[68].mxu0 %vm449_vm1, %v4312_v11  ;;  %4023 = vmatmul.mubr.msk.bf16.vlgmr.msra.gmra.mrb[68].mxu1 %vm449_vm1, %v4315_v12 }
  0xe0   : > { %4027 = vmatpush3.bf16.msra.mxu0 %v4523_v61  ;;  %4033 = vmatpush3.bf16.msra.mxu1 %v4526_v62 }
  0xe1   : > { %4028 = vmatprep.mubr.msk.bf16.mxu0 %vm4213_vm0, %v4212_v0  ;;  %4034 = vmatprep.mubr.msk.bf16.mxu1 %vm4213_vm0, %v4212_v0 }
  0xe2   : > { %4038 = vmatprep.subr.bf16.mxu0 %v4212_v0  ;;  %4044 = vmatprep.subr.bf16.mxu1 %v4212_v0 }
  0xe7   : > { %4029 = vmatmul.mubr.msk.bf16.vlgmr.msra.gmra.mrb[72].mxu0 %vm449_vm1, %v4336_v17  ;;  %4035 = vmatmul.mubr.msk.bf16.vlgmr.msra.gmra.mrb[72].mxu1 %vm449_vm1, %v4339_v18 }
  0xe8   : > { %4039 = vmatpush3.bf16.msra.mxu0 %v4547_v10  ;;  %4045 = vmatpush3.bf16.msra.mxu1 %v4550_v15 }
  0xe9   : > { %4040 = vmatprep.mubr.msk.bf16.mxu0 %vm4213_vm0, %v4212_v0  ;;  %4046 = vmatprep.mubr.msk.bf16.mxu1 %vm4213_vm0, %v4212_v0 }
  0xea   : > { %v4806_v1 = vpop.f32.mrb[0].mxu0  ;;  %4050 = vmatprep.subr.bf16.mxu0 %v4212_v0  ;;  %v4811_v2 = vpop.f32.mrb[0].mxu1  ;;  %4056 = vmatprep.subr.bf16.mxu1 %v4212_v0 }
  0xeb   : > { %v3718_v5 = vpop.f32.mrb[1].mxu0  ;;  %v3724_v6 = vpop.f32.mrb[1].mxu1 }
  0xec   : > { %v490_v7 = vpop.f32.mrb[2].mxu0  ;;  %v539_v8 = vpop.f32.mrb[2].mxu1 }
  0xed   : > { %v3719_v11 = vpop.f32.mrb[3].mxu0  ;;  %v3725_v12 = vpop.f32.mrb[3].mxu1 }
  0xef   : > { %4041 = vmatmul.mubr.msk.bf16.vlgmr.msra.gmra.mrb[76].mxu0 %vm449_vm1, %v4367_v23  ;;  %4047 = vmatmul.mubr.msk.bf16.vlgmr.msra.gmra.mrb[76].mxu1 %vm449_vm1, %v4370_v24 }
  0xf0   : > { %4051 = vmatpush3.bf16.msra.mxu0 %v4571_v28  ;;  %4057 = vmatpush3.bf16.msra.mxu1 %v4574_v33 }
  0xf1   : > { %4052 = vmatprep.mubr.msk.bf16.mxu0 %vm4213_vm0, %v4212_v0  ;;  %4058 = vmatprep.mubr.msk.bf16.mxu1 %vm4213_vm0, %v4212_v0 }
  0xf2   : > { %v4822_v13 = vpop.f32.mrb[4].mxu0  ;;  %4062 = vmatprep.subr.bf16.mxu0 %v4212_v0  ;;  %v4827_v14 = vpop.f32.mrb[4].mxu1  ;;  %4068 = vmatprep.subr.bf16.mxu1 %v4212_v0 }
  0xf3   : > { %v3730_v17 = vpop.f32.mrb[5].mxu0  ;;  %v3736_v18 = vpop.f32.mrb[5].mxu1 }
  0xf4   : > { %v588_v19 = vpop.f32.mrb[6].mxu0  ;;  %v637_v20 = vpop.f32.mrb[6].mxu1 }
  0xf5   : > { %v3731_v23 = vpop.f32.mrb[7].mxu0  ;;  %v3737_v24 = vpop.f32.mrb[7].mxu1 }
  0xf7   : > { %4053 = vmatmul.mubr.msk.bf16.vlgmr.msra.gmra.mrb[80].mxu0 %vm449_vm1, %v4391_v29  ;;  %4059 = vmatmul.mubr.msk.bf16.vlgmr.msra.gmra.mrb[80].mxu1 %vm449_vm1, %v4394_v30 }
  0xf8   : > { %4063 = vmatpush3.bf16.msra.mxu0 %v4595_v46  ;;  %4069 = vmatpush3.bf16.msra.mxu1 %v4598_v51 }
  0xf9   : > { %4064 = vmatprep.mubr.msk.bf16.mxu0 %vm4213_vm0, %v4212_v0  ;;  %4070 = vmatprep.mubr.msk.bf16.mxu1 %vm4213_vm0, %v4212_v0 }
  0xfa   : > { %v4838_v25 = vpop.f32.mrb[8].mxu0  ;;  %4074 = vmatprep.subr.bf16.mxu0 %v4212_v0  ;;  %v4843_v26 = vpop.f32.mrb[8].mxu1  ;;  %4080 = vmatprep.subr.bf16.mxu1 %v4212_v0 }
  0xfb   : > { %v3742_v29 = vpop.f32.mrb[9].mxu0  ;;  %v3748_v30 = vpop.f32.mrb[9].mxu1 }
  0xfc   : > { %v686_v31 = vpop.f32.mrb[10].mxu0  ;;  %v735_v32 = vpop.f32.mrb[10].mxu1 }
  0xfd   : > { %v3743_v37 = vpop.f32.mrb[11].mxu0  ;;  %v3749_v38 = vpop.f32.mrb[11].mxu1 }
  0xff   : > { %4065 = vmatmul.mubr.msk.bf16.vlgmr.msra.gmra.mrb[84].mxu0 %vm449_vm1, %v4415_v35  ;;  %4071 = vmatmul.mubr.msk.bf16.vlgmr.msra.gmra.mrb[84].mxu1 %vm449_vm1, %v4418_v36 }
 0x100   : > { %4075 = vmatpush3.bf16.msra.mxu0 %v4619_v3  ;;  %4081 = vmatpush3.bf16.msra.mxu1 %v4622_v16 }
 0x101   : > { %4076 = vmatprep.mubr.msk.bf16.mxu0 %vm4213_vm0, %v4212_v0  ;;  %4082 = vmatprep.mubr.msk.bf16.mxu1 %vm4213_vm0, %v4212_v0 }
 0x102   : > { %v4854_v42 = vpop.f32.mrb[12].mxu0  ;;  %4086 = vmatprep.subr.bf16.mxu0 %v4212_v0  ;;  %v4859_v43 = vpop.f32.mrb[12].mxu1  ;;  %4092 = vmatprep.subr.bf16.mxu1 %v4212_v0 }
 0x103   : > { %v3754_v35 = vpop.f32.mrb[13].mxu0  ;;  %v3760_v36 = vpop.f32.mrb[13].mxu1 }
 0x104   : > { %v784_v44 = vpop.f32.mrb[14].mxu0  ;;  %v833_v47 = vpop.f32.mrb[14].mxu1 }
 0x105   : > { %v3755_v49 = vpop.f32.mrb[15].mxu0  ;;  %v3761_v50 = vpop.f32.mrb[15].mxu1 }
 0x107   : > { %4077 = vmatmul.mubr.msk.bf16.vlgmr.msra.gmra.mrb[88].mxu0 %vm449_vm1, %v4439_v41  ;;  %4083 = vmatmul.mubr.msk.bf16.vlgmr.msra.gmra.mrb[88].mxu1 %vm449_vm1, %v4999_v53 }
 0x108   : > { %4087 = vmatpush3.bf16.msra.mxu0 %v4643_v57  ;;  %4093 = vmatpush3.bf16.msra.mxu1 %v4646_v48  ;;  %v5001_v48 = vld [vmem:[#allocation4_spill] sm:$0xff] }
 0x109   : > { %4088 = vmatprep.mubr.msk.bf16.mxu0 %vm4213_vm0, %v4212_v0  ;;  %4094 = vmatprep.mubr.msk.bf16.mxu1 %vm4213_vm0, %v4212_v0 }
 0x10a   : > { %v4870_v54 = vpop.f32.mrb[16].mxu0  ;;  %v4874_v55 = vpop.f32.mrb[16].mxu1 }
 0x10b   : > { %v3766_v56 = vpop.f32.mrb[17].mxu0  ;;  %v3772_v59 = vpop.f32.mrb[17].mxu1 }
 0x10c   : > { %v882_v41 = vpop.f32.mrb[18].mxu0  ;;  %v931_v60 = vpop.f32.mrb[18].mxu1 }
 0x10d   : > { %v3767_v61 = vpop.f32.mrb[19].mxu0  ;;  %v3773_v62 = vpop.f32.mrb[19].mxu1 }
 0x10f   : > { %4089 = vmatmul.mubr.msk.bf16.vlgmr.msra.gmra.mrb[92].mxu0 %vm449_vm1, %v5000_v4  ;;  %4095 = vmatmul.mubr.msk.bf16.vlgmr.msra.gmra.mrb[92].mxu1 %vm449_vm1, %v5001_v48 }
 0x112   : > { %v4880_v9 = vpop.f32.mrb[20].mxu0  ;;  %v4882_v10 = vpop.f32.mrb[20].mxu1 }
 0x113   : > { %v3778_v15 = vpop.f32.mrb[21].mxu0  ;;  %v3784_v0 = vpop.f32.mrb[21].mxu1 }
 0x114   : > { %v980_v22 = vpop.f32.mrb[22].mxu0  ;;  %v1029_v27 = vpop.f32.mrb[22].mxu1 }
 0x115   : > { %v3779_v28 = vpop.f32.mrb[23].mxu0  ;;  %v3785_v33 = vpop.f32.mrb[23].mxu1 }
 0x11a   : > { %v4884_v40 = vpop.f32.mrb[24].mxu0  ;;  %v4886_v45 = vpop.f32.mrb[24].mxu1 }
 0x11b   : > { %v3790_v46 = vpop.f32.mrb[25].mxu0  ;;  %v3796_v51 = vpop.f32.mrb[25].mxu1 }
 0x11c   : > { %v1078_v58 = vpop.f32.mrb[26].mxu0  ;;  %v1127_v63 = vpop.f32.mrb[26].mxu1 }
 0x11d   : > { %v3791_v3 = vpop.f32.mrb[27].mxu0  ;;  %v3797_v16 = vpop.f32.mrb[27].mxu1 }
 0x122   : > { %v4888_v39 = vpop.f32.mrb[28].mxu0  ;;  %v4890_v52 = vpop.f32.mrb[28].mxu1 }
 0x123   : > { %v3802_v57 = vpop.f32.mrb[29].mxu0  ;;  %v3808_v21 = vpop.f32.mrb[29].mxu1 }
 0x124   : > { %v1176_v34 = vpop.f32.mrb[30].mxu0  ;;  %v1225_v5 = vpop.f32.mrb[30].mxu1 }
 0x125   : > { %v3803_v6 = vpop.f32.mrb[31].mxu0  ;;  %v3809_v7 = vpop.f32.mrb[31].mxu1 }
 0x12a   : > { %v1271_v8 = vpop.f32.mrb[32].mxu0  ;;  %v1320_v12 = vpop.f32.mrb[32].mxu1 }
 0x12b   : > { %v2652_v11 = vsub.f32 %v4806_v1, %v1271_v8  ;;  %v3814_v17 = vpop.f32.mrb[33].mxu0  ;;  %v2653_v18 = vsub.f32 %v4811_v2, %v1320_v12  ;;  %v3820_v19 = vpop.f32.mrb[33].mxu1 }
 0x12c   : > { %v1274_v20 = vpop.f32.mrb[34].mxu0  ;;  %v1323_v23 = vpop.f32.mrb[34].mxu1 }
 0x12d   : > { %2669 = vst.msk [vmem:[%s4896_s12] sm:$0x3] %vm2668_vm2, %v2652_v11  ;;  %v3815_v24 = vpop.f32.mrb[35].mxu0  ;;  %2670 = vst.msk [vmem:[%s4896_s12 + $0x2] sm:$0x3] %vm2668_vm2, %v2653_v18  ;;  %v3821_v29 = vpop.f32.mrb[35].mxu1 }
 0x132   : > { %v1369_v30 = vpop.f32.mrb[36].mxu0  ;;  %v1418_v32 = vpop.f32.mrb[36].mxu1 }
 0x133   : > { %v2654_v31 = vsub.f32 %v4822_v13, %v1369_v30  ;;  %v3826_v1 = vpop.f32.mrb[37].mxu0  ;;  %v2655_v37 = vsub.f32 %v4827_v14, %v1418_v32  ;;  %v3832_v38 = vpop.f32.mrb[37].mxu1 }
 0x134   : > { %v1372_v2 = vpop.f32.mrb[38].mxu0  ;;  %v1421_v35 = vpop.f32.mrb[38].mxu1 }
 0x135   : > { %2671 = vst.msk [vmem:[%s4896_s12 + $0x4] sm:$0x3] %vm2668_vm2, %v2654_v31  ;;  %v3827_v36 = vpop.f32.mrb[39].mxu0  ;;  %2672 = vst.msk [vmem:[%s4896_s12 + $0x6] sm:$0x3] %vm2668_vm2, %v2655_v37  ;;  %v3833_v44 = vpop.f32.mrb[39].mxu1 }
 0x13a   : > { %v1467_v47 = vpop.f32.mrb[40].mxu0  ;;  %v1516_v50 = vpop.f32.mrb[40].mxu1 }
 0x13b   : > { %v2656_v49 = vsub.f32 %v4838_v25, %v1467_v47  ;;  %v3838_v13 = vpop.f32.mrb[41].mxu0  ;;  %v2657_v53 = vsub.f32 %v4843_v26, %v1516_v50  ;;  %v3844_v56 = vpop.f32.mrb[41].mxu1 }
 0x13c   : > { %v1470_v14 = vpop.f32.mrb[42].mxu0  ;;  %v1519_v59 = vpop.f32.mrb[42].mxu1 }
 0x13d   : > { %2673 = vst.msk [vmem:[%s4896_s12 + $0x8] sm:$0x3] %vm2668_vm2, %v2656_v49  ;;  %v3839_v41 = vpop.f32.mrb[43].mxu0  ;;  %2674 = vst.msk [vmem:[%s4896_s12 + $0xa] sm:$0x3] %vm2668_vm2, %v2657_v53  ;;  %v3845_v60 = vpop.f32.mrb[43].mxu1 }
 0x142   : > { %v1565_v61 = vpop.f32.mrb[44].mxu0  ;;  %v1614_v4 = vpop.f32.mrb[44].mxu1 }
 0x143   : > { %v2658_v62 = vsub.f32 %v4854_v42, %v1565_v61  ;;  %v3850_v25 = vpop.f32.mrb[45].mxu0  ;;  %v2659_v48 = vsub.f32 %v4859_v43, %v1614_v4  ;;  %v3856_v15 = vpop.f32.mrb[45].mxu1 }
 0x144   : > { %v1568_v26 = vpop.f32.mrb[46].mxu0  ;;  %v1617_v0 = vpop.f32.mrb[46].mxu1 }
 0x145   : > { %2675 = vst.msk [vmem:[%s4896_s12 + $0xc] sm:$0x3] %vm2668_vm2, %v2658_v62  ;;  %v3851_v22 = vpop.f32.mrb[47].mxu0  ;;  %2676 = vst.msk [vmem:[%s4896_s12 + $0xe] sm:$0x3] %vm2668_vm2, %v2659_v48  ;;  %v3857_v27 = vpop.f32.mrb[47].mxu1 }
 0x14a   : > { %v1663_v28 = vpop.f32.mrb[48].mxu0  ;;  %v1712_v46 = vpop.f32.mrb[48].mxu1 }
 0x14b   : > { %v2660_v33 = vsub.f32 %v4870_v54, %v1663_v28  ;;  %v3862_v42 = vpop.f32.mrb[49].mxu0  ;;  %v2661_v51 = vsub.f32 %v4874_v55, %v1712_v46  ;;  %v3868_v58 = vpop.f32.mrb[49].mxu1 }
 0x14c   : > { %v1666_v43 = vpop.f32.mrb[50].mxu0  ;;  %v1715_v63 = vpop.f32.mrb[50].mxu1 }
 0x14d   : > { %2677 = vst.msk [vmem:[%s4896_s12 + $0x10] sm:$0x3] %vm2668_vm2, %v2660_v33  ;;  %v3863_v3 = vpop.f32.mrb[51].mxu0  ;;  %2678 = vst.msk [vmem:[%s4896_s12 + $0x12] sm:$0x3] %vm2668_vm2, %v2661_v51  ;;  %v3869_v16 = vpop.f32.mrb[51].mxu1 }
 0x152   : > { %v1761_v57 = vpop.f32.mrb[52].mxu0  ;;  %v1810_v34 = vpop.f32.mrb[52].mxu1 }
 0x153   : > { %v2662_v21 = vsub.f32 %v4880_v9, %v1761_v57  ;;  %v3874_v54 = vpop.f32.mrb[53].mxu0  ;;  %v2663_v5 = vsub.f32 %v4882_v10, %v1810_v34  ;;  %v3880_v6 = vpop.f32.mrb[53].mxu1 }
 0x154   : > { %v1764_v55 = vpop.f32.mrb[54].mxu0  ;;  %v1813_v7 = vpop.f32.mrb[54].mxu1 }
 0x155   : > { %2679 = vst.msk [vmem:[%s4896_s12 + $0x14] sm:$0x3] %vm2668_vm2, %v2662_v21  ;;  %v3875_v8 = vpop.f32.mrb[55].mxu0  ;;  %2680 = vst.msk [vmem:[%s4896_s12 + $0x16] sm:$0x3] %vm2668_vm2, %v2663_v5  ;;  %v3881_v11 = vpop.f32.mrb[55].mxu1 }
 0x15a   : > { %v1859_v12 = vpop.f32.mrb[56].mxu0  ;;  %v1908_v18 = vpop.f32.mrb[56].mxu1 }
 0x15b   : > { %v2664_v17 = vsub.f32 %v4884_v40, %v1859_v12  ;;  %v3886_v9 = vpop.f32.mrb[57].mxu0  ;;  %v2665_v19 = vsub.f32 %v4886_v45, %v1908_v18  ;;  %v3892_v20 = vpop.f32.mrb[57].mxu1 }
 0x15c   : > { %v1862_v10 = vpop.f32.mrb[58].mxu0  ;;  %v1911_v23 = vpop.f32.mrb[58].mxu1 }
 0x15d   : > { %2681 = vst.msk [vmem:[%s4896_s12 + $0x18] sm:$0x3] %vm2668_vm2, %v2664_v17  ;;  %v3887_v24 = vpop.f32.mrb[59].mxu0  ;;  %2682 = vst.msk [vmem:[%s4896_s12 + $0x1a] sm:$0x3] %vm2668_vm2, %v2665_v19  ;;  %v3893_v29 = vpop.f32.mrb[59].mxu1 }
 0x162   : > { %v1957_v30 = vpop.f32.mrb[60].mxu0  ;;  %v2006_v40 = vpop.f32.mrb[60].mxu1 }
 0x163   : > { %v2666_v31 = vsub.f32 %v4888_v39, %v1957_v30  ;;  %v3898_v32 = vpop.f32.mrb[61].mxu0  ;;  %v2667_v1 = vsub.f32 %v4890_v52, %v2006_v40  ;;  %v3904_v37 = vpop.f32.mrb[61].mxu1 }
 0x164   : > { %v1960_v45 = vpop.f32.mrb[62].mxu0  ;;  %v2009_v38 = vpop.f32.mrb[62].mxu1 }
 0x165   : > { %2683 = vst.msk [vmem:[%s4896_s12 + $0x1c] sm:$0x3] %vm2668_vm2, %v2666_v31  ;;  %v3899_v2 = vpop.f32.mrb[63].mxu0  ;;  %2684 = vst.msk [vmem:[%s4896_s12 + $0x1e] sm:$0x3] %vm2668_vm2, %v2667_v1  ;;  %v3905_v35 = vpop.f32.mrb[63].mxu1 }
 0x1aa   : > { %v2719_v39 = vpop.f32.mrb[64].mxu0  ;;  %v2759_v52 = vpop.f32.mrb[64].mxu1 }
 0x1ab   : > { %3325 = vst.msk [vmem:[%s4950_s15] sm:$0x3] %vm2668_vm2, %v2719_v39  ;;  %v4006_v36 = vpop.f32.mrb[65].mxu0  ;;  %3326 = vst.msk [vmem:[%s4950_s15 + $0x2] sm:$0x3] %vm2668_vm2, %v2759_v52  ;;  %v4012_v44 = vpop.f32.mrb[65].mxu1 }
 0x1ac   : > { %v2722_v47 = vpop.f32.mrb[66].mxu0  ;;  %v2762_v49 = vpop.f32.mrb[66].mxu1 }
 0x1ad   : > { %v4007_v50 = vpop.f32.mrb[67].mxu0  ;;  %v4013_v13 = vpop.f32.mrb[67].mxu1 }
 0x1b2   : > { %v2799_v53 = vpop.f32.mrb[68].mxu0  ;;  %v2839_v56 = vpop.f32.mrb[68].mxu1 }
 0x1b3   : > { %3327 = vst.msk [vmem:[%s4950_s15 + $0x4] sm:$0x3] %vm2668_vm2, %v2799_v53  ;;  %v4018_v14 = vpop.f32.mrb[69].mxu0  ;;  %3328 = vst.msk [vmem:[%s4950_s15 + $0x6] sm:$0x3] %vm2668_vm2, %v2839_v56  ;;  %v4024_v59 = vpop.f32.mrb[69].mxu1 }
 0x1b4   : > { %v2802_v41 = vpop.f32.mrb[70].mxu0  ;;  %v2842_v60 = vpop.f32.mrb[70].mxu1 }
 0x1b5   : > { %v4019_v61 = vpop.f32.mrb[71].mxu0  ;;  %v4025_v62 = vpop.f32.mrb[71].mxu1 }
 0x1ba   : > { %v2879_v4 = vpop.f32.mrb[72].mxu0  ;;  %v2919_v25 = vpop.f32.mrb[72].mxu1 }
 0x1bb   : > { %3329 = vst.msk [vmem:[%s4950_s15 + $0x8] sm:$0x3] %vm2668_vm2, %v2879_v4  ;;  %v4030_v48 = vpop.f32.mrb[73].mxu0  ;;  %3330 = vst.msk [vmem:[%s4950_s15 + $0xa] sm:$0x3] %vm2668_vm2, %v2919_v25  ;;  %v4036_v15 = vpop.f32.mrb[73].mxu1 }
 0x1bc   : > { %v2882_v26 = vpop.f32.mrb[74].mxu0  ;;  %v2922_v0 = vpop.f32.mrb[74].mxu1 }
 0x1bd   : > { %v4031_v22 = vpop.f32.mrb[75].mxu0  ;;  %v4037_v27 = vpop.f32.mrb[75].mxu1 }
 0x1c2   : > { %v2959_v28 = vpop.f32.mrb[76].mxu0  ;;  %v2999_v33 = vpop.f32.mrb[76].mxu1 }
 0x1c3   : > { %3331 = vst.msk [vmem:[%s4950_s15 + $0xc] sm:$0x3] %vm2668_vm2, %v2959_v28  ;;  %v4042_v46 = vpop.f32.mrb[77].mxu0  ;;  %3332 = vst.msk [vmem:[%s4950_s15 + $0xe] sm:$0x3] %vm2668_vm2, %v2999_v33  ;;  %v4048_v42 = vpop.f32.mrb[77].mxu1 }
 0x1c4   : > { %v2962_v51 = vpop.f32.mrb[78].mxu0  ;;  %v3002_v58 = vpop.f32.mrb[78].mxu1 }
 0x1c5   : > { %v4043_v43 = vpop.f32.mrb[79].mxu0  ;;  %v4049_v63 = vpop.f32.mrb[79].mxu1 }
 0x1ca   : > { %v3039_v3 = vpop.f32.mrb[80].mxu0  ;;  %v3079_v16 = vpop.f32.mrb[80].mxu1 }
 0x1cb   : > { %3333 = vst.msk [vmem:[%s4950_s15 + $0x10] sm:$0x3] %vm2668_vm2, %v3039_v3  ;;  %v4054_v57 = vpop.f32.mrb[81].mxu0  ;;  %3334 = vst.msk [vmem:[%s4950_s15 + $0x12] sm:$0x3] %vm2668_vm2, %v3079_v16  ;;  %v4060_v21 = vpop.f32.mrb[81].mxu1 }
 0x1cc   : > { %v3042_v34 = vpop.f32.mrb[82].mxu0  ;;  %v3082_v54 = vpop.f32.mrb[82].mxu1 }
 0x1cd   : > { %v4055_v5 = vpop.f32.mrb[83].mxu0  ;;  %v4061_v6 = vpop.f32.mrb[83].mxu1 }
 0x1d2   : > { %v3119_v55 = vpop.f32.mrb[84].mxu0  ;;  %v3159_v7 = vpop.f32.mrb[84].mxu1 }
 0x1d3   : > { %3335 = vst.msk [vmem:[%s4950_s15 + $0x14] sm:$0x3] %vm2668_vm2, %v3119_v55  ;;  %v4066_v8 = vpop.f32.mrb[85].mxu0  ;;  %3336 = vst.msk [vmem:[%s4950_s15 + $0x16] sm:$0x3] %vm2668_vm2, %v3159_v7  ;;  %v4072_v11 = vpop.f32.mrb[85].mxu1 }
 0x1d4   : > { %v3122_v12 = vpop.f32.mrb[86].mxu0  ;;  %v3162_v17 = vpop.f32.mrb[86].mxu1 }
 0x1d5   : > { %v4067_v18 = vpop.f32.mrb[87].mxu0  ;;  %v4073_v9 = vpop.f32.mrb[87].mxu1 }
 0x1da   : > { %v3199_v19 = vpop.f32.mrb[88].mxu0  ;;  %v3239_v20 = vpop.f32.mrb[88].mxu1 }
 0x1db   : > { %3337 = vst.msk [vmem:[%s4950_s15 + $0x18] sm:$0x3] %vm2668_vm2, %v3199_v19  ;;  %v4078_v10 = vpop.f32.mrb[89].mxu0  ;;  %3338 = vst.msk [vmem:[%s4950_s15 + $0x1a] sm:$0x3] %vm2668_vm2, %v3239_v20  ;;  %v4084_v23 = vpop.f32.mrb[89].mxu1 }
 0x1dc   : > { %v3202_v24 = vpop.f32.mrb[90].mxu0  ;;  %v3242_v29 = vpop.f32.mrb[90].mxu1 }
 0x1dd   : > { %v4079_v30 = vpop.f32.mrb[91].mxu0  ;;  %v4085_v31 = vpop.f32.mrb[91].mxu1 }
 0x1e2   : > { %v3279_v40 = vpop.f32.mrb[92].mxu0  ;;  %v3319_v32 = vpop.f32.mrb[92].mxu1 }
 0x1e3   : > { %3339 = vst.msk [vmem:[%s4950_s15 + $0x1c] sm:$0x3] %vm2668_vm2, %v3279_v40  ;;  %v4090_v1 = vpop.f32.mrb[93].mxu0  ;;  %3340 = vst.msk [vmem:[%s4950_s15 + $0x1e] sm:$0x3] %vm2668_vm2, %v3319_v32  ;;  %v4096_v37 = vpop.f32.mrb[93].mxu1 }
 0x1e4   : > { %v3282_v45 = vpop.f32.mrb[94].mxu0  ;;  %v3322_v38 = vpop.f32.mrb[94].mxu1 }
 0x1e5   : > { %v4091_v2 = vpop.f32.mrb[95].mxu0  ;;  %v4097_v35 = vpop.f32.mrb[95].mxu1 }
 0x1e6 PF: > { %s16_s18 = sadd.s32 1, %s4210_s18  }
 0x1e7   : > { %p13_p4 = scmp.ge.s32.totalorder %s16_s18, 4  }
 0x1e9   :  { %15 = sbr.rel (!%p13_p4) target bundleno = 1 (0x1), region = 87 }

// kernel: fno2d_forward.8
= control target key start
LH: loop header
LB: loop body
LE: loop exit
PB: predicated region body
PF: predicated region fallthrough
CT: control target
= control target key end

     0   :  { %s1300_s15 = smov 0   ;;  %s1657_s0 = inlined_call_operand.vmem [shape: f32[512,16], index: 0, kind: input, shape index: {}]   ;;  %s1658_s1 = inlined_call_operand.vmem [shape: bf16[512,16], index: 1, kind: input, shape index: {}]   ;;  %s1659_s2 = inlined_call_operand.vmem [shape: bf16[16,16], index: 2, kind: input, shape index: {}]   ;;  %s1660_s3 = inlined_call_operand.vmem [shape: f32[1,16], index: 3, kind: input, shape index: {}]   ;;  %s1661_s4 = inlined_call_operand.vmem [shape: bf16[512,16], index: 4, kind: output, shape index: {}]  }
   0x1 LB: > { %s1014_s16 = sadd.s32 4294967295, %s1273_s15   ;;  %p1018_p0 = scmp.ge.s32.totalorder %s1273_s15, 1  ;;  %s1273_s15 = sphi %s1300_s15, %s14_s15  }
   0x2   : > { %p174_p1 = scmp.lt.s32.totalorder %s1273_s15, 3 }
   0x4   : > { %p175_p2 = pnand %p1018_p0, %p174_p1 }
   0x5   : > { %v1186_v0 = vld [vmem:[%s1659_s2] sm:$0xff] (!%p175_p2)   ;;  %s1019_s19 = sshll.u32 (!%p175_p2), %s1014_s16, 5  ;;  %vm351_vm0 = vcmask (!%p175_p2), 130048   ;;  %vm913_vm1 = vcmask (!%p175_p2), 125952  }
   0x6   : > { %178 = sbr.rel (%p175_p2) target bundleno = 306 (0x132), region = 36  ;;  %p206_p3 = scmp.lt.s32.totalorder (!%p175_p2), %s1019_s19, 63  ;;  %1142 = vmatprep.subr.bf16.mxu0 (!%p175_p2), %v1186_v0  ;;  %1176 = vmatprep.subr.bf16.mxu1 (!%p175_p2), %v1186_v0  ;;  %v1362_v17 = vld [vmem:[%s1660_s3] ss:$0 sm:$0xff] (!%p175_p2) }
   0x7   : > { %1143 = vmatpush3.bf16.msra.mxu0 (!%p175_p2), %v1186_v0  ;;  %1177 = vmatpush3.bf16.msra.mxu1 (!%p175_p2), %v1186_v0 }
   0xd   : > { %s1663_s19 = smov (!%p206_p3, %s1019_s19), 63 }
   0xe   : > { %s1022_s20 = sshll.u32 %s1663_s19, 2  ;;  %s1020_s24 = sshll.u32 %s1663_s19, 3 }
   0xf   : > { %s1319_s23 = scalar_lea.vmem %s1658_s1, %s1022_s20  ;;  %s1357_s27 = scalar_lea.vmem %s1657_s0, %s1020_s24 }
  0x10   : > { %v1187_v1 = vld [vmem:[%s1319_s23] sm:$0xff]   ;;  %v1189_v3 = vld [vmem:[%s1319_s23 + $0x8] sm:$0xff]   ;;  %v1191_v5 = vld [vmem:[%s1319_s23 + $0x10] sm:$0xff]   ;;  %s1442_s6 = scalar_lea.vmem %s1661_s4, %s1022_s20 }
  0x11   : > { %v1188_v2 = vld [vmem:[%s1319_s23 + $0x40] sm:$0xff]   ;;  %1144 = vmatprep.mubr.msk.bf16.mxu0 %vm351_vm0, %v1187_v1  ;;  %v1190_v4 = vld [vmem:[%s1319_s23 + $0x48] sm:$0xff]   ;;  %v1192_v6 = vld [vmem:[%s1319_s23 + $0x50] sm:$0xff]  }
  0x12   : > { %1160 = vmatprep.mubr.msk.bf16.mxu1 %vm351_vm0, %v1188_v2  ;;  %1145 = vmatmul.mubr.msk.bf16.vlgmr.msra.gmra.mrb[0].mxu0 %vm351_vm0, %v1189_v3  ;;  %v1193_v7 = vld [vmem:[%s1319_s23 + $0x18] sm:$0xff]   ;;  %v1195_v9 = vld [vmem:[%s1319_s23 + $0x20] sm:$0xff]   ;;  %v1197_v11 = vld [vmem:[%s1319_s23 + $0x28] sm:$0xff]  }
  0x13   : > { %1161 = vmatmul.mubr.msk.bf16.vlgmr.msra.gmra.mrb[0].mxu1 %vm351_vm0, %v1190_v4  ;;  %1148 = vmatprep.mubr.msk.bf16.mxu0 %vm351_vm0, %v1191_v5  ;;  %v1194_v8 = vld [vmem:[%s1319_s23 + $0x58] sm:$0xff]   ;;  %v1196_v10 = vld [vmem:[%s1319_s23 + $0x60] sm:$0xff]   ;;  %v1198_v12 = vld [vmem:[%s1319_s23 + $0x68] sm:$0xff]  }
  0x14   : > { %1164 = vmatprep.mubr.msk.bf16.mxu1 %vm351_vm0, %v1192_v6  ;;  %v1199_v13 = vld [vmem:[%s1319_s23 + $0x30] sm:$0xff]   ;;  %v1201_v15 = vld [vmem:[%s1319_s23 + $0x38] sm:$0xff]   ;;  %v561_v24 = vld [vmem:[%s1357_s27] sm:$0xff] }
  0x15   : > { %v1200_v14 = vld [vmem:[%s1319_s23 + $0x70] sm:$0xff]   ;;  %v1202_v16 = vld [vmem:[%s1319_s23 + $0x78] sm:$0xff]   ;;  %v577_v28 = vld [vmem:[%s1357_s27 + $0x80] sm:$0xff] }
  0x16   : > { %v563_v19 = vld [vmem:[%s1357_s27 + $0x10] sm:$0xff]  ;;  %v564_v30 = vld [vmem:[%s1357_s27 + $0x18] sm:$0xff]  ;;  %v562_v45 = vld [vmem:[%s1357_s27 + $0x8] sm:$0xff] }
  0x17   : > { %v579_v22 = vld [vmem:[%s1357_s27 + $0x90] sm:$0xff]  ;;  %v580_v44 = vld [vmem:[%s1357_s27 + $0x98] sm:$0xff]  ;;  %v578_v52 = vld [vmem:[%s1357_s27 + $0x88] sm:$0xff] }
  0x18   : > { %v567_v54 = vld [vmem:[%s1357_s27 + $0x30] sm:$0xff]  ;;  %v565_v5 = vld [vmem:[%s1357_s27 + $0x20] sm:$0xff] }
  0x19   : > { %v583_v59 = vld [vmem:[%s1357_s27 + $0xb0] sm:$0xff]  ;;  %v581_v6 = vld [vmem:[%s1357_s27 + $0xa0] sm:$0xff] }
  0x1a   : > { %1149 = vmatmul.mubr.msk.bf16.gmra.mrb[4].mxu0 %vm351_vm0, %v1193_v7 }
  0x1b   : > { %1165 = vmatmul.mubr.msk.bf16.gmra.mrb[4].mxu1 %vm351_vm0, %v1194_v8  ;;  %1152 = vmatprep.mubr.msk.bf16.mxu0 %vm351_vm0, %v1195_v9 }
  0x1c   : > { %1168 = vmatprep.mubr.msk.bf16.mxu1 %vm351_vm0, %v1196_v10 }
  0x22   : > { %1153 = vmatmul.mubr.msk.bf16.gmra.mrb[8].mxu0 %vm351_vm0, %v1197_v11 }
  0x23   : > { %1169 = vmatmul.mubr.msk.bf16.gmra.mrb[8].mxu1 %vm351_vm0, %v1198_v12  ;;  %1156 = vmatprep.mubr.msk.bf16.mxu0 %vm351_vm0, %v1199_v13 }
  0x24   : > { %1172 = vmatprep.mubr.msk.bf16.mxu1 %vm351_vm0, %v1200_v14 }
  0x2a   : > { %1157 = vmatmul.mubr.msk.bf16.gmra.mrb[12].mxu0 %vm351_vm0, %v1201_v15 }
  0x2b   : > { %1173 = vmatmul.mubr.msk.bf16.gmra.mrb[12].mxu1 %vm351_vm0, %v1202_v16 }
  0xe5   : > { %v1146_v18 = vpop.f32.mrb[0].mxu0 }
  0xe6   : > { %v443_v20 = vadd.f32 %v1146_v18, %v1362_v17  ;;  %v1162_v21 = vpop.f32.mrb[0].mxu1  ;;  %v434_v23 = vpop.f32.mrb[1].mxu0 }
  0xe7   : > { %v507_v25 = vadd.f32 %v1162_v21, %v1362_v17  ;;  %v435_v26 = vadd.f32 %v1362_v17, %v434_v23  ;;  %v498_v27 = vpop.f32.mrb[1].mxu1  ;;  %v1147_v29 = vpop.f32.mrb[2].mxu0  ;;  %v568_v21 = vld [vmem:[%s1357_s27 + $0x38] sm:$0xff] }
  0xe8   : > { %v595_v31 = vadd.f32 %v563_v19, %v443_v20  ;;  %v499_v32 = vadd.f32 %v1362_v17, %v498_v27  ;;  %v446_v33 = vadd.f32 %v1147_v29, %v1362_v17  ;;  %v1163_v34 = vpop.f32.mrb[2].mxu1  ;;  %v437_v35 = vpop.f32.mrb[3].mxu0 }
  0xe9   : > { %v611_v36 = vadd.f32 %v579_v22, %v507_v25  ;;  %v593_v37 = vadd.f32 %v561_v24, %v435_v26  ;;  %v510_v38 = vadd.f32 %v1163_v34, %v1362_v17  ;;  %v438_v39 = vadd.f32 %v1362_v17, %v437_v35  ;;  %v501_v40 = vpop.f32.mrb[3].mxu1  ;;  %v584_v24 = vld [vmem:[%s1357_s27 + $0xb8] sm:$0xff]  ;;  %v566_v26 = vld [vmem:[%s1357_s27 + $0x28] sm:$0xff] }
  0xea   : > { %v659_v41 = vmul.f32 0.70710677, %v595_v31  ;;  %v609_v42 = vadd.f32 %v577_v28, %v499_v32  ;;  %v596_v43 = vadd.f32 %v564_v30, %v446_v33  ;;  %v1380_v55 = vmul.f32 0.5, %v595_v31 }
  0xeb   : > { %v675_v46 = vmul.f32 0.70710677, %v611_v36  ;;  %v657_v47 = vmul.f32 0.70710677, %v593_v37  ;;  %v612_v50 = vadd.f32 %v580_v44, %v510_v38  ;;  %v594_v51 = vadd.f32 %v562_v45, %v438_v39 }
  0xec   : > { %1203 = verf.f32 %v659_v41  ;;  %v673_v48 = vmul.f32 0.70710677, %v609_v42  ;;  %v660_v49 = vmul.f32 0.70710677, %v596_v43  ;;  %v502_v56 = vadd.f32 %v1362_v17, %v501_v40 }
  0xed   : > { %1205 = verf.f32 %v675_v46  ;;  %v1150_v53 = vpop.f32.mrb[4].mxu0  ;;  %v1385_v61 = vmul.f32 0.5, %v611_v36  ;;  %v1387_v62 = vmul.f32 0.5, %v593_v37  ;;  %v676_v63 = vmul.f32 0.70710677, %v612_v50 }
  0xee   : > { %1207 = verf.f32 %v657_v47  ;;  %v459_v57 = vadd.f32 %v1150_v53, %v1362_v17  ;;  %v1166_v58 = vpop.f32.mrb[4].mxu1  ;;  %v450_v60 = vpop.f32.mrb[5].mxu0  ;;  %v658_v2 = vmul.f32 0.70710677, %v594_v51  ;;  %v610_v3 = vadd.f32 %v578_v52, %v502_v56 }
  0xef   : > { %1209 = verf.f32 %v673_v48  ;;  %v514_v0 = vpop.f32.mrb[5].mxu1  ;;  %v1151_v1 = vpop.f32.mrb[6].mxu0  ;;  %v523_v9 = vadd.f32 %v1166_v58, %v1362_v17  ;;  %v451_v10 = vadd.f32 %v1362_v17, %v450_v60  ;;  %v641_v13 = vmul.f32 0.5, %v609_v42 }
  0xf0   : > { %1211 = verf.f32 %v660_v49  ;;  %v599_v4 = vadd.f32 %v567_v54, %v459_v57  ;;  %v1167_v7 = vpop.f32.mrb[6].mxu1  ;;  %v453_v8 = vpop.f32.mrb[7].mxu0  ;;  %v515_v11 = vadd.f32 %v1362_v17, %v514_v0  ;;  %v1396_v14 = vmul.f32 0.5, %v596_v43 }
  0xf1   : > { %1213 = verf.f32 %v676_v63  ;;  %v1394_v12 = vpop.f32.mrb[7].mxu1  ;;  %v674_v15 = vmul.f32 0.70710677, %v610_v3  ;;  %v615_v18 = vadd.f32 %v583_v59, %v523_v9  ;;  %v597_v19 = vadd.f32 %v565_v5, %v451_v10  ;;  %v582_v9 = vld [vmem:[%s1357_s27 + $0xa8] sm:$0xff] }
  0xf2   : > { %1215 = verf.f32 %v658_v2  ;;  %v663_v16 = vmul.f32 0.70710677, %v599_v4  ;;  %v1398_v20 = vadd.f32 %v581_v6, %v515_v11  ;;  %v462_v22 = vadd.f32 %v1151_v1, %v1362_v17 }
  0xf3   : > { %1217 = verf.f32 %v674_v15  ;;  %v526_v23 = vadd.f32 %v1167_v7, %v1362_v17  ;;  %v454_v25 = vadd.f32 %v1362_v17, %v453_v8  ;;  %v644_v27 = vmul.f32 0.5, %v612_v50 }
  0xf4   : > { %v1406_v28 = vmul.f32 0.5, %v594_v51  ;;  %1219 = verf.f32 %v663_v16  ;;  %v679_v29 = vmul.f32 0.70710677, %v615_v18  ;;  %v1408_v32 = vmul.f32 0.5, %v610_v3 }
  0xf5   : > { %v1154_v30 = vpop.f32.mrb[8].mxu0  ;;  %v661_v33 = vmul.f32 0.70710677, %v597_v19  ;;  %v677_v34 = vmul.f32 0.70710677, %v1398_v20  ;;  %v1411_v35 = vadd.f32 %v568_v21, %v462_v22  ;;  %v1415_v39 = vadd.f32 %v584_v24, %v526_v23 }
  0xf6   : > { %v1204_v31 = vpop.eup %1203  ;;  %v1413_v36 = vpop.f32.mrb[8].mxu1  ;;  %1221 = verf.f32 %v679_v29  ;;  %v1417_v40 = vadd.f32 %v566_v26, %v454_v25  ;;  %v1423_v45 = vmul.f32 0.5, %v599_v4  ;;  %v1431_v52 = vmul.f32 0.5, %v615_v18 }
  0xf7   : > { %v1206_v37 = vpop.eup %1205  ;;  %v723_v38 = vadd.f32 1.0, %v1204_v31  ;;  %v1419_v41 = vpop.f32.mrb[9].mxu0  ;;  %1223 = verf.f32 %v661_v33  ;;  %v664_v46 = vmul.f32 0.70710677, %v1411_v35  ;;  %v1447_v1 = vmul.f32 0.5, %v597_v19 }
  0xf8   : > { %v1421_v42 = vpop.f32.mrb[9].mxu1  ;;  %v1208_v43 = vpop.eup %1207  ;;  %v739_v44 = vadd.f32 1.0, %v1206_v37  ;;  %1225 = verf.f32 %v677_v34  ;;  %v662_v8 = vmul.f32 0.70710677, %v1417_v40  ;;  %v518_v16 = vadd.f32 %v1362_v17, %v1394_v12 }
  0xf9   : > { %v1426_v47 = vpop.f32.mrb[10].mxu0  ;;  %v1428_v48 = vpop.f32.mrb[10].mxu1  ;;  %v755_v50 = vmul.f32 %v723_v38, %v1380_v55  ;;  %v721_v51 = vadd.f32 1.0, %v1208_v43  ;;  %1227 = verf.f32 %v664_v46  ;;  %v680_v55 = vmul.f32 0.70710677, %v1415_v39 }
  0xfa   : > { %v1210_v49 = vpop.eup %1209  ;;  %v1433_v53 = vpop.f32.mrb[11].mxu0  ;;  %v771_v57 = vmul.f32 %v739_v44, %v1385_v61  ;;  %v475_v18 = vadd.f32 %v1154_v30, %v1362_v17  ;;  %v1475_v29 = vadd.f32 %v582_v9, %v518_v16  ;;  %v645_v38 = vmul.f32 0.5, %v1398_v20 }
  0xfb   : > { %v1435_v54 = vpop.f32.mrb[11].mxu1  ;;  %v1212_v56 = vpop.eup %1211  ;;  %v737_v58 = vadd.f32 1.0, %v1210_v49  ;;  %v1095_v60 = vpack.c.bf16 %v755_v50, %v755_v50  ;;  %v753_v63 = vmul.f32 %v721_v51, %v1387_v62  ;;  %1229 = verf.f32 %v680_v55  ;;  %v571_v62 = vld [vmem:[%s1357_s27 + $0x50] sm:$0xff] }
  0xfc   : > { %v1214_v59 = vpop.eup %1213  ;;  %v724_v0 = vadd.f32 1.0, %v1212_v56  ;;  %v1111_v3 = vpack.c.bf16 %v771_v57, %v771_v57  ;;  %1231 = verf.f32 %v662_v8  ;;  %v1477_v30 = vadd.f32 %v571_v62, %v475_v18  ;;  %v587_v56 = vld [vmem:[%s1357_s27 + $0xd0] sm:$0xff] }
  0xfd   : > { %v1216_v2 = vpop.eup %1215  ;;  %v769_v4 = vmul.f32 %v737_v58, %v641_v13  ;;  %v740_v5 = vadd.f32 1.0, %v1214_v59  ;;  %916 = vst.msk [vmem:[%s1442_s6 + $0x8] sm:$0xf] %vm913_vm1, %v1095_v60  ;;  %v1093_v61 = vpack.c.bf16 %v753_v63, %v753_v63  ;;  %v1455_v10 = vpop.f32.mrb[12].mxu0  ;;  %v539_v43 = vadd.f32 %v1413_v36, %v1362_v17  ;;  %v569_v59 = vld [vmem:[%s1357_s27 + $0x40] sm:$0xff] }
  0xfe   : > { %v756_v6 = vmul.f32 %v724_v0, %v1396_v14  ;;  %v722_v7 = vadd.f32 1.0, %v1216_v2  ;;  %v1218_v11 = vpop.eup %1217  ;;  %932 = vst.msk [vmem:[%s1442_s6 + $0x48] sm:$0xf] %vm913_vm1, %v1111_v3  ;;  %v1462_v19 = vpop.f32.mrb[12].mxu1  ;;  %v678_v51 = vmul.f32 0.70710677, %v1475_v29 }
  0xff   : > { %v1109_v13 = vpack.c.bf16 %v769_v4, %v769_v4  ;;  %v772_v15 = vmul.f32 %v740_v5, %v644_v27  ;;  %v1464_v14 = vpop.f32.mrb[13].mxu0  ;;  %v1220_v21 = vpop.eup %1219  ;;  %914 = vst.msk [vmem:[%s1442_s6] sm:$0xf] %vm913_vm1, %v1093_v61  ;;  %v738_v24 = vadd.f32 1.0, %v1218_v11  ;;  %v632_v58 = vmul.f32 0.5, %v1411_v35 }
 0x100   : > { %v1096_v22 = vpack.c.bf16 %v756_v6, %v756_v6  ;;  %v754_v23 = vmul.f32 %v722_v7, %v1406_v28  ;;  %v1469_v25 = vpop.f32.mrb[13].mxu1  ;;  %v1471_v26 = vpop.f32.mrb[14].mxu0  ;;  %v727_v27 = vadd.f32 1.0, %v1220_v21  ;;  %v667_v55 = vmul.f32 0.70710677, %v1477_v30  ;;  %v585_v6 = vld [vmem:[%s1357_s27 + $0xc0] sm:$0xff] }
 0x101   : > { %930 = vst.msk [vmem:[%s1442_s6 + $0x40] sm:$0xf] %vm913_vm1, %v1109_v13  ;;  %v1112_v12 = vpack.c.bf16 %v772_v15, %v772_v15  ;;  %v1479_v31 = vpop.f32.mrb[14].mxu1  ;;  %v1481_v33 = vpop.f32.mrb[15].mxu0  ;;  %v770_v37 = vmul.f32 %v738_v24, %v1408_v32  ;;  %v467_v32 = vadd.f32 %v1362_v17, %v1419_v41  ;;  %1233 = verf.f32 %v678_v51  ;;  %v570_v24 = vld [vmem:[%s1357_s27 + $0x48] sm:$0xff] }
 0x102   : > { %v1222_v28 = vpop.eup %1221  ;;  %917 = vst.msk [vmem:[%s1442_s6 + $0xc] sm:$0xf] %vm913_vm1, %v1096_v22  ;;  %v1094_v34 = vpack.c.bf16 %v754_v23, %v754_v23  ;;  %v1489_v44 = vpop.f32.mrb[15].mxu1  ;;  %v759_v49 = vmul.f32 %v727_v27, %v1423_v45  ;;  %1235 = verf.f32 %v667_v55  ;;  %v1507_v3 = vadd.f32 %v587_v56, %v539_v43  ;;  %v572_v22 = vld [vmem:[%s1357_s27 + $0x58] sm:$0xff] }
 0x103   : > { %v1224_v46 = vpop.eup %1223  ;;  %933 = vst.msk [vmem:[%s1442_s6 + $0x4c] sm:$0xf] %vm913_vm1, %v1112_v12  ;;  %v743_v50 = vadd.f32 1.0, %v1222_v28  ;;  %v1110_v57 = vpack.c.bf16 %v770_v37, %v770_v37  ;;  %v1511_v61 = vadd.f32 %v569_v59, %v467_v32  ;;  %v648_v8 = vmul.f32 0.5, %v1415_v39  ;;  %v588_v23 = vld [vmem:[%s1357_s27 + $0xd8] sm:$0xff] }
 0x104   : > { %v1226_v20 = vpop.eup %1225  ;;  %915 = vst.msk [vmem:[%s1442_s6 + $0x4] sm:$0xf] %vm913_vm1, %v1094_v34  ;;  %v725_v36 = vadd.f32 1.0, %v1224_v46  ;;  %v1099_v60 = vpack.c.bf16 %v759_v49, %v759_v49  ;;  %v630_v11 = vmul.f32 0.5, %v1417_v40  ;;  %v683_v13 = vmul.f32 0.70710677, %v1507_v3 }
 0x105   : > { %v1228_v45 = vpop.eup %1227  ;;  %v775_v63 = vmul.f32 %v743_v50, %v1431_v52  ;;  %v741_v0 = vadd.f32 1.0, %v1226_v20  ;;  %931 = vst.msk [vmem:[%s1442_s6 + $0x44] sm:$0xf] %vm913_vm1, %v1110_v57  ;;  %v531_v52 = vadd.f32 %v1362_v17, %v1421_v42  ;;  %v665_v42 = vmul.f32 0.70710677, %v1511_v61  ;;  %v575_v49 = vld [vmem:[%s1357_s27 + $0x70] sm:$0xff] }
 0x106   : > { %v757_v41 = vmul.f32 %v725_v36, %v1447_v1  ;;  %v728_v2 = vadd.f32 1.0, %v1228_v45  ;;  %v1230_v35 = vpop.eup %1229  ;;  %920 = vst.msk [vmem:[%s1442_s6 + $0x18] sm:$0xf] %vm913_vm1, %v1099_v60  ;;  %v478_v39 = vadd.f32 %v1426_v47, %v1362_v17  ;;  %1237 = verf.f32 %v683_v13  ;;  %v591_v57 = vld [vmem:[%s1357_s27 + $0xf0] sm:$0xff] }
 0x107   : > { %v1115_v4 = vpack.c.bf16 %v775_v63, %v775_v63  ;;  %v773_v5 = vmul.f32 %v741_v0, %v645_v38  ;;  %v744_v9 = vadd.f32 1.0, %v1230_v35  ;;  %v1232_v15 = vpop.eup %1231  ;;  %v1524_v21 = vadd.f32 %v585_v6, %v531_v52  ;;  %v573_v63 = vld [vmem:[%s1357_s27 + $0x60] sm:$0xff] }
 0x108   : > { %v1097_v7 = vpack.c.bf16 %v757_v41, %v757_v41  ;;  %v760_v1 = vmul.f32 %v728_v2, %v632_v58  ;;  %v726_v40 = vadd.f32 1.0, %v1232_v15  ;;  %v542_v12 = vadd.f32 %v1428_v48, %v1362_v17 }
 0x109   : > { %936 = vst.msk [vmem:[%s1442_s6 + $0x58] sm:$0xf] %vm913_vm1, %v1115_v4  ;;  %v1113_v62 = vpack.c.bf16 %v773_v5, %v773_v5  ;;  %v776_v18 = vmul.f32 %v744_v9, %v648_v8  ;;  %v470_v27 = vadd.f32 %v1362_v17, %v1433_v53  ;;  %1239 = verf.f32 %v665_v42  ;;  %v586_v53 = vld [vmem:[%s1357_s27 + $0xc8] sm:$0xff]  ;;  %v576_v8 = vld [vmem:[%s1357_s27 + $0x78] sm:$0xff] }
 0x10a   : > { %918 = vst.msk [vmem:[%s1442_s6 + $0x10] sm:$0xf] %vm913_vm1, %v1097_v7  ;;  %v1100_v16 = vpack.c.bf16 %v760_v1, %v760_v1  ;;  %v681_v47 = vmul.f32 0.70710677, %v1524_v21  ;;  %v758_v34 = vmul.f32 %v726_v40, %v630_v11  ;;  %v1540_v37 = vadd.f32 %v572_v22, %v478_v39  ;;  %v589_v1 = vld [vmem:[%s1357_s27 + $0xe0] sm:$0xff]  ;;  %v592_v22 = vld [vmem:[%s1357_s27 + $0xf8] sm:$0xff] }
 0x10b   : > { %934 = vst.msk [vmem:[%s1442_s6 + $0x50] sm:$0xf] %vm913_vm1, %v1113_v62  ;;  %v1116_v28 = vpack.c.bf16 %v776_v18, %v776_v18  ;;  %v1542_v38 = vadd.f32 %v588_v23, %v542_v12  ;;  %v1544_v43 = vadd.f32 %v570_v24, %v470_v27  ;;  %v534_v48 = vadd.f32 %v1362_v17, %v1435_v54  ;;  %v1234_v51 = vpop.eup %1233  ;;  %v574_v24 = vld [vmem:[%s1357_s27 + $0x68] sm:$0xff] }
 0x10c   : > { %921 = vst.msk [vmem:[%s1442_s6 + $0x1c] sm:$0xf] %vm913_vm1, %v1100_v16  ;;  %1241 = verf.f32 %v681_v47  ;;  %v491_v46 = vadd.f32 %v1455_v10, %v1362_v17  ;;  %v555_v50 = vadd.f32 %v1462_v19, %v1362_v17  ;;  %v1098_v56 = vpack.c.bf16 %v758_v34, %v758_v34  ;;  %v1236_v36 = vpop.eup %1235 }
 0x10d   : > { %937 = vst.msk [vmem:[%s1442_s6 + $0x5c] sm:$0xf] %vm913_vm1, %v1116_v28  ;;  %v646_v32 = vmul.f32 0.5, %v1475_v29  ;;  %v668_v20 = vmul.f32 0.70710677, %v1540_v37  ;;  %v742_v58 = vadd.f32 1.0, %v1234_v51  ;;  %v1564_v19 = vadd.f32 %v586_v53, %v534_v48 }
 0x10e   : > { %v635_v54 = vmul.f32 0.5, %v1477_v30  ;;  %v684_v55 = vmul.f32 0.70710677, %v1542_v38  ;;  %v666_v10 = vmul.f32 0.70710677, %v1544_v43  ;;  %v731_v59 = vadd.f32 1.0, %v1236_v36 }
 0x10f   : > { %919 = vst.msk [vmem:[%s1442_s6 + $0x14] sm:$0xf] %vm913_vm1, %v1098_v56  ;;  %1243 = verf.f32 %v668_v20  ;;  %v1566_v45 = vadd.f32 %v575_v49, %v491_v46  ;;  %v774_v29 = vmul.f32 %v742_v58, %v646_v32  ;;  %v1568_v60 = vadd.f32 %v591_v57, %v555_v50 }
 0x110   : > { %1245 = verf.f32 %v684_v55  ;;  %v483_v30 = vadd.f32 %v1362_v17, %v1464_v14  ;;  %v763_v0 = vmul.f32 %v731_v59, %v635_v54  ;;  %v682_v41 = vmul.f32 0.70710677, %v1564_v19  ;;  %v1238_v52 = vpop.eup %1237 }
 0x111   : > { %1247 = verf.f32 %v666_v10  ;;  %v1114_v2 = vpack.c.bf16 %v774_v29, %v774_v29  ;;  %v651_v35 = vmul.f32 0.5, %v1507_v3  ;;  %v633_v4 = vmul.f32 0.5, %v1511_v61 }
 0x112   : > { %v671_v5 = vmul.f32 0.70710677, %v1566_v45  ;;  %v1103_v6 = vpack.c.bf16 %v763_v0, %v763_v0  ;;  %1249 = verf.f32 %v682_v41  ;;  %v687_v7 = vmul.f32 0.70710677, %v1568_v60 }
 0x113   : > { %v1578_v14 = vadd.f32 %v573_v63, %v483_v30  ;;  %v1240_v9 = vpop.eup %1239  ;;  %935 = vst.msk [vmem:[%s1442_s6 + $0x54] sm:$0xf] %vm913_vm1, %v1114_v2  ;;  %v747_v62 = vadd.f32 1.0, %v1238_v52  ;;  %v547_v3 = vadd.f32 %v1362_v17, %v1469_v25  ;;  %v494_v61 = vadd.f32 %v1471_v26, %v1362_v17 }
 0x114   : > { %1251 = verf.f32 %v671_v5  ;;  %924 = vst.msk [vmem:[%s1442_s6 + $0x28] sm:$0xf] %vm913_vm1, %v1103_v6  ;;  %v729_v11 = vadd.f32 1.0, %v1240_v9  ;;  %v649_v13 = vmul.f32 0.5, %v1524_v21  ;;  %v558_v25 = vadd.f32 %v1479_v31, %v1362_v17 }
 0x115   : > { %1253 = verf.f32 %v687_v7  ;;  %v669_v42 = vmul.f32 0.70710677, %v1578_v14  ;;  %v779_v16 = vmul.f32 %v747_v62, %v651_v35  ;;  %v1592_v18 = vadd.f32 %v589_v1, %v547_v3 }
 0x116   : > { %v1242_v15 = vpop.eup %1241  ;;  %v1594_v39 = vadd.f32 %v576_v8, %v494_v61  ;;  %v761_v26 = vmul.f32 %v729_v11, %v633_v4  ;;  %v486_v21 = vadd.f32 %v1362_v17, %v1481_v33  ;;  %v636_v12 = vmul.f32 0.5, %v1540_v37 }
 0x117   : > { %v745_v23 = vadd.f32 1.0, %v1242_v15  ;;  %1255 = verf.f32 %v669_v42  ;;  %v1119_v40 = vpack.c.bf16 %v779_v16, %v779_v16  ;;  %v652_v27 = vmul.f32 0.5, %v1542_v38  ;;  %v590_v38 = vld [vmem:[%s1357_s27 + $0xe8] sm:$0xff] }
 0x118   : > { %v685_v28 = vmul.f32 0.70710677, %v1592_v18  ;;  %v1101_v31 = vpack.c.bf16 %v761_v26, %v761_v26  ;;  %v672_v48 = vmul.f32 0.70710677, %v1594_v39  ;;  %v1606_v53 = vadd.f32 %v592_v22, %v558_v25 }
 0x119   : > { %v1244_v47 = vpop.eup %1243  ;;  %v777_v34 = vmul.f32 %v745_v23, %v649_v13  ;;  %940 = vst.msk [vmem:[%s1442_s6 + $0x68] sm:$0xf] %vm913_vm1, %v1119_v40  ;;  %v1610_v49 = vadd.f32 %v574_v24, %v486_v21  ;;  %v550_v37 = vadd.f32 %v1362_v17, %v1489_v44  ;;  %v634_v32 = vmul.f32 0.5, %v1544_v43 }
 0x11a   : > { %v1246_v46 = vpop.eup %1245  ;;  %v732_v33 = vadd.f32 1.0, %v1244_v47  ;;  %1257 = verf.f32 %v685_v28  ;;  %922 = vst.msk [vmem:[%s1442_s6 + $0x20] sm:$0xf] %vm913_vm1, %v1101_v31  ;;  %v650_v36 = vmul.f32 0.5, %v1564_v19  ;;  %v688_v58 = vmul.f32 0.70710677, %v1606_v53 }
 0x11b   : > { %v1248_v50 = vpop.eup %1247  ;;  %v1117_v51 = vpack.c.bf16 %v777_v34, %v777_v34  ;;  %v748_v56 = vadd.f32 1.0, %v1246_v46  ;;  %1259 = verf.f32 %v672_v48  ;;  %v639_v44 = vmul.f32 0.5, %v1566_v45 }
 0x11c   : > { %v764_v20 = vmul.f32 %v732_v33, %v636_v12  ;;  %v730_v57 = vadd.f32 1.0, %v1248_v50  ;;  %v1250_v54 = vpop.eup %1249  ;;  %v670_v55 = vmul.f32 0.70710677, %v1610_v49  ;;  %v622_v10 = vadd.f32 %v590_v38, %v550_v37 }
 0x11d   : > { %938 = vst.msk [vmem:[%s1442_s6 + $0x60] sm:$0xf] %vm913_vm1, %v1117_v51  ;;  %v780_v17 = vmul.f32 %v748_v56, %v652_v27  ;;  %v746_v30 = vadd.f32 1.0, %v1250_v54  ;;  %1261 = verf.f32 %v688_v58  ;;  %v655_v41 = vmul.f32 0.5, %v1568_v60 }
 0x11e   : > { %v1252_v59 = vpop.eup %1251  ;;  %v1104_v43 = vpack.c.bf16 %v764_v20, %v764_v20  ;;  %v762_v29 = vmul.f32 %v730_v57, %v634_v32  ;;  %1263 = verf.f32 %v670_v55  ;;  %v686_v4 = vmul.f32 0.70710677, %v622_v10 }
 0x11f   : > { %v1254_v19 = vpop.eup %1253  ;;  %v1120_v63 = vpack.c.bf16 %v780_v17, %v780_v17  ;;  %v735_v0 = vadd.f32 1.0, %v1252_v59  ;;  %v778_v2 = vmul.f32 %v746_v30, %v650_v36  ;;  %v637_v6 = vmul.f32 0.5, %v1578_v14 }
 0x120   : > { %925 = vst.msk [vmem:[%s1442_s6 + $0x2c] sm:$0xf] %vm913_vm1, %v1104_v43  ;;  %v1102_v45 = vpack.c.bf16 %v762_v29, %v762_v29  ;;  %v751_v35 = vadd.f32 1.0, %v1254_v19  ;;  %1265 = verf.f32 %v686_v4  ;;  %v653_v11 = vmul.f32 0.5, %v1592_v18 }
 0x121   : > { %v1256_v5 = vpop.eup %1255  ;;  %941 = vst.msk [vmem:[%s1442_s6 + $0x6c] sm:$0xf] %vm913_vm1, %v1120_v63  ;;  %v767_v52 = vmul.f32 %v735_v0, %v639_v44  ;;  %v1118_v7 = vpack.c.bf16 %v778_v2, %v778_v2  ;;  %v640_v42 = vmul.f32 0.5, %v1594_v39  ;;  %v656_v21 = vmul.f32 0.5, %v1606_v53 }
 0x122   : > { %923 = vst.msk [vmem:[%s1442_s6 + $0x24] sm:$0xf] %vm913_vm1, %v1102_v45  ;;  %v783_v60 = vmul.f32 %v751_v35, %v655_v41  ;;  %v733_v1 = vadd.f32 1.0, %v1256_v5  ;;  %v638_v40 = vmul.f32 0.5, %v1610_v49  ;;  %v654_v31 = vmul.f32 0.5, %v622_v10 }
 0x123   : > { %v1107_v8 = vpack.c.bf16 %v767_v52, %v767_v52  ;;  %939 = vst.msk [vmem:[%s1442_s6 + $0x64] sm:$0xf] %vm913_vm1, %v1118_v7 }
 0x124   : > { %v1258_v9 = vpop.eup %1257  ;;  %v1123_v62 = vpack.c.bf16 %v783_v60, %v783_v60  ;;  %v765_v3 = vmul.f32 %v733_v1, %v637_v6 }
 0x125   : > { %v1260_v61 = vpop.eup %1259  ;;  %928 = vst.msk [vmem:[%s1442_s6 + $0x38] sm:$0xf] %vm913_vm1, %v1107_v8  ;;  %v749_v13 = vadd.f32 1.0, %v1258_v9 }
 0x126   : > { %944 = vst.msk [vmem:[%s1442_s6 + $0x78] sm:$0xf] %vm913_vm1, %v1123_v62  ;;  %v1105_v14 = vpack.c.bf16 %v765_v3, %v765_v3  ;;  %v736_v15 = vadd.f32 1.0, %v1260_v61 }
 0x127   : > { %v781_v16 = vmul.f32 %v749_v13, %v653_v11  ;;  %v1262_v25 = vpop.eup %1261 }
 0x128   : > { %926 = vst.msk [vmem:[%s1442_s6 + $0x30] sm:$0xf] %vm913_vm1, %v1105_v14  ;;  %v768_v22 = vmul.f32 %v736_v15, %v640_v42  ;;  %v1264_v26 = vpop.eup %1263  ;;  %v752_v18 = vadd.f32 1.0, %v1262_v25 }
 0x129   : > { %v1121_v23 = vpack.c.bf16 %v781_v16, %v781_v16  ;;  %v734_v12 = vadd.f32 1.0, %v1264_v26 }
 0x12a   : > { %v1108_v24 = vpack.c.bf16 %v768_v22, %v768_v22  ;;  %v784_v39 = vmul.f32 %v752_v18, %v656_v21  ;;  %v1266_v27 = vpop.eup %1265 }
 0x12b   : > { %942 = vst.msk [vmem:[%s1442_s6 + $0x70] sm:$0xf] %vm913_vm1, %v1121_v23  ;;  %v766_v28 = vmul.f32 %v734_v12, %v638_v40  ;;  %v750_v34 = vadd.f32 1.0, %v1266_v27 }
 0x12c   : > { %929 = vst.msk [vmem:[%s1442_s6 + $0x3c] sm:$0xf] %vm913_vm1, %v1108_v24  ;;  %v1124_v47 = vpack.c.bf16 %v784_v39, %v784_v39 }
 0x12d   : > { %v1106_v48 = vpack.c.bf16 %v766_v28, %v766_v28  ;;  %v782_v53 = vmul.f32 %v750_v34, %v654_v31 }
 0x12e   : > { %945 = vst.msk [vmem:[%s1442_s6 + $0x7c] sm:$0xf] %vm913_vm1, %v1124_v47 }
 0x12f   : > { %927 = vst.msk [vmem:[%s1442_s6 + $0x34] sm:$0xf] %vm913_vm1, %v1106_v48  ;;  %v1122_v46 = vpack.c.bf16 %v782_v53, %v782_v53 }
 0x131   : > { %943 = vst.msk [vmem:[%s1442_s6 + $0x74] sm:$0xf] %vm913_vm1, %v1122_v46 }
 0x132 PF: > { %s14_s15 = sadd.s32 1, %s1273_s15  }
 0x133   : > { %p11_p4 = scmp.ge.s32.totalorder %s14_s15, 4  }
 0x135   :  { %13 = sbr.rel (!%p11_p4) target bundleno = 1 (0x1), region = 69 }

// kernel: fno2d_forward.11
= control target key start
LH: loop header
LB: loop body
LE: loop exit
PB: predicated region body
PF: predicated region fallthrough
CT: control target
= control target key end

     0   :  { %s1362_s18 = smov 0   ;;  %s1638_s0 = inlined_call_operand.vmem [shape: bf16[512,16], index: 0, kind: input, shape index: {}]   ;;  %s1639_s1 = inlined_call_operand.vmem [shape: bf16[16,32], index: 1, kind: input, shape index: {}]   ;;  %s1640_s2 = inlined_call_operand.vmem [shape: f32[1,32], index: 2, kind: input, shape index: {}]   ;;  %s1641_s3 = inlined_call_operand.vmem [shape: bf16[32,8], index: 3, kind: input, shape index: {}]   ;;  %s1642_s4 = inlined_call_operand.vmem [shape: f32[1,8], index: 4, kind: input, shape index: {}]   ;;  %s1643_s5 = inlined_call_operand.vmem [shape: f32[512,8], index: 5, kind: output, shape index: {}]  }
   0x1 LB: > { %s1064_s19 = sadd.s32 4294967295, %s1330_s18   ;;  %p1068_p0 = scmp.ge.s32.totalorder %s1330_s18, 1  ;;  %s1330_s18 = sphi %s1362_s18, %s15_s18  }
   0x2   : > { %p188_p1 = scmp.lt.s32.totalorder %s1330_s18, 3 }
   0x4   : > { %p189_p2 = pnand %p1068_p0, %p188_p1 }
   0x5   : > { %v1241_v0 = vld [vmem:[%s1639_s1] sm:$0xff] (!%p189_p2)   ;;  %s1069_s22 = sshll.u32 (!%p189_p2), %s1064_s19, 5  ;;  %vm356_vm0 = vcmask (!%p189_p2), 130048   ;;  %v1259_v18 = vld [vmem:[%s1641_s3 + $0x8] sm:$0xff] (!%p189_p2)   ;;  %vm765_vm1 = vcmask (!%p189_p2), 261120   ;;  %vm975_vm2 = vcmask (!%p189_p2), 64512  }
   0x6   : > { %192 = sbr.rel (%p189_p2) target bundleno = 529 (0x211), region = 40  ;;  %p217_p3 = scmp.lt.s32.totalorder (!%p189_p2), %s1069_s22, 63  ;;  %1163 = vmatprep.subr.bf16.mxu0 (!%p189_p2), %v1241_v0  ;;  %v1258_v17 = vld [vmem:[%s1641_s3] sm:$0xff] (!%p189_p2)  }
   0x7   : > { %1164 = vmatpush3.bf16.msra.mxu0 (!%p189_p2), %v1241_v0  ;;  %1197 = vmatprep.subr.bf16.mxu1 (!%p189_p2), %v1258_v17  ;;  %v1422_v19 = vld [vmem:[%s1640_s2] ss:$0 sm:$0xff] (!%p189_p2) }
   0x8   : > { %1198 = vmatpush3.bf16.msra.mxu1 (!%p189_p2), %v1258_v17 }
   0x9   : > { %1199 = vmatprep.subr.bf16.mxu1 (!%p189_p2), %v1259_v18 }
   0xc   : > { %1200 = vmatpush3.bf16.msra.mxu1 (!%p189_p2), %v1259_v18 }
   0xd   : > { %s1645_s22 = smov (!%p217_p3, %s1069_s22), 63 }
   0xe   : > { %s1070_s23 = sshll.u32 %s1645_s22, 2  ;;  %s1072_s8 = sshll.u32 %s1645_s22, 3 }
   0xf   : > { %s1379_s26 = scalar_lea.vmem %s1638_s0, %s1070_s23  ;;  %s1537_s13 = scalar_lea.vmem %s1643_s5, %s1072_s8 }
  0x10   : > { %v1242_v1 = vld [vmem:[%s1379_s26] sm:$0xff]   ;;  %v1243_v2 = vld [vmem:[%s1379_s26 + $0x8] sm:$0xff]   ;;  %v1244_v3 = vld [vmem:[%s1379_s26 + $0x10] sm:$0xff]  }
  0x11   : > { %1165 = vmatprep.mubr.msk.bf16.mxu0 %vm356_vm0, %v1242_v1  ;;  %v1245_v4 = vld [vmem:[%s1379_s26 + $0x18] sm:$0xff]   ;;  %v1246_v5 = vld [vmem:[%s1379_s26 + $0x20] sm:$0xff]   ;;  %v1247_v6 = vld [vmem:[%s1379_s26 + $0x28] sm:$0xff]  }
  0x12   : > { %1166 = vmatmul.mubr.msk.bf16.vlgmr.msra.gmra.mrb[0].mxu0 %vm356_vm0, %v1243_v2  ;;  %v1248_v7 = vld [vmem:[%s1379_s26 + $0x30] sm:$0xff]   ;;  %v1249_v8 = vld [vmem:[%s1379_s26 + $0x38] sm:$0xff]   ;;  %v1250_v9 = vld [vmem:[%s1379_s26 + $0x40] sm:$0xff]  }
  0x13   : > { %1169 = vmatprep.mubr.msk.bf16.mxu0 %vm356_vm0, %v1244_v3  ;;  %v1251_v10 = vld [vmem:[%s1379_s26 + $0x48] sm:$0xff]   ;;  %v1252_v11 = vld [vmem:[%s1379_s26 + $0x50] sm:$0xff]   ;;  %v1253_v12 = vld [vmem:[%s1379_s26 + $0x58] sm:$0xff]  }
  0x14   : > { %v1254_v13 = vld [vmem:[%s1379_s26 + $0x60] sm:$0xff]   ;;  %v1255_v14 = vld [vmem:[%s1379_s26 + $0x68] sm:$0xff]   ;;  %v1256_v15 = vld [vmem:[%s1379_s26 + $0x70] sm:$0xff]  }
  0x15   : > { %v1257_v16 = vld [vmem:[%s1379_s26 + $0x78] sm:$0xff]  }
  0x1a   : > { %1170 = vmatmul.mubr.msk.bf16.gmra.mrb[4].mxu0 %vm356_vm0, %v1245_v4 }
  0x1b   : > { %1173 = vmatprep.mubr.msk.bf16.mxu0 %vm356_vm0, %v1246_v5 }
  0x22   : > { %1174 = vmatmul.mubr.msk.bf16.gmra.mrb[8].mxu0 %vm356_vm0, %v1247_v6 }
  0x23   : > { %1177 = vmatprep.mubr.msk.bf16.mxu0 %vm356_vm0, %v1248_v7 }
  0x2a   : > { %1178 = vmatmul.mubr.msk.bf16.gmra.mrb[12].mxu0 %vm356_vm0, %v1249_v8 }
  0x2b   : > { %1181 = vmatprep.mubr.msk.bf16.mxu0 %vm356_vm0, %v1250_v9 }
  0x32   : > { %1182 = vmatmul.mubr.msk.bf16.gmra.mrb[16].mxu0 %vm356_vm0, %v1251_v10 }
  0x33   : > { %1185 = vmatprep.mubr.msk.bf16.mxu0 %vm356_vm0, %v1252_v11 }
  0x3a   : > { %1186 = vmatmul.mubr.msk.bf16.gmra.mrb[20].mxu0 %vm356_vm0, %v1253_v12 }
  0x3b   : > { %1189 = vmatprep.mubr.msk.bf16.mxu0 %vm356_vm0, %v1254_v13 }
  0x42   : > { %1190 = vmatmul.mubr.msk.bf16.gmra.mrb[24].mxu0 %vm356_vm0, %v1255_v14 }
  0x43   : > { %1193 = vmatprep.mubr.msk.bf16.mxu0 %vm356_vm0, %v1256_v15 }
  0x4a   : > { %1194 = vmatmul.mubr.msk.bf16.gmra.mrb[28].mxu0 %vm356_vm0, %v1257_v16 }
  0xe5   : > { %v1167_v20 = vpop.f32.mrb[0].mxu0 }
  0xe6   : > { %v448_v21 = vadd.f32 %v1167_v20, %v1422_v19  ;;  %v439_v22 = vpop.f32.mrb[1].mxu0 }
  0xe7   : > { %v440_v23 = vadd.f32 %v1422_v19, %v439_v22  ;;  %v1168_v24 = vpop.f32.mrb[2].mxu0 }
  0xe8   : > { %v600_v25 = vmul.f32 0.70710677, %v448_v21  ;;  %v451_v26 = vadd.f32 %v1168_v24, %v1422_v19  ;;  %v442_v27 = vpop.f32.mrb[3].mxu0  ;;  %v568_v52 = vmul.f32 0.5, %v448_v21 }
  0xe9   : > { %v598_v28 = vmul.f32 0.70710677, %v440_v23  ;;  %v443_v29 = vadd.f32 %v1422_v19, %v442_v27  ;;  %v566_v2 = vmul.f32 0.5, %v440_v23 }
  0xea   : > { %1260 = verf.f32 %v600_v25  ;;  %v601_v30 = vmul.f32 0.70710677, %v451_v26  ;;  %v569_v53 = vmul.f32 0.5, %v451_v26 }
  0xeb   : > { %1262 = verf.f32 %v598_v28  ;;  %v599_v31 = vmul.f32 0.70710677, %v443_v29  ;;  %v567_v3 = vmul.f32 0.5, %v443_v29 }
  0xec   : > { %1264 = verf.f32 %v601_v30 }
  0xed   : > { %1266 = verf.f32 %v599_v31  ;;  %v1171_v32 = vpop.f32.mrb[4].mxu0 }
  0xee   : > { %v464_v33 = vadd.f32 %v1171_v32, %v1422_v19  ;;  %v455_v34 = vpop.f32.mrb[5].mxu0 }
  0xef   : > { %v456_v35 = vadd.f32 %v1422_v19, %v455_v34  ;;  %v1172_v36 = vpop.f32.mrb[6].mxu0 }
  0xf0   : > { %v604_v37 = vmul.f32 0.70710677, %v464_v33  ;;  %v467_v38 = vadd.f32 %v1172_v36, %v1422_v19  ;;  %v458_v39 = vpop.f32.mrb[7].mxu0  ;;  %v572_v20 = vmul.f32 0.5, %v464_v33 }
  0xf1   : > { %v602_v40 = vmul.f32 0.70710677, %v456_v35  ;;  %v459_v41 = vadd.f32 %v1422_v19, %v458_v39  ;;  %v570_v25 = vmul.f32 0.5, %v456_v35 }
  0xf2   : > { %1268 = verf.f32 %v604_v37  ;;  %v605_v42 = vmul.f32 0.70710677, %v467_v38  ;;  %v573_v21 = vmul.f32 0.5, %v467_v38 }
  0xf3   : > { %1270 = verf.f32 %v602_v40  ;;  %v603_v43 = vmul.f32 0.70710677, %v459_v41  ;;  %v571_v26 = vmul.f32 0.5, %v459_v41 }
  0xf4   : > { %v1261_v44 = vpop.eup %1260  ;;  %1272 = verf.f32 %v605_v42 }
  0xf5   : > { %v1263_v45 = vpop.eup %1262  ;;  %v664_v46 = vadd.f32 1.0, %v1261_v44  ;;  %1274 = verf.f32 %v603_v43  ;;  %v1175_v47 = vpop.f32.mrb[8].mxu0 }
  0xf6   : > { %v1265_v48 = vpop.eup %1264  ;;  %v1433_v49 = vadd.f32 %v1175_v47, %v1422_v19  ;;  %v471_v50 = vpop.f32.mrb[9].mxu0  ;;  %v662_v60 = vadd.f32 1.0, %v1263_v45 }
  0xf7   : > { %v1267_v51 = vpop.eup %1266  ;;  %v665_v54 = vadd.f32 1.0, %v1265_v48  ;;  %v1436_v55 = vadd.f32 %v1422_v19, %v471_v50  ;;  %v1176_v56 = vpop.f32.mrb[10].mxu0  ;;  %v696_v62 = vmul.f32 %v664_v46, %v568_v52 }
  0xf8   : > { %v608_v57 = vmul.f32 0.70710677, %v1433_v49  ;;  %v1440_v58 = vadd.f32 %v1176_v56, %v1422_v19  ;;  %v474_v59 = vpop.f32.mrb[11].mxu0  ;;  %v663_v61 = vadd.f32 1.0, %v1267_v51  ;;  %v694_v8 = vmul.f32 %v662_v60, %v566_v2 }
  0xf9   : > { %v697_v63 = vmul.f32 %v665_v54, %v569_v53  ;;  %v606_v0 = vmul.f32 0.70710677, %v1436_v55  ;;  %v1444_v1 = vadd.f32 %v1422_v19, %v474_v59  ;;  %v576_v51 = vmul.f32 0.5, %v1433_v49 }
  0xfa   : > { %1276 = verf.f32 %v608_v57  ;;  %v609_v4 = vmul.f32 0.70710677, %v1440_v58  ;;  %v695_v9 = vmul.f32 %v663_v61, %v567_v3  ;;  %v577_v52 = vmul.f32 0.5, %v1440_v58 }
  0xfb   : > { %v727_v5 = vpack.c.bf16 %v697_v63, %v696_v62  ;;  %1278 = verf.f32 %v606_v0  ;;  %v607_v6 = vmul.f32 0.70710677, %v1444_v1  ;;  %v574_v57 = vmul.f32 0.5, %v1436_v55 }
  0xfc   : > { %v1269_v7 = vpop.eup %1268  ;;  %1280 = verf.f32 %v609_v4  ;;  %v726_v17 = vpack.c.bf16 %v695_v9, %v694_v8  ;;  %v575_v59 = vmul.f32 0.5, %v1444_v1 }
  0xfd   : > { %v1271_v10 = vpop.eup %1270  ;;  %v668_v11 = vadd.f32 1.0, %v1269_v7  ;;  %1282 = verf.f32 %v607_v6  ;;  %v1179_v12 = vpop.f32.mrb[12].mxu0 }
  0xfe   : > { %v1273_v13 = vpop.eup %1272  ;;  %v666_v14 = vadd.f32 1.0, %v1271_v10  ;;  %v1449_v15 = vadd.f32 %v1179_v12, %v1422_v19  ;;  %v487_v16 = vpop.f32.mrb[13].mxu0  ;;  %1201 = vmatprep.mubr.msk.bf16.mxu1 %vm765_vm1, %v726_v17 }
  0xff   : > { %v1275_v18 = vpop.eup %1274  ;;  %v669_v22 = vadd.f32 1.0, %v1273_v13  ;;  %v1452_v23 = vadd.f32 %v1422_v19, %v487_v16  ;;  %v1180_v24 = vpop.f32.mrb[14].mxu0  ;;  %v700_v30 = vmul.f32 %v668_v11, %v572_v20  ;;  %1202 = vmatmul.mubr.msk.bf16.vlgmr.msra.gmra.mrb[0].mxu1 %vm765_vm1, %v727_v5 }
 0x100   : > { %v667_v27 = vadd.f32 1.0, %v1275_v18  ;;  %v612_v28 = vmul.f32 0.70710677, %v1449_v15  ;;  %v490_v29 = vpop.f32.mrb[15].mxu0  ;;  %v499_v33 = vadd.f32 %v1180_v24, %v1422_v19  ;;  %v698_v34 = vmul.f32 %v666_v14, %v570_v25 }
 0x101   : > { %v701_v31 = vmul.f32 %v669_v22, %v573_v21  ;;  %v610_v32 = vmul.f32 0.70710677, %v1452_v23  ;;  %v491_v35 = vadd.f32 %v1422_v19, %v490_v29  ;;  %v580_v14 = vmul.f32 0.5, %v1449_v15 }
 0x102   : > { %v699_v36 = vmul.f32 %v667_v27, %v571_v26  ;;  %1284 = verf.f32 %v612_v28  ;;  %v613_v38 = vmul.f32 0.70710677, %v499_v33  ;;  %v578_v21 = vmul.f32 0.5, %v1452_v23 }
 0x103   : > { %v729_v37 = vpack.c.bf16 %v701_v31, %v700_v30  ;;  %1286 = verf.f32 %v610_v32  ;;  %v611_v41 = vmul.f32 0.70710677, %v491_v35  ;;  %v581_v22 = vmul.f32 0.5, %v499_v33 }
 0x104   : > { %v1277_v39 = vpop.eup %1276  ;;  %v728_v40 = vpack.c.bf16 %v699_v36, %v698_v34  ;;  %1288 = verf.f32 %v613_v38  ;;  %v579_v27 = vmul.f32 0.5, %v491_v35 }
 0x105   : > { %v1279_v42 = vpop.eup %1278  ;;  %v672_v43 = vadd.f32 1.0, %v1277_v39  ;;  %v1183_v44 = vpop.f32.mrb[16].mxu0  ;;  %1290 = verf.f32 %v611_v41 }
 0x106   : > { %v1281_v45 = vpop.eup %1280  ;;  %v670_v46 = vadd.f32 1.0, %v1279_v42  ;;  %v1461_v47 = vadd.f32 %v1183_v44, %v1422_v19  ;;  %v503_v48 = vpop.f32.mrb[17].mxu0  ;;  %1205 = vmatprep.mubr.msk.bf16.mxu1 %vm765_vm1, %v728_v40 }
 0x107   : > { %v1283_v50 = vpop.eup %1282  ;;  %v673_v53 = vadd.f32 1.0, %v1281_v45  ;;  %v1467_v54 = vadd.f32 %v1422_v19, %v503_v48  ;;  %v1184_v56 = vpop.f32.mrb[18].mxu0  ;;  %v704_v63 = vmul.f32 %v672_v43, %v576_v51  ;;  %1206 = vmatmul.mubr.msk.bf16.gmra.mrb[4].mxu1 %vm765_vm1, %v729_v37 }
 0x108   : > { %v671_v60 = vadd.f32 1.0, %v1283_v50  ;;  %v616_v61 = vmul.f32 0.70710677, %v1461_v47  ;;  %v506_v62 = vpop.f32.mrb[19].mxu0  ;;  %v515_v49 = vadd.f32 %v1184_v56, %v1422_v19  ;;  %v702_v58 = vmul.f32 %v670_v46, %v574_v57 }
 0x109   : > { %v705_v0 = vmul.f32 %v673_v53, %v577_v52  ;;  %v614_v2 = vmul.f32 0.70710677, %v1467_v54  ;;  %v507_v4 = vadd.f32 %v1422_v19, %v506_v62  ;;  %v584_v45 = vmul.f32 0.5, %v1461_v47 }
 0x10a   : > { %v703_v3 = vmul.f32 %v671_v60, %v575_v59  ;;  %1292 = verf.f32 %v616_v61  ;;  %v617_v1 = vmul.f32 0.70710677, %v515_v49  ;;  %v582_v52 = vmul.f32 0.5, %v1467_v54 }
 0x10b   : > { %v731_v55 = vpack.c.bf16 %v705_v0, %v704_v63  ;;  %1294 = verf.f32 %v614_v2  ;;  %v615_v7 = vmul.f32 0.70710677, %v507_v4  ;;  %v585_v53 = vmul.f32 0.5, %v515_v49 }
 0x10c   : > { %v1285_v5 = vpop.eup %1284  ;;  %v730_v6 = vpack.c.bf16 %v703_v3, %v702_v58  ;;  %1296 = verf.f32 %v617_v1  ;;  %v583_v60 = vmul.f32 0.5, %v507_v4 }
 0x10d   : > { %v1287_v8 = vpop.eup %1286  ;;  %v1187_v9 = vpop.f32.mrb[20].mxu0  ;;  %v676_v10 = vadd.f32 1.0, %v1285_v5  ;;  %1298 = verf.f32 %v615_v7 }
 0x10e   : > { %v1477_v11 = vadd.f32 %v1187_v9, %v1422_v19  ;;  %v519_v12 = vpop.f32.mrb[21].mxu0  ;;  %1209 = vmatprep.mubr.msk.bf16.mxu1 %vm765_vm1, %v730_v6  ;;  %v1289_v13 = vpop.eup %1288  ;;  %v674_v16 = vadd.f32 1.0, %v1287_v8 }
 0x10f   : > { %v1482_v17 = vadd.f32 %v1422_v19, %v519_v12  ;;  %v1188_v18 = vpop.f32.mrb[22].mxu0  ;;  %v1291_v20 = vpop.eup %1290  ;;  %v677_v24 = vadd.f32 1.0, %v1289_v13  ;;  %1210 = vmatmul.mubr.msk.bf16.gmra.mrb[8].mxu1 %vm765_vm1, %v731_v55  ;;  %v708_v15 = vmul.f32 %v676_v10, %v580_v14 }
 0x110   : > { %v620_v25 = vmul.f32 0.70710677, %v1477_v11  ;;  %v522_v26 = vpop.f32.mrb[23].mxu0  ;;  %v675_v28 = vadd.f32 1.0, %v1291_v20  ;;  %v1488_v30 = vadd.f32 %v1188_v18, %v1422_v19  ;;  %v706_v23 = vmul.f32 %v674_v16, %v578_v21 }
 0x111   : > { %v618_v29 = vmul.f32 0.70710677, %v1482_v17  ;;  %v709_v31 = vmul.f32 %v677_v24, %v581_v22  ;;  %v1492_v32 = vadd.f32 %v1422_v19, %v522_v26  ;;  %v588_v12 = vmul.f32 0.5, %v1477_v11 }
 0x112   : > { %1300 = verf.f32 %v620_v25  ;;  %v707_v33 = vmul.f32 %v675_v28, %v579_v27  ;;  %v621_v34 = vmul.f32 0.70710677, %v1488_v30  ;;  %v586_v20 = vmul.f32 0.5, %v1482_v17 }
 0x113   : > { %1302 = verf.f32 %v618_v29  ;;  %v733_v35 = vpack.c.bf16 %v709_v31, %v708_v15  ;;  %v619_v37 = vmul.f32 0.70710677, %v1492_v32  ;;  %v589_v21 = vmul.f32 0.5, %v1488_v30 }
 0x114   : > { %v1293_v36 = vpop.eup %1292  ;;  %v732_v39 = vpack.c.bf16 %v707_v33, %v706_v23  ;;  %1304 = verf.f32 %v621_v34  ;;  %v587_v26 = vmul.f32 0.5, %v1492_v32 }
 0x115   : > { %v1295_v38 = vpop.eup %1294  ;;  %v1191_v40 = vpop.f32.mrb[24].mxu0  ;;  %v680_v41 = vadd.f32 1.0, %v1293_v36  ;;  %1306 = verf.f32 %v619_v37 }
 0x116   : > { %v1497_v42 = vadd.f32 %v1191_v40, %v1422_v19  ;;  %v535_v43 = vpop.f32.mrb[25].mxu0  ;;  %v1297_v44 = vpop.eup %1296  ;;  %v678_v46 = vadd.f32 1.0, %v1295_v38  ;;  %1213 = vmatprep.mubr.msk.bf16.mxu1 %vm765_vm1, %v732_v39 }
 0x117   : > { %v1501_v48 = vadd.f32 %v1422_v19, %v535_v43  ;;  %v1192_v50 = vpop.f32.mrb[26].mxu0  ;;  %v1299_v51 = vpop.eup %1298  ;;  %v681_v56 = vadd.f32 1.0, %v1297_v44  ;;  %1214 = vmatmul.mubr.msk.bf16.gmra.mrb[12].mxu1 %vm765_vm1, %v733_v35  ;;  %v712_v63 = vmul.f32 %v680_v41, %v584_v45 }
 0x118   : > { %v624_v57 = vmul.f32 0.70710677, %v1497_v42  ;;  %v538_v59 = vpop.f32.mrb[27].mxu0  ;;  %v679_v61 = vadd.f32 1.0, %v1299_v51  ;;  %v547_v47 = vadd.f32 %v1192_v50, %v1422_v19  ;;  %v710_v58 = vmul.f32 %v678_v46, %v582_v52 }
 0x119   : > { %v622_v62 = vmul.f32 0.70710677, %v1501_v48  ;;  %v713_v0 = vmul.f32 %v681_v56, %v585_v53  ;;  %v539_v2 = vadd.f32 %v1422_v19, %v538_v59  ;;  %v592_v41 = vmul.f32 0.5, %v1497_v42 }
 0x11a   : > { %1308 = verf.f32 %v624_v57  ;;  %v711_v54 = vmul.f32 %v679_v61, %v583_v60  ;;  %v625_v49 = vmul.f32 0.70710677, %v547_v47  ;;  %v590_v44 = vmul.f32 0.5, %v1501_v48 }
 0x11b   : > { %1310 = verf.f32 %v622_v62  ;;  %v735_v55 = vpack.c.bf16 %v713_v0, %v712_v63  ;;  %v623_v1 = vmul.f32 0.70710677, %v539_v2  ;;  %v591_v45 = vmul.f32 0.5, %v539_v2 }
 0x11c   : > { %v1301_v3 = vpop.eup %1300  ;;  %v734_v5 = vpack.c.bf16 %v711_v54, %v710_v58  ;;  %1312 = verf.f32 %v625_v49 }
 0x11d   : > { %v1303_v4 = vpop.eup %1302  ;;  %v1195_v6 = vpop.f32.mrb[28].mxu0  ;;  %v684_v7 = vadd.f32 1.0, %v1301_v3  ;;  %1314 = verf.f32 %v623_v1 }
 0x11e   : > { %v560_v8 = vadd.f32 %v1195_v6, %v1422_v19  ;;  %v551_v9 = vpop.f32.mrb[29].mxu0  ;;  %v1305_v10 = vpop.eup %1304  ;;  %v682_v13 = vadd.f32 1.0, %v1303_v4  ;;  %1217 = vmatprep.mubr.msk.bf16.mxu1 %vm765_vm1, %v734_v5  ;;  %v1532_v6 = vld [vmem:[%s1642_s4] ss:$0 sm:$0xff] }
 0x11f   : > { %v552_v14 = vadd.f32 %v1422_v19, %v551_v9  ;;  %v1196_v16 = vpop.f32.mrb[30].mxu0  ;;  %v1307_v18 = vpop.eup %1306  ;;  %v685_v22 = vadd.f32 1.0, %v1305_v10  ;;  %1218 = vmatmul.mubr.msk.bf16.gmra.mrb[16].mxu1 %vm765_vm1, %v735_v55  ;;  %v716_v29 = vmul.f32 %v684_v7, %v588_v12 }
 0x120   : > { %v628_v24 = vmul.f32 0.70710677, %v560_v8  ;;  %v554_v25 = vpop.f32.mrb[31].mxu0  ;;  %v683_v27 = vadd.f32 1.0, %v1307_v18  ;;  %v563_v11 = vadd.f32 %v1196_v16, %v1422_v19  ;;  %v714_v23 = vmul.f32 %v682_v13, %v586_v20 }
 0x121   : > { %v626_v28 = vmul.f32 0.70710677, %v552_v14  ;;  %v717_v15 = vmul.f32 %v685_v22, %v589_v21  ;;  %v555_v31 = vadd.f32 %v1422_v19, %v554_v25  ;;  %v593_v19 = vmul.f32 0.5, %v547_v47 }
 0x122   : > { %1316 = verf.f32 %v628_v24  ;;  %v715_v17 = vmul.f32 %v683_v27, %v587_v26  ;;  %v629_v30 = vmul.f32 0.70710677, %v563_v11  ;;  %v596_v48 = vmul.f32 0.5, %v560_v8 }
 0x123   : > { %1318 = verf.f32 %v626_v28  ;;  %v737_v34 = vpack.c.bf16 %v717_v15, %v716_v29  ;;  %v627_v36 = vmul.f32 0.70710677, %v555_v31  ;;  %v597_v47 = vmul.f32 0.5, %v563_v11 }
 0x124   : > { %v1309_v33 = vpop.eup %1308  ;;  %v736_v32 = vpack.c.bf16 %v715_v17, %v714_v23  ;;  %1320 = verf.f32 %v629_v30  ;;  %v594_v2 = vmul.f32 0.5, %v552_v14  ;;  %v595_v58 = vmul.f32 0.5, %v555_v31 }
 0x125   : > { %v1311_v35 = vpop.eup %1310  ;;  %v688_v37 = vadd.f32 1.0, %v1309_v33  ;;  %1322 = verf.f32 %v627_v36 }
 0x126   : > { %v1313_v38 = vpop.eup %1312  ;;  %v686_v39 = vadd.f32 1.0, %v1311_v35  ;;  %1221 = vmatprep.mubr.msk.bf16.mxu1 %vm765_vm1, %v736_v32 }
 0x127   : > { %v1315_v40 = vpop.eup %1314  ;;  %v689_v43 = vadd.f32 1.0, %v1313_v38  ;;  %1222 = vmatmul.mubr.msk.bf16.gmra.mrb[20].mxu1 %vm765_vm1, %v737_v34  ;;  %v720_v50 = vmul.f32 %v688_v37, %v592_v41 }
 0x128   : > { %v687_v46 = vadd.f32 1.0, %v1315_v40  ;;  %v718_v52 = vmul.f32 %v686_v39, %v590_v44 }
 0x129   : > { %v721_v51 = vmul.f32 %v689_v43, %v593_v19 }
 0x12a   : > { %v719_v53 = vmul.f32 %v687_v46, %v591_v45 }
 0x12b   : > { %v739_v57 = vpack.c.bf16 %v721_v51, %v720_v50 }
 0x12c   : > { %v1317_v56 = vpop.eup %1316  ;;  %v738_v60 = vpack.c.bf16 %v719_v53, %v718_v52 }
 0x12d   : > { %v1319_v59 = vpop.eup %1318  ;;  %v692_v61 = vadd.f32 1.0, %v1317_v56 }
 0x12e   : > { %v1321_v62 = vpop.eup %1320  ;;  %v690_v63 = vadd.f32 1.0, %v1319_v59  ;;  %1225 = vmatprep.mubr.msk.bf16.mxu1 %vm765_vm1, %v738_v60 }
 0x12f   : > { %v1323_v42 = vpop.eup %1322  ;;  %v693_v0 = vadd.f32 1.0, %v1321_v62  ;;  %1226 = vmatmul.mubr.msk.bf16.gmra.mrb[24].mxu1 %vm765_vm1, %v739_v57  ;;  %v724_v49 = vmul.f32 %v692_v61, %v596_v48 }
 0x130   : > { %v691_v54 = vadd.f32 1.0, %v1323_v42  ;;  %v722_v55 = vmul.f32 %v690_v63, %v594_v2 }
 0x131   : > { %v725_v3 = vmul.f32 %v693_v0, %v597_v47 }
 0x132   : > { %v723_v1 = vmul.f32 %v691_v54, %v595_v58 }
 0x133   : > { %v741_v4 = vpack.c.bf16 %v725_v3, %v724_v49 }
 0x134   : > { %v740_v5 = vpack.c.bf16 %v723_v1, %v722_v55 }
 0x136   : > { %1229 = vmatprep.mubr.msk.bf16.mxu1 %vm765_vm1, %v740_v5 }
 0x137   : > { %1230 = vmatmul.mubr.msk.bf16.gmra.mrb[28].mxu1 %vm765_vm1, %v741_v4 }
 0x1d2   : > { %v1203_v7 = vpop.f32.mrb[0].mxu1 }
 0x1d3   : > { %v857_v8 = vadd.f32 %v1203_v7, %v1532_v6  ;;  %v848_v9 = vpop.f32.mrb[1].mxu1 }
 0x1d4   : > { %v849_v10 = vadd.f32 %v1532_v6, %v848_v9  ;;  %v1204_v12 = vpop.f32.mrb[2].mxu1 }
 0x1d5   : > { %978 = vst.msk [vmem:[%s1537_s13 + $0x10] sm:$0xff] %vm975_vm2, %v857_v8  ;;  %v860_v13 = vadd.f32 %v1204_v12, %v1532_v6  ;;  %v851_v14 = vpop.f32.mrb[3].mxu1 }
 0x1d6   : > { %976 = vst.msk [vmem:[%s1537_s13] sm:$0xff] %vm975_vm2, %v849_v10  ;;  %v852_v16 = vadd.f32 %v1532_v6, %v851_v14 }
 0x1d7   : > { %979 = vst.msk [vmem:[%s1537_s13 + $0x18] sm:$0xff] %vm975_vm2, %v860_v13 }
 0x1d8   : > { %977 = vst.msk [vmem:[%s1537_s13 + $0x8] sm:$0xff] %vm975_vm2, %v852_v16 }
 0x1da   : > { %v1207_v18 = vpop.f32.mrb[4].mxu1 }
 0x1db   : > { %v873_v20 = vadd.f32 %v1207_v18, %v1532_v6  ;;  %v864_v21 = vpop.f32.mrb[5].mxu1 }
 0x1dc   : > { %v865_v22 = vadd.f32 %v1532_v6, %v864_v21  ;;  %v1208_v24 = vpop.f32.mrb[6].mxu1 }
 0x1dd   : > { %982 = vst.msk [vmem:[%s1537_s13 + $0x30] sm:$0xff] %vm975_vm2, %v873_v20  ;;  %v876_v25 = vadd.f32 %v1208_v24, %v1532_v6  ;;  %v867_v26 = vpop.f32.mrb[7].mxu1 }
 0x1de   : > { %980 = vst.msk [vmem:[%s1537_s13 + $0x20] sm:$0xff] %vm975_vm2, %v865_v22  ;;  %v868_v27 = vadd.f32 %v1532_v6, %v867_v26 }
 0x1df   : > { %983 = vst.msk [vmem:[%s1537_s13 + $0x38] sm:$0xff] %vm975_vm2, %v876_v25 }
 0x1e0   : > { %981 = vst.msk [vmem:[%s1537_s13 + $0x28] sm:$0xff] %vm975_vm2, %v868_v27 }
 0x1e2   : > { %v1211_v28 = vpop.f32.mrb[8].mxu1 }
 0x1e3   : > { %v889_v11 = vadd.f32 %v1211_v28, %v1532_v6  ;;  %v880_v29 = vpop.f32.mrb[9].mxu1 }
 0x1e4   : > { %v881_v15 = vadd.f32 %v1532_v6, %v880_v29  ;;  %v1212_v31 = vpop.f32.mrb[10].mxu1 }
 0x1e5   : > { %986 = vst.msk [vmem:[%s1537_s13 + $0x50] sm:$0xff] %vm975_vm2, %v889_v11  ;;  %v892_v23 = vadd.f32 %v1212_v31, %v1532_v6  ;;  %v883_v17 = vpop.f32.mrb[11].mxu1 }
 0x1e6   : > { %984 = vst.msk [vmem:[%s1537_s13 + $0x40] sm:$0xff] %vm975_vm2, %v881_v15  ;;  %v884_v30 = vadd.f32 %v1532_v6, %v883_v17 }
 0x1e7   : > { %987 = vst.msk [vmem:[%s1537_s13 + $0x58] sm:$0xff] %vm975_vm2, %v892_v23 }
 0x1e8   : > { %985 = vst.msk [vmem:[%s1537_s13 + $0x48] sm:$0xff] %vm975_vm2, %v884_v30 }
 0x1ea   : > { %v1215_v33 = vpop.f32.mrb[12].mxu1 }
 0x1eb   : > { %v905_v34 = vadd.f32 %v1215_v33, %v1532_v6  ;;  %v896_v36 = vpop.f32.mrb[13].mxu1 }
 0x1ec   : > { %v897_v35 = vadd.f32 %v1532_v6, %v896_v36  ;;  %v1216_v32 = vpop.f32.mrb[14].mxu1 }
 0x1ed   : > { %990 = vst.msk [vmem:[%s1537_s13 + $0x70] sm:$0xff] %vm975_vm2, %v905_v34  ;;  %v908_v37 = vadd.f32 %v1216_v32, %v1532_v6  ;;  %v899_v38 = vpop.f32.mrb[15].mxu1 }
 0x1ee   : > { %988 = vst.msk [vmem:[%s1537_s13 + $0x60] sm:$0xff] %vm975_vm2, %v897_v35  ;;  %v900_v39 = vadd.f32 %v1532_v6, %v899_v38 }
 0x1ef   : > { %991 = vst.msk [vmem:[%s1537_s13 + $0x78] sm:$0xff] %vm975_vm2, %v908_v37 }
 0x1f0   : > { %989 = vst.msk [vmem:[%s1537_s13 + $0x68] sm:$0xff] %vm975_vm2, %v900_v39 }
 0x1f2   : > { %v1219_v40 = vpop.f32.mrb[16].mxu1 }
 0x1f3   : > { %v921_v41 = vadd.f32 %v1219_v40, %v1532_v6  ;;  %v912_v19 = vpop.f32.mrb[17].mxu1 }
 0x1f4   : > { %v913_v43 = vadd.f32 %v1532_v6, %v912_v19  ;;  %v1220_v44 = vpop.f32.mrb[18].mxu1 }
 0x1f5   : > { %994 = vst.msk [vmem:[%s1537_s13 + $0x90] sm:$0xff] %vm975_vm2, %v921_v41  ;;  %v924_v45 = vadd.f32 %v1220_v44, %v1532_v6  ;;  %v915_v46 = vpop.f32.mrb[19].mxu1 }
 0x1f6   : > { %992 = vst.msk [vmem:[%s1537_s13 + $0x80] sm:$0xff] %vm975_vm2, %v913_v43  ;;  %v916_v50 = vadd.f32 %v1532_v6, %v915_v46 }
 0x1f7   : > { %995 = vst.msk [vmem:[%s1537_s13 + $0x98] sm:$0xff] %vm975_vm2, %v924_v45 }
 0x1f8   : > { %993 = vst.msk [vmem:[%s1537_s13 + $0x88] sm:$0xff] %vm975_vm2, %v916_v50 }
 0x1fa   : > { %v1223_v51 = vpop.f32.mrb[20].mxu1 }
 0x1fb   : > { %v937_v52 = vadd.f32 %v1223_v51, %v1532_v6  ;;  %v928_v53 = vpop.f32.mrb[21].mxu1 }
 0x1fc   : > { %v929_v56 = vadd.f32 %v1532_v6, %v928_v53  ;;  %v1224_v57 = vpop.f32.mrb[22].mxu1 }
 0x1fd   : > { %998 = vst.msk [vmem:[%s1537_s13 + $0xb0] sm:$0xff] %vm975_vm2, %v937_v52  ;;  %v940_v59 = vadd.f32 %v1224_v57, %v1532_v6  ;;  %v931_v60 = vpop.f32.mrb[23].mxu1 }
 0x1fe   : > { %996 = vst.msk [vmem:[%s1537_s13 + $0xa0] sm:$0xff] %vm975_vm2, %v929_v56  ;;  %v932_v61 = vadd.f32 %v1532_v6, %v931_v60 }
 0x1ff   : > { %999 = vst.msk [vmem:[%s1537_s13 + $0xb8] sm:$0xff] %vm975_vm2, %v940_v59 }
 0x200   : > { %997 = vst.msk [vmem:[%s1537_s13 + $0xa8] sm:$0xff] %vm975_vm2, %v932_v61 }
 0x202   : > { %v1227_v62 = vpop.f32.mrb[24].mxu1 }
 0x203   : > { %v953_v63 = vadd.f32 %v1227_v62, %v1532_v6  ;;  %v944_v42 = vpop.f32.mrb[25].mxu1 }
 0x204   : > { %v945_v48 = vadd.f32 %v1532_v6, %v944_v42  ;;  %v1228_v47 = vpop.f32.mrb[26].mxu1 }
 0x205   : > { %1002 = vst.msk [vmem:[%s1537_s13 + $0xd0] sm:$0xff] %vm975_vm2, %v953_v63  ;;  %v956_v0 = vadd.f32 %v1228_v47, %v1532_v6  ;;  %v947_v2 = vpop.f32.mrb[27].mxu1 }
 0x206   : > { %1000 = vst.msk [vmem:[%s1537_s13 + $0xc0] sm:$0xff] %vm975_vm2, %v945_v48  ;;  %v948_v58 = vadd.f32 %v1532_v6, %v947_v2 }
 0x207   : > { %1003 = vst.msk [vmem:[%s1537_s13 + $0xd8] sm:$0xff] %vm975_vm2, %v956_v0 }
 0x208   : > { %1001 = vst.msk [vmem:[%s1537_s13 + $0xc8] sm:$0xff] %vm975_vm2, %v948_v58 }
 0x20a   : > { %v1231_v54 = vpop.f32.mrb[28].mxu1 }
 0x20b   : > { %v969_v49 = vadd.f32 %v1231_v54, %v1532_v6  ;;  %v960_v3 = vpop.f32.mrb[29].mxu1 }
 0x20c   : > { %v961_v55 = vadd.f32 %v1532_v6, %v960_v3  ;;  %v1232_v1 = vpop.f32.mrb[30].mxu1 }
 0x20d   : > { %1006 = vst.msk [vmem:[%s1537_s13 + $0xf0] sm:$0xff] %vm975_vm2, %v969_v49  ;;  %v972_v4 = vadd.f32 %v1232_v1, %v1532_v6  ;;  %v963_v5 = vpop.f32.mrb[31].mxu1 }
 0x20e   : > { %1004 = vst.msk [vmem:[%s1537_s13 + $0xe0] sm:$0xff] %vm975_vm2, %v961_v55  ;;  %v964_v7 = vadd.f32 %v1532_v6, %v963_v5 }
 0x20f   : > { %1007 = vst.msk [vmem:[%s1537_s13 + $0xf8] sm:$0xff] %vm975_vm2, %v972_v4 }
 0x210   : > { %1005 = vst.msk [vmem:[%s1537_s13 + $0xe8] sm:$0xff] %vm975_vm2, %v964_v7 }
 0x211 PF: > { %s15_s18 = sadd.s32 1, %s1330_s18  }
 0x212   : > { %p12_p4 = scmp.ge.s32.totalorder %s15_s18, 4  }
 0x214   :  { %14 = sbr.rel (!%p12_p4) target bundleno = 1 (0x1), region = 70 }

</bundles_post_ra>
